<compile_context>
chip_gen: v7x
topology: tpu7x:2x2x1
jax: 0.10.0
libtpu: 0.0.40
codegen_flags: <defaults>
</compile_context>

<pallas_src>
import jax
import jax.numpy as jnp
from jax.experimental import pallas as pl
from jax.experimental.pallas import tpu as pltpu

F32 = jnp.float32
BF16 = jnp.bfloat16
BN_EPS = 1e-5

# tiny synthetic "icosphere" sizes (level -> vertex / face counts)
V = {l: 16 * (2 ** l) for l in range(1, 6)}      # V1..V5 = 32, 64, 128, 256, 512
FACES = {l: 2 * V[l] - 4 for l in range(1, 6)}


# -------------------------- parameter construction --------------------------

def _bn_fold(key, c):
    k1, k2, k3, k4 = jax.random.split(key, 4)
    gamma = 0.5 + jax.random.uniform(k1, (c,), F32)
    beta = 0.1 * jax.random.normal(k2, (c,), F32)
    mean = 0.1 * jax.random.normal(k3, (c,), F32)
    var = 0.5 + jax.random.uniform(k4, (c,), F32)
    scale = gamma / jnp.sqrt(var + BN_EPS)
    shift = beta - mean * scale
    return scale, shift


def _conv1x1_bn(key, cin, cout):
    """1x1 Conv1d + eval BatchNorm folded: returns (bf16 weight (cout,cin), f32 bias (cout,1))."""
    kw, kb, kbn = jax.random.split(key, 3)
    w = jax.random.normal(kw, (cout, cin), F32) / jnp.sqrt(cin)
    b = 0.1 * jax.random.normal(kb, (cout,), F32)
    scale, shift = _bn_fold(kbn, cout)
    w_f = (scale[:, None] * w).astype(BF16)
    b_f = (scale * b + shift).reshape(cout, 1).astype(F32)
    return w_f, b_f


def _meshconv_bn(key, cin, cout, cin_pad=None):
    """MeshConv channel-mix weights (k-order [id, lap, ew, ns]) flattened to (cout, 4*cin_pad),
    with eval BatchNorm folded in. Padded input channels get zero weights (exactness preserved)."""
    kw, kb, kbn = jax.random.split(key, 3)
    cin_pad = cin if cin_pad is None else cin_pad
    coeffs = jax.random.normal(kw, (cout, 4, cin), F32) / jnp.sqrt(4.0 * cin)
    b = 0.1 * jax.random.normal(kb, (cout,), F32)
    scale, shift = _bn_fold(kbn, cout)
    coeffs = scale[:, None, None] * coeffs
    if cin_pad != cin:
        coeffs = jnp.pad(coeffs, ((0, 0), (0, 0), (0, cin_pad - cin)))
    w_f = coeffs.reshape(cout, 4 * cin_pad).astype(BF16)
    b_f = (scale * b + shift).reshape(cout, 1).astype(F32)
    return w_f, b_f


def _mesh_ops(key, vin, nv, nf):
    """Synthetic dense stand-ins for the sparse icosphere operators. The fixed chain
    F2V @ (tangent-weighted gradient) is folded into dense (vin, nv) operators, and
    [Laplacian | EW-grad | NS-grad] are concatenated into ONE (vin, 3*nv) bf16 matrix."""
    kG, kE, kN, kL, kF = jax.random.split(key, 5)
    G = jax.random.normal(kG, (3 * nf, vin), F32) / jnp.sqrt(vin)     # vertex->face gradient
    EW = jax.random.normal(kE, (nf, 3), F32)                          # east-west field
    NS = jax.random.normal(kN, (nf, 3), F32)                          # north-south field
    L = jax.random.normal(kL, (nv, vin), F32) / jnp.sqrt(vin)         # (restricted) Laplacian
    F2V = jax.random.normal(kF, (nv, nf), F32) / jnp.sqrt(nf)         # face->vertex average
    Gr = G.reshape(3, nf, vin)
    ew_face = jnp.einsum("fd,dfv->fv", EW, Gr)
    ns_face = jnp.einsum("fd,dfv->fv", NS, Gr)
    D_ew = F2V @ ew_face
    D_ns = F2V @ ns_face
    ops = jnp.concatenate([L.T, D_ew.T, D_ns.T], axis=1)              # (vin, 3*nv)
    return ops.astype(BF16)


def init_params(key, feat=8, nclasses=10, cin=6, cin_pad=8):
    """Flat ordered param list:
    [in_ops, in_w, in_b] + 3 * [ops, w1, b1, w2, b2, w3, b3, w_short, b_short] + [fc_w, fc_b]."""
    keys = iter(jax.random.split(key, 32))
    params = []
    # in_block: MeshConv(6, feat, icosphere_5, stride=2) + BN (+ ReLU inside kernel)
    params.append(_mesh_ops(next(keys), V[5], V[4], FACES[5]))
    params.extend(_meshconv_bn(next(keys), cin, feat, cin_pad=cin_pad))
    # ResBlocks (coarsen=True -> mesh at level-1; DownSamp hoisted into the kernel)
    block_cfg = [(feat, feat, 4 * feat, 4),
                 (4 * feat, 4 * feat, 16 * feat, 3),
                 (16 * feat, 16 * feat, 64 * feat, 2)]
    for cin_b, neck, cout, level in block_cfg:
        l = level - 1
        params.append(_mesh_ops(next(keys), V[l], V[l], FACES[l]))
        params.extend(_conv1x1_bn(next(keys), cin_b, neck))      # conv1 + bn1
        params.extend(_meshconv_bn(next(keys), neck, neck))      # conv2 (MeshConv) + bn2
        params.extend(_conv1x1_bn(next(keys), neck, cout))       # conv3 + bn3
        params.extend(_conv1x1_bn(next(keys), cin_b, cout))      # shortcut conv_ + bn_
    kfc1, kfc2 = jax.random.split(next(keys))
    fc_w = jax.random.normal(kfc1, (nclasses, 64 * feat), F32) / jnp.sqrt(64.0 * feat)
    fc_b = 0.1 * jax.random.normal(kfc2, (nclasses, 1), F32)
    params.extend([fc_w, fc_b])
    return params


# ------------------------------ fused forward -------------------------------

def build_forward(feat=8, nclasses=10, cin=6, cin_pad=8):
    nv_in = V[5]                 # 512 input vertices
    nv0 = V[4]                   # 256 after the stride-2 in_block
    block_nv = [V[3], V[2], V[1]]  # 128, 64, 32

    def kernel(*refs):
        o_ref = refs[-1]
        it = iter(refs[:-1])
        x_ref = next(it)
        in_ops, in_w, in_b = next(it), next(it), next(it)
        blk = [tuple(next(it) for _ in range(9)) for _ in range(3)]
        fc_w, fc_b = next(it), next(it)

        def conv1x1(w_ref, b_ref, x, relu):
            # 1x1 Conv1d with folded eval-BatchNorm; bf16 operands, f32 accumulate.
            y = jnp.dot(w_ref[...], x.astype(BF16),
                        preferred_element_type=F32) + b_ref[...]
            return jnp.maximum(y, 0.0) if relu else y

        def meshconv(ops_ref, w_ref, b_ref, x, nv, relu):
            # One matmul for [lap | ew | ns] features, one matmul for the 4-way channel mix.
            feats = jnp.dot(x.astype(BF16), ops_ref[...],
                            preferred_element_type=F32)          # (cin, 3*nv) f32
            stacked = jnp.concatenate(
                [x[:, :nv], feats[:, :nv], feats[:, nv:2 * nv], feats[:, 2 * nv:3 * nv]],
                axis=0)                                           # (4*cin, nv)
            y = jnp.dot(w_ref[...], stacked.astype(BF16),
                        preferred_element_type=F32) + b_ref[...]
            return jnp.maximum(y, 0.0) if relu else y

        # in_block: MeshConv(stride=2) + BN + ReLU
        h = meshconv(in_ops, in_w, in_b, x_ref[...], nv0, relu=True)   # (feat, 256)

        # Three ResBlocks (coarsen=True). DownSamp commutes with the 1x1 conv / eval-BN
        # that precedes it, so it is hoisted to the input of both branches.
        for nv, (ops, w1, b1, w2, b2, w3, b3, ws, bs) in zip(block_nv, blk):
            x_ds = h[:, :nv]
            x2 = conv1x1(ws, bs, x_ds, relu=False)                 # shortcut: conv_ + bn_
            t = conv1x1(w1, b1, x_ds, relu=True)                   # conv1 + bn1 + relu
            t = meshconv(ops, w2, b2, t, nv, relu=True)            # MeshConv + bn2 + relu
            t = conv1x1(w3, b3, t, relu=False)                     # conv3 + bn3
            h = jnp.maximum(t + x2, 0.0)                           # residual add + relu

        # head: avg-pool over all remaining vertices + (eval) dropout + Linear + log_softmax
        pooled = jnp.sum(h, axis=1, keepdims=True) * (1.0 / block_nv[-1])   # (64*feat, 1)
        logits = jnp.dot(fc_w[...], pooled, preferred_element_type=F32) + fc_b[...]  # (K, 1)
        m = jnp.max(logits, axis=0, keepdims=True)
        s = logits - m
        lse = jnp.log(jnp.sum(jnp.exp(s), axis=0, keepdims=True))
        o_ref[...] = (s - lse).astype(o_ref.dtype)

    def forward(params, x):
        B = x.shape[0]
        # zero-pad the 6 input channels to 8 (weights for the pad channels are zero).
        x8 = jnp.pad(x, ((0, 0), (0, cin_pad - x.shape[1]), (0, 0)))
        in_specs = [pl.BlockSpec((None, cin_pad, nv_in), lambda b: (b, 0, 0))]
        for p in params:
            in_specs.append(pl.BlockSpec(p.shape, lambda b, nd=p.ndim: (0,) * nd))
        out = pl.pallas_call(
            kernel,
            out_shape=jax.ShapeDtypeStruct((B, nclasses, 1), F32),
            grid=(B,),
            in_specs=in_specs,
            out_specs=pl.BlockSpec((None, nclasses, 1), lambda b: (b, 0, 0)),
            compiler_params=pltpu.CompilerParams(
                dimension_semantics=("parallel",)),   # batch across TCs on v7x
        )(x8, *params)
        return out[:, :, 0]

    return jax.jit(forward)


# ----------------------------------- main -----------------------------------

if __name__ == "__main__":
    FEAT = 8
    NCLASSES = 10
    BATCH = 2

    key = jax.random.PRNGKey(0)
    kp, kx = jax.random.split(key)
    params = init_params(kp, feat=FEAT, nclasses=NCLASSES)
    x = jax.random.normal(kx, (BATCH, 6, V[5]), F32)   # (B, 6 input channels, level-5 vertices)

    forward = build_forward(feat=FEAT, nclasses=NCLASSES)
    out = forward(params, x)
    out = jax.block_until_ready(out)

    assert out.shape == (BATCH, NCLASSES), out.shape
    assert bool(jnp.all(jnp.isfinite(out)))
    # rows of log_softmax must sum to ~1 in probability space
    assert bool(jnp.allclose(jnp.sum(jnp.exp(out), axis=1), 1.0, atol=1e-4))
    print("KERNEL_OK")
</pallas_src>

<mosaic_0001>
module attributes {stable_mosaic.version = 11 : i64} {
  func.func @kernel(%arg0: i32, %arg1: memref<1x8x512xf32, #tpu.memory_space<vmem>>, %arg2: memref<512x768xbf16, #tpu.memory_space<vmem>>, %arg3: memref<8x32xbf16, #tpu.memory_space<vmem>>, %arg4: memref<8x1xf32, #tpu.memory_space<vmem>>, %arg5: memref<128x384xbf16, #tpu.memory_space<vmem>>, %arg6: memref<8x8xbf16, #tpu.memory_space<vmem>>, %arg7: memref<8x1xf32, #tpu.memory_space<vmem>>, %arg8: memref<8x32xbf16, #tpu.memory_space<vmem>>, %arg9: memref<8x1xf32, #tpu.memory_space<vmem>>, %arg10: memref<32x8xbf16, #tpu.memory_space<vmem>>, %arg11: memref<32x1xf32, #tpu.memory_space<vmem>>, %arg12: memref<32x8xbf16, #tpu.memory_space<vmem>>, %arg13: memref<32x1xf32, #tpu.memory_space<vmem>>, %arg14: memref<64x192xbf16, #tpu.memory_space<vmem>>, %arg15: memref<32x32xbf16, #tpu.memory_space<vmem>>, %arg16: memref<32x1xf32, #tpu.memory_space<vmem>>, %arg17: memref<32x128xbf16, #tpu.memory_space<vmem>>, %arg18: memref<32x1xf32, #tpu.memory_space<vmem>>, %arg19: memref<128x32xbf16, #tpu.memory_space<vmem>>, %arg20: memref<128x1xf32, #tpu.memory_space<vmem>>, %arg21: memref<128x32xbf16, #tpu.memory_space<vmem>>, %arg22: memref<128x1xf32, #tpu.memory_space<vmem>>, %arg23: memref<32x96xbf16, #tpu.memory_space<vmem>>, %arg24: memref<128x128xbf16, #tpu.memory_space<vmem>>, %arg25: memref<128x1xf32, #tpu.memory_space<vmem>>, %arg26: memref<128x512xbf16, #tpu.memory_space<vmem>>, %arg27: memref<128x1xf32, #tpu.memory_space<vmem>>, %arg28: memref<512x128xbf16, #tpu.memory_space<vmem>>, %arg29: memref<512x1xf32, #tpu.memory_space<vmem>>, %arg30: memref<512x128xbf16, #tpu.memory_space<vmem>>, %arg31: memref<512x1xf32, #tpu.memory_space<vmem>>, %arg32: memref<10x512xf32, #tpu.memory_space<vmem>>, %arg33: memref<10x1xf32, #tpu.memory_space<vmem>>, %arg34: memref<1x10x1xf32, #tpu.memory_space<vmem>>) attributes {dimension_semantics = [#tpu.dimension_semantics<parallel>], iteration_bounds = array<i64: 2>, scalar_prefetch = 0 : i64, scratch_operands = 0 : i64, tpu.core_type = #tpu.core_type<tc>, window_params = [{transform_indices = @transform_0, window_bounds = array<i64: 1, 8, 512>}, {pipeline_mode = #tpu.pipeline_mode<synchronous>, transform_indices = @transform_1, window_bounds = array<i64: 512, 768>}, {pipeline_mode = #tpu.pipeline_mode<synchronous>, transform_indices = @transform_2, window_bounds = array<i64: 8, 32>}, {pipeline_mode = #tpu.pipeline_mode<synchronous>, transform_indices = @transform_3, window_bounds = array<i64: 8, 1>}, {pipeline_mode = #tpu.pipeline_mode<synchronous>, transform_indices = @transform_4, window_bounds = array<i64: 128, 384>}, {pipeline_mode = #tpu.pipeline_mode<synchronous>, transform_indices = @transform_5, window_bounds = array<i64: 8, 8>}, {pipeline_mode = #tpu.pipeline_mode<synchronous>, transform_indices = @transform_6, window_bounds = array<i64: 8, 1>}, {pipeline_mode = #tpu.pipeline_mode<synchronous>, transform_indices = @transform_7, window_bounds = array<i64: 8, 32>}, {pipeline_mode = #tpu.pipeline_mode<synchronous>, transform_indices = @transform_8, window_bounds = array<i64: 8, 1>}, {pipeline_mode = #tpu.pipeline_mode<synchronous>, transform_indices = @transform_9, window_bounds = array<i64: 32, 8>}, {pipeline_mode = #tpu.pipeline_mode<synchronous>, transform_indices = @transform_10, window_bounds = array<i64: 32, 1>}, {pipeline_mode = #tpu.pipeline_mode<synchronous>, transform_indices = @transform_11, window_bounds = array<i64: 32, 8>}, {pipeline_mode = #tpu.pipeline_mode<synchronous>, transform_indices = @transform_12, window_bounds = array<i64: 32, 1>}, {pipeline_mode = #tpu.pipeline_mode<synchronous>, transform_indices = @transform_13, window_bounds = array<i64: 64, 192>}, {pipeline_mode = #tpu.pipeline_mode<synchronous>, transform_indices = @transform_14, window_bounds = array<i64: 32, 32>}, {pipeline_mode = #tpu.pipeline_mode<synchronous>, transform_indices = @transform_15, window_bounds = array<i64: 32, 1>}, {pipeline_mode = #tpu.pipeline_mode<synchronous>, transform_indices = @transform_16, window_bounds = array<i64: 32, 128>}, {pipeline_mode = #tpu.pipeline_mode<synchronous>, transform_indices = @transform_17, window_bounds = array<i64: 32, 1>}, {pipeline_mode = #tpu.pipeline_mode<synchronous>, transform_indices = @transform_18, window_bounds = array<i64: 128, 32>}, {pipeline_mode = #tpu.pipeline_mode<synchronous>, transform_indices = @transform_19, window_bounds = array<i64: 128, 1>}, {pipeline_mode = #tpu.pipeline_mode<synchronous>, transform_indices = @transform_20, window_bounds = array<i64: 128, 32>}, {pipeline_mode = #tpu.pipeline_mode<synchronous>, transform_indices = @transform_21, window_bounds = array<i64: 128, 1>}, {pipeline_mode = #tpu.pipeline_mode<synchronous>, transform_indices = @transform_22, window_bounds = array<i64: 32, 96>}, {pipeline_mode = #tpu.pipeline_mode<synchronous>, transform_indices = @transform_23, window_bounds = array<i64: 128, 128>}, {pipeline_mode = #tpu.pipeline_mode<synchronous>, transform_indices = @transform_24, window_bounds = array<i64: 128, 1>}, {pipeline_mode = #tpu.pipeline_mode<synchronous>, transform_indices = @transform_25, window_bounds = array<i64: 128, 512>}, {pipeline_mode = #tpu.pipeline_mode<synchronous>, transform_indices = @transform_26, window_bounds = array<i64: 128, 1>}, {pipeline_mode = #tpu.pipeline_mode<synchronous>, transform_indices = @transform_27, window_bounds = array<i64: 512, 128>}, {pipeline_mode = #tpu.pipeline_mode<synchronous>, transform_indices = @transform_28, window_bounds = array<i64: 512, 1>}, {pipeline_mode = #tpu.pipeline_mode<synchronous>, transform_indices = @transform_29, window_bounds = array<i64: 512, 128>}, {pipeline_mode = #tpu.pipeline_mode<synchronous>, transform_indices = @transform_30, window_bounds = array<i64: 512, 1>}, {pipeline_mode = #tpu.pipeline_mode<synchronous>, transform_indices = @transform_31, window_bounds = array<i64: 10, 512>}, {pipeline_mode = #tpu.pipeline_mode<synchronous>, transform_indices = @transform_32, window_bounds = array<i64: 10, 1>}, {transform_indices = @transform_33, window_bounds = array<i64: 1, 10, 1>}]} {
    %c0 = arith.constant 0 : index
    %c0_0 = arith.constant 0 : index
    %c0_1 = arith.constant 0 : index
    %0 = vector.load %arg1[%c0, %c0_0, %c0_1] : memref<1x8x512xf32, #tpu.memory_space<vmem>>, vector<1x8x512xf32>
    %1 = vector.shape_cast %0 : vector<1x8x512xf32> to vector<8x512xf32>
    %2 = arith.truncf %1 : vector<8x512xf32> to vector<8x512xbf16>
    %c0_2 = arith.constant 0 : index
    %c0_3 = arith.constant 0 : index
    %3 = vector.load %arg2[%c0_2, %c0_3] : memref<512x768xbf16, #tpu.memory_space<vmem>>, vector<512x768xbf16>
    %cst = arith.constant dense<0.000000e+00> : vector<8x768xf32>
    %4 = tpu.matmul %2, %3, %cst {dimension_numbers = #tpu.dot_dimension_numbers<[1], [0], [0], [1], [0, 0, 1, 1], [], []>} : vector<8x512xbf16>, vector<512x768xbf16>, vector<8x768xf32> -> vector<8x768xf32>
    %5 = vector.extract_strided_slice %1 {offsets = [0, 0], sizes = [8, 256], strides = [1, 1]} : vector<8x512xf32> to vector<8x256xf32>
    %6 = vector.extract_strided_slice %4 {offsets = [0, 0], sizes = [8, 256], strides = [1, 1]} : vector<8x768xf32> to vector<8x256xf32>
    %7 = vector.extract_strided_slice %4 {offsets = [0, 256], sizes = [8, 256], strides = [1, 1]} : vector<8x768xf32> to vector<8x256xf32>
    %8 = vector.extract_strided_slice %4 {offsets = [0, 512], sizes = [8, 256], strides = [1, 1]} : vector<8x768xf32> to vector<8x256xf32>
    %9 = tpu.concatenate %5, %6, %7, %8 in 0 : vector<8x256xf32>, vector<8x256xf32>, vector<8x256xf32>, vector<8x256xf32> -> vector<32x256xf32>
    %c0_4 = arith.constant 0 : index
    %c0_5 = arith.constant 0 : index
    %10 = vector.load %arg3[%c0_4, %c0_5] : memref<8x32xbf16, #tpu.memory_space<vmem>>, vector<8x32xbf16>
    %11 = arith.truncf %9 : vector<32x256xf32> to vector<32x256xbf16>
    %cst_6 = arith.constant dense<0.000000e+00> : vector<8x256xf32>
    %12 = tpu.matmul %10, %11, %cst_6 {dimension_numbers = #tpu.dot_dimension_numbers<[1], [0], [0], [1], [0, 0, 1, 1], [], []>} : vector<8x32xbf16>, vector<32x256xbf16>, vector<8x256xf32> -> vector<8x256xf32>
    %c0_7 = arith.constant 0 : index
    %c0_8 = arith.constant 0 : index
    %13 = vector.load %arg4[%c0_7, %c0_8] : memref<8x1xf32, #tpu.memory_space<vmem>>, vector<8x1xf32>
    %14 = vector.broadcast %13 : vector<8x1xf32> to vector<8x256xf32>
    %15 = arith.addf %12, %14 : vector<8x256xf32>
    %cst_9 = arith.constant 0.000000e+00 : f32
    %16 = vector.broadcast %cst_9 : f32 to vector<8x256xf32>
    %17 = arith.maximumf %15, %16 : vector<8x256xf32>
    %18 = vector.extract_strided_slice %17 {offsets = [0, 0], sizes = [8, 128], strides = [1, 1]} : vector<8x256xf32> to vector<8x128xf32>
    %c0_10 = arith.constant 0 : index
    %c0_11 = arith.constant 0 : index
    %19 = vector.load %arg12[%c0_10, %c0_11] : memref<32x8xbf16, #tpu.memory_space<vmem>>, vector<32x8xbf16>
    %20 = arith.truncf %18 : vector<8x128xf32> to vector<8x128xbf16>
    %cst_12 = arith.constant dense<0.000000e+00> : vector<32x128xf32>
    %21 = tpu.matmul %19, %20, %cst_12 {dimension_numbers = #tpu.dot_dimension_numbers<[1], [0], [0], [1], [0, 0, 1, 1], [], []>} : vector<32x8xbf16>, vector<8x128xbf16>, vector<32x128xf32> -> vector<32x128xf32>
    %c0_13 = arith.constant 0 : index
    %c0_14 = arith.constant 0 : index
    %22 = vector.load %arg13[%c0_13, %c0_14] : memref<32x1xf32, #tpu.memory_space<vmem>>, vector<32x1xf32>
    %23 = vector.broadcast %22 : vector<32x1xf32> to vector<32x128xf32>
    %24 = arith.addf %21, %23 : vector<32x128xf32>
    %c0_15 = arith.constant 0 : index
    %c0_16 = arith.constant 0 : index
    %25 = vector.load %arg6[%c0_15, %c0_16] : memref<8x8xbf16, #tpu.memory_space<vmem>>, vector<8x8xbf16>
    %26 = arith.truncf %18 : vector<8x128xf32> to vector<8x128xbf16>
    %cst_17 = arith.constant dense<0.000000e+00> : vector<8x128xf32>
    %27 = tpu.matmul %25, %26, %cst_17 {dimension_numbers = #tpu.dot_dimension_numbers<[1], [0], [0], [1], [0, 0, 1, 1], [], []>} : vector<8x8xbf16>, vector<8x128xbf16>, vector<8x128xf32> -> vector<8x128xf32>
    %c0_18 = arith.constant 0 : index
    %c0_19 = arith.constant 0 : index
    %28 = vector.load %arg7[%c0_18, %c0_19] : memref<8x1xf32, #tpu.memory_space<vmem>>, vector<8x1xf32>
    %29 = vector.broadcast %28 : vector<8x1xf32> to vector<8x128xf32>
    %30 = arith.addf %27, %29 : vector<8x128xf32>
    %cst_20 = arith.constant 0.000000e+00 : f32
    %31 = vector.broadcast %cst_20 : f32 to vector<8x128xf32>
    %32 = arith.maximumf %30, %31 : vector<8x128xf32>
    %33 = arith.truncf %32 : vector<8x128xf32> to vector<8x128xbf16>
    %c0_21 = arith.constant 0 : index
    %c0_22 = arith.constant 0 : index
    %34 = vector.load %arg5[%c0_21, %c0_22] : memref<128x384xbf16, #tpu.memory_space<vmem>>, vector<128x384xbf16>
    %cst_23 = arith.constant dense<0.000000e+00> : vector<8x384xf32>
    %35 = tpu.matmul %33, %34, %cst_23 {dimension_numbers = #tpu.dot_dimension_numbers<[1], [0], [0], [1], [0, 0, 1, 1], [], []>} : vector<8x128xbf16>, vector<128x384xbf16>, vector<8x384xf32> -> vector<8x384xf32>
    %36 = vector.extract_strided_slice %35 {offsets = [0, 0], sizes = [8, 128], strides = [1, 1]} : vector<8x384xf32> to vector<8x128xf32>
    %37 = vector.extract_strided_slice %35 {offsets = [0, 128], sizes = [8, 128], strides = [1, 1]} : vector<8x384xf32> to vector<8x128xf32>
    %38 = vector.extract_strided_slice %35 {offsets = [0, 256], sizes = [8, 128], strides = [1, 1]} : vector<8x384xf32> to vector<8x128xf32>
    %39 = tpu.concatenate %32, %36, %37, %38 in 0 : vector<8x128xf32>, vector<8x128xf32>, vector<8x128xf32>, vector<8x128xf32> -> vector<32x128xf32>
    %c0_24 = arith.constant 0 : index
    %c0_25 = arith.constant 0 : index
    %40 = vector.load %arg8[%c0_24, %c0_25] : memref<8x32xbf16, #tpu.memory_space<vmem>>, vector<8x32xbf16>
    %41 = arith.truncf %39 : vector<32x128xf32> to vector<32x128xbf16>
    %cst_26 = arith.constant dense<0.000000e+00> : vector<8x128xf32>
    %42 = tpu.matmul %40, %41, %cst_26 {dimension_numbers = #tpu.dot_dimension_numbers<[1], [0], [0], [1], [0, 0, 1, 1], [], []>} : vector<8x32xbf16>, vector<32x128xbf16>, vector<8x128xf32> -> vector<8x128xf32>
    %c0_27 = arith.constant 0 : index
    %c0_28 = arith.constant 0 : index
    %43 = vector.load %arg9[%c0_27, %c0_28] : memref<8x1xf32, #tpu.memory_space<vmem>>, vector<8x1xf32>
    %44 = vector.broadcast %43 : vector<8x1xf32> to vector<8x128xf32>
    %45 = arith.addf %42, %44 : vector<8x128xf32>
    %cst_29 = arith.constant 0.000000e+00 : f32
    %46 = vector.broadcast %cst_29 : f32 to vector<8x128xf32>
    %47 = arith.maximumf %45, %46 : vector<8x128xf32>
    %c0_30 = arith.constant 0 : index
    %c0_31 = arith.constant 0 : index
    %48 = vector.load %arg10[%c0_30, %c0_31] : memref<32x8xbf16, #tpu.memory_space<vmem>>, vector<32x8xbf16>
    %49 = arith.truncf %47 : vector<8x128xf32> to vector<8x128xbf16>
    %cst_32 = arith.constant dense<0.000000e+00> : vector<32x128xf32>
    %50 = tpu.matmul %48, %49, %cst_32 {dimension_numbers = #tpu.dot_dimension_numbers<[1], [0], [0], [1], [0, 0, 1, 1], [], []>} : vector<32x8xbf16>, vector<8x128xbf16>, vector<32x128xf32> -> vector<32x128xf32>
    %c0_33 = arith.constant 0 : index
    %c0_34 = arith.constant 0 : index
    %51 = vector.load %arg11[%c0_33, %c0_34] : memref<32x1xf32, #tpu.memory_space<vmem>>, vector<32x1xf32>
    %52 = vector.broadcast %51 : vector<32x1xf32> to vector<32x128xf32>
    %53 = arith.addf %50, %52 : vector<32x128xf32>
    %54 = arith.addf %53, %24 : vector<32x128xf32>
    %cst_35 = arith.constant 0.000000e+00 : f32
    %55 = vector.broadcast %cst_35 : f32 to vector<32x128xf32>
    %56 = arith.maximumf %54, %55 : vector<32x128xf32>
    %57 = vector.extract_strided_slice %56 {offsets = [0, 0], sizes = [32, 64], strides = [1, 1]} : vector<32x128xf32> to vector<32x64xf32>
    %c0_36 = arith.constant 0 : index
    %c0_37 = arith.constant 0 : index
    %58 = vector.load %arg21[%c0_36, %c0_37] : memref<128x32xbf16, #tpu.memory_space<vmem>>, vector<128x32xbf16>
    %59 = arith.truncf %57 : vector<32x64xf32> to vector<32x64xbf16>
    %cst_38 = arith.constant dense<0.000000e+00> : vector<128x64xf32>
    %60 = tpu.matmul %58, %59, %cst_38 {dimension_numbers = #tpu.dot_dimension_numbers<[1], [0], [0], [1], [0, 0, 1, 1], [], []>} : vector<128x32xbf16>, vector<32x64xbf16>, vector<128x64xf32> -> vector<128x64xf32>
    %c0_39 = arith.constant 0 : index
    %c0_40 = arith.constant 0 : index
    %61 = vector.load %arg22[%c0_39, %c0_40] : memref<128x1xf32, #tpu.memory_space<vmem>>, vector<128x1xf32>
    %62 = vector.broadcast %61 : vector<128x1xf32> to vector<128x64xf32>
    %63 = arith.addf %60, %62 : vector<128x64xf32>
    %c0_41 = arith.constant 0 : index
    %c0_42 = arith.constant 0 : index
    %64 = vector.load %arg15[%c0_41, %c0_42] : memref<32x32xbf16, #tpu.memory_space<vmem>>, vector<32x32xbf16>
    %65 = arith.truncf %57 : vector<32x64xf32> to vector<32x64xbf16>
    %cst_43 = arith.constant dense<0.000000e+00> : vector<32x64xf32>
    %66 = tpu.matmul %64, %65, %cst_43 {dimension_numbers = #tpu.dot_dimension_numbers<[1], [0], [0], [1], [0, 0, 1, 1], [], []>} : vector<32x32xbf16>, vector<32x64xbf16>, vector<32x64xf32> -> vector<32x64xf32>
    %c0_44 = arith.constant 0 : index
    %c0_45 = arith.constant 0 : index
    %67 = vector.load %arg16[%c0_44, %c0_45] : memref<32x1xf32, #tpu.memory_space<vmem>>, vector<32x1xf32>
    %68 = vector.broadcast %67 : vector<32x1xf32> to vector<32x64xf32>
    %69 = arith.addf %66, %68 : vector<32x64xf32>
    %cst_46 = arith.constant 0.000000e+00 : f32
    %70 = vector.broadcast %cst_46 : f32 to vector<32x64xf32>
    %71 = arith.maximumf %69, %70 : vector<32x64xf32>
    %72 = arith.truncf %71 : vector<32x64xf32> to vector<32x64xbf16>
    %c0_47 = arith.constant 0 : index
    %c0_48 = arith.constant 0 : index
    %73 = vector.load %arg14[%c0_47, %c0_48] : memref<64x192xbf16, #tpu.memory_space<vmem>>, vector<64x192xbf16>
    %cst_49 = arith.constant dense<0.000000e+00> : vector<32x192xf32>
    %74 = tpu.matmul %72, %73, %cst_49 {dimension_numbers = #tpu.dot_dimension_numbers<[1], [0], [0], [1], [0, 0, 1, 1], [], []>} : vector<32x64xbf16>, vector<64x192xbf16>, vector<32x192xf32> -> vector<32x192xf32>
    %75 = vector.extract_strided_slice %74 {offsets = [0, 0], sizes = [32, 64], strides = [1, 1]} : vector<32x192xf32> to vector<32x64xf32>
    %76 = vector.extract_strided_slice %74 {offsets = [0, 64], sizes = [32, 64], strides = [1, 1]} : vector<32x192xf32> to vector<32x64xf32>
    %77 = vector.extract_strided_slice %74 {offsets = [0, 128], sizes = [32, 64], strides = [1, 1]} : vector<32x192xf32> to vector<32x64xf32>
    %78 = tpu.concatenate %71, %75, %76, %77 in 0 : vector<32x64xf32>, vector<32x64xf32>, vector<32x64xf32>, vector<32x64xf32> -> vector<128x64xf32>
    %c0_50 = arith.constant 0 : index
    %c0_51 = arith.constant 0 : index
    %79 = vector.load %arg17[%c0_50, %c0_51] : memref<32x128xbf16, #tpu.memory_space<vmem>>, vector<32x128xbf16>
    %80 = arith.truncf %78 : vector<128x64xf32> to vector<128x64xbf16>
    %cst_52 = arith.constant dense<0.000000e+00> : vector<32x64xf32>
    %81 = tpu.matmul %79, %80, %cst_52 {dimension_numbers = #tpu.dot_dimension_numbers<[1], [0], [0], [1], [0, 0, 1, 1], [], []>} : vector<32x128xbf16>, vector<128x64xbf16>, vector<32x64xf32> -> vector<32x64xf32>
    %c0_53 = arith.constant 0 : index
    %c0_54 = arith.constant 0 : index
    %82 = vector.load %arg18[%c0_53, %c0_54] : memref<32x1xf32, #tpu.memory_space<vmem>>, vector<32x1xf32>
    %83 = vector.broadcast %82 : vector<32x1xf32> to vector<32x64xf32>
    %84 = arith.addf %81, %83 : vector<32x64xf32>
    %cst_55 = arith.constant 0.000000e+00 : f32
    %85 = vector.broadcast %cst_55 : f32 to vector<32x64xf32>
    %86 = arith.maximumf %84, %85 : vector<32x64xf32>
    %c0_56 = arith.constant 0 : index
    %c0_57 = arith.constant 0 : index
    %87 = vector.load %arg19[%c0_56, %c0_57] : memref<128x32xbf16, #tpu.memory_space<vmem>>, vector<128x32xbf16>
    %88 = arith.truncf %86 : vector<32x64xf32> to vector<32x64xbf16>
    %cst_58 = arith.constant dense<0.000000e+00> : vector<128x64xf32>
    %89 = tpu.matmul %87, %88, %cst_58 {dimension_numbers = #tpu.dot_dimension_numbers<[1], [0], [0], [1], [0, 0, 1, 1], [], []>} : vector<128x32xbf16>, vector<32x64xbf16>, vector<128x64xf32> -> vector<128x64xf32>
    %c0_59 = arith.constant 0 : index
    %c0_60 = arith.constant 0 : index
    %90 = vector.load %arg20[%c0_59, %c0_60] : memref<128x1xf32, #tpu.memory_space<vmem>>, vector<128x1xf32>
    %91 = vector.broadcast %90 : vector<128x1xf32> to vector<128x64xf32>
    %92 = arith.addf %89, %91 : vector<128x64xf32>
    %93 = arith.addf %92, %63 : vector<128x64xf32>
    %cst_61 = arith.constant 0.000000e+00 : f32
    %94 = vector.broadcast %cst_61 : f32 to vector<128x64xf32>
    %95 = arith.maximumf %93, %94 : vector<128x64xf32>
    %96 = vector.extract_strided_slice %95 {offsets = [0, 0], sizes = [128, 32], strides = [1, 1]} : vector<128x64xf32> to vector<128x32xf32>
    %c0_62 = arith.constant 0 : index
    %c0_63 = arith.constant 0 : index
    %97 = vector.load %arg30[%c0_62, %c0_63] : memref<512x128xbf16, #tpu.memory_space<vmem>>, vector<512x128xbf16>
    %98 = arith.truncf %96 : vector<128x32xf32> to vector<128x32xbf16>
    %cst_64 = arith.constant dense<0.000000e+00> : vector<512x32xf32>
    %99 = tpu.matmul %97, %98, %cst_64 {dimension_numbers = #tpu.dot_dimension_numbers<[1], [0], [0], [1], [0, 0, 1, 1], [], []>} : vector<512x128xbf16>, vector<128x32xbf16>, vector<512x32xf32> -> vector<512x32xf32>
    %c0_65 = arith.constant 0 : index
    %c0_66 = arith.constant 0 : index
    %100 = vector.load %arg31[%c0_65, %c0_66] : memref<512x1xf32, #tpu.memory_space<vmem>>, vector<512x1xf32>
    %101 = vector.broadcast %100 : vector<512x1xf32> to vector<512x32xf32>
    %102 = arith.addf %99, %101 : vector<512x32xf32>
    %c0_67 = arith.constant 0 : index
    %c0_68 = arith.constant 0 : index
    %103 = vector.load %arg24[%c0_67, %c0_68] : memref<128x128xbf16, #tpu.memory_space<vmem>>, vector<128x128xbf16>
    %104 = arith.truncf %96 : vector<128x32xf32> to vector<128x32xbf16>
    %cst_69 = arith.constant dense<0.000000e+00> : vector<128x32xf32>
    %105 = tpu.matmul %103, %104, %cst_69 {dimension_numbers = #tpu.dot_dimension_numbers<[1], [0], [0], [1], [0, 0, 1, 1], [], []>} : vector<128x128xbf16>, vector<128x32xbf16>, vector<128x32xf32> -> vector<128x32xf32>
    %c0_70 = arith.constant 0 : index
    %c0_71 = arith.constant 0 : index
    %106 = vector.load %arg25[%c0_70, %c0_71] : memref<128x1xf32, #tpu.memory_space<vmem>>, vector<128x1xf32>
    %107 = vector.broadcast %106 : vector<128x1xf32> to vector<128x32xf32>
    %108 = arith.addf %105, %107 : vector<128x32xf32>
    %cst_72 = arith.constant 0.000000e+00 : f32
    %109 = vector.broadcast %cst_72 : f32 to vector<128x32xf32>
    %110 = arith.maximumf %108, %109 : vector<128x32xf32>
    %111 = arith.truncf %110 : vector<128x32xf32> to vector<128x32xbf16>
    %c0_73 = arith.constant 0 : index
    %c0_74 = arith.constant 0 : index
    %112 = vector.load %arg23[%c0_73, %c0_74] : memref<32x96xbf16, #tpu.memory_space<vmem>>, vector<32x96xbf16>
    %cst_75 = arith.constant dense<0.000000e+00> : vector<128x96xf32>
    %113 = tpu.matmul %111, %112, %cst_75 {dimension_numbers = #tpu.dot_dimension_numbers<[1], [0], [0], [1], [0, 0, 1, 1], [], []>} : vector<128x32xbf16>, vector<32x96xbf16>, vector<128x96xf32> -> vector<128x96xf32>
    %114 = vector.extract_strided_slice %113 {offsets = [0, 0], sizes = [128, 32], strides = [1, 1]} : vector<128x96xf32> to vector<128x32xf32>
    %115 = vector.extract_strided_slice %113 {offsets = [0, 32], sizes = [128, 32], strides = [1, 1]} : vector<128x96xf32> to vector<128x32xf32>
    %116 = vector.extract_strided_slice %113 {offsets = [0, 64], sizes = [128, 32], strides = [1, 1]} : vector<128x96xf32> to vector<128x32xf32>
    %117 = tpu.concatenate %110, %114, %115, %116 in 0 : vector<128x32xf32>, vector<128x32xf32>, vector<128x32xf32>, vector<128x32xf32> -> vector<512x32xf32>
    %c0_76 = arith.constant 0 : index
    %c0_77 = arith.constant 0 : index
    %118 = vector.load %arg26[%c0_76, %c0_77] : memref<128x512xbf16, #tpu.memory_space<vmem>>, vector<128x512xbf16>
    %119 = arith.truncf %117 : vector<512x32xf32> to vector<512x32xbf16>
    %cst_78 = arith.constant dense<0.000000e+00> : vector<128x32xf32>
    %120 = tpu.matmul %118, %119, %cst_78 {dimension_numbers = #tpu.dot_dimension_numbers<[1], [0], [0], [1], [0, 0, 1, 1], [], []>} : vector<128x512xbf16>, vector<512x32xbf16>, vector<128x32xf32> -> vector<128x32xf32>
    %c0_79 = arith.constant 0 : index
    %c0_80 = arith.constant 0 : index
    %121 = vector.load %arg27[%c0_79, %c0_80] : memref<128x1xf32, #tpu.memory_space<vmem>>, vector<128x1xf32>
    %122 = vector.broadcast %121 : vector<128x1xf32> to vector<128x32xf32>
    %123 = arith.addf %120, %122 : vector<128x32xf32>
    %cst_81 = arith.constant 0.000000e+00 : f32
    %124 = vector.broadcast %cst_81 : f32 to vector<128x32xf32>
    %125 = arith.maximumf %123, %124 : vector<128x32xf32>
    %c0_82 = arith.constant 0 : index
    %c0_83 = arith.constant 0 : index
    %126 = vector.load %arg28[%c0_82, %c0_83] : memref<512x128xbf16, #tpu.memory_space<vmem>>, vector<512x128xbf16>
    %127 = arith.truncf %125 : vector<128x32xf32> to vector<128x32xbf16>
    %cst_84 = arith.constant dense<0.000000e+00> : vector<512x32xf32>
    %128 = tpu.matmul %126, %127, %cst_84 {dimension_numbers = #tpu.dot_dimension_numbers<[1], [0], [0], [1], [0, 0, 1, 1], [], []>} : vector<512x128xbf16>, vector<128x32xbf16>, vector<512x32xf32> -> vector<512x32xf32>
    %c0_85 = arith.constant 0 : index
    %c0_86 = arith.constant 0 : index
    %129 = vector.load %arg29[%c0_85, %c0_86] : memref<512x1xf32, #tpu.memory_space<vmem>>, vector<512x1xf32>
    %130 = vector.broadcast %129 : vector<512x1xf32> to vector<512x32xf32>
    %131 = arith.addf %128, %130 : vector<512x32xf32>
    %132 = arith.addf %131, %102 : vector<512x32xf32>
    %cst_87 = arith.constant 0.000000e+00 : f32
    %133 = vector.broadcast %cst_87 : f32 to vector<512x32xf32>
    %134 = arith.maximumf %132, %133 : vector<512x32xf32>
    %cst_88 = arith.constant dense<0.000000e+00> : vector<512xf32>
    %135 = vector.multi_reduction <add>, %134, %cst_88 [1] : vector<512x32xf32> to vector<512xf32>
    %136 = vector.shape_cast %135 : vector<512xf32> to vector<512x1xf32>
    %cst_89 = arith.constant 3.125000e-02 : f32
    %137 = vector.broadcast %cst_89 : f32 to vector<512x1xf32>
    %138 = arith.mulf %136, %137 : vector<512x1xf32>
    %c0_90 = arith.constant 0 : index
    %c0_91 = arith.constant 0 : index
    %139 = vector.load %arg32[%c0_90, %c0_91] : memref<10x512xf32, #tpu.memory_space<vmem>>, vector<10x512xf32>
    %cst_92 = arith.constant dense<0.000000e+00> : vector<10x1xf32>
    %140 = tpu.matmul %139, %138, %cst_92 {dimension_numbers = #tpu.dot_dimension_numbers<[1], [0], [0], [1], [0, 0, 1, 1], [], []>} : vector<10x512xf32>, vector<512x1xf32>, vector<10x1xf32> -> vector<10x1xf32>
    %c0_93 = arith.constant 0 : index
    %c0_94 = arith.constant 0 : index
    %141 = vector.load %arg33[%c0_93, %c0_94] : memref<10x1xf32, #tpu.memory_space<vmem>>, vector<10x1xf32>
    %142 = arith.addf %140, %141 : vector<10x1xf32>
    %cst_95 = arith.constant dense<0xFF800000> : vector<1xf32>
    %143 = vector.multi_reduction <maximumf>, %142, %cst_95 [0] : vector<10x1xf32> to vector<1xf32>
    %144 = vector.shape_cast %143 : vector<1xf32> to vector<1x1xf32>
    %145 = vector.broadcast %144 : vector<1x1xf32> to vector<10x1xf32>
    %146 = arith.subf %142, %145 : vector<10x1xf32>
    %147 = math.exp %146 : vector<10x1xf32>
    %cst_96 = arith.constant dense<0.000000e+00> : vector<1xf32>
    %148 = vector.multi_reduction <add>, %147, %cst_96 [0] : vector<10x1xf32> to vector<1xf32>
    %149 = vector.shape_cast %148 : vector<1xf32> to vector<1x1xf32>
    %150 = math.log %149 : vector<1x1xf32>
    %151 = vector.broadcast %150 : vector<1x1xf32> to vector<10x1xf32>
    %152 = arith.subf %146, %151 : vector<10x1xf32>
    %c0_97 = arith.constant 0 : index
    %c0_98 = arith.constant 0 : index
    %c0_99 = arith.constant 0 : index
    %153 = vector.load %arg34[%c0_97, %c0_98, %c0_99] : memref<1x10x1xf32, #tpu.memory_space<vmem>>, vector<1x10x1xf32>
    %154 = vector.shape_cast %153 : vector<1x10x1xf32> to vector<10x1xf32>
    %155 = vector.shape_cast %152 : vector<10x1xf32> to vector<1x10x1xf32>
    tpu.vector_store %arg34[%c0_97, %c0_98, %c0_99], %155 {strides = array<i32>} : memref<1x10x1xf32, #tpu.memory_space<vmem>>, vector<1x10x1xf32>,
    return
  }
  func.func @transform_0(%arg0: i32) -> (i32, i32, i32) {
    %c0_i32 = arith.constant 0 : i32
    %c0_i32_0 = arith.constant 0 : i32
    %c0_i32_1 = arith.constant 0 : i32
    return %arg0, %c0_i32, %c0_i32_0 : i32, i32, i32
  }
  func.func @transform_1(%arg0: i32) -> (i32, i32) {
    %c0_i32 = arith.constant 0 : i32
    %c0_i32_0 = arith.constant 0 : i32
    %c0_i32_1 = arith.constant 0 : i32
    return %c0_i32, %c0_i32_0 : i32, i32
  }
  func.func @transform_2(%arg0: i32) -> (i32, i32) {
    %c0_i32 = arith.constant 0 : i32
    %c0_i32_0 = arith.constant 0 : i32
    %c0_i32_1 = arith.constant 0 : i32
    return %c0_i32, %c0_i32_0 : i32, i32
  }
  func.func @transform_3(%arg0: i32) -> (i32, i32) {
    %c0_i32 = arith.constant 0 : i32
    %c0_i32_0 = arith.constant 0 : i32
    %c0_i32_1 = arith.constant 0 : i32
    return %c0_i32, %c0_i32_0 : i32, i32
  }
  func.func @transform_4(%arg0: i32) -> (i32, i32) {
    %c0_i32 = arith.constant 0 : i32
    %c0_i32_0 = arith.constant 0 : i32
    %c0_i32_1 = arith.constant 0 : i32
    return %c0_i32, %c0_i32_0 : i32, i32
  }
  func.func @transform_5(%arg0: i32) -> (i32, i32) {
    %c0_i32 = arith.constant 0 : i32
    %c0_i32_0 = arith.constant 0 : i32
    %c0_i32_1 = arith.constant 0 : i32
    return %c0_i32, %c0_i32_0 : i32, i32
  }
  func.func @transform_6(%arg0: i32) -> (i32, i32) {
    %c0_i32 = arith.constant 0 : i32
    %c0_i32_0 = arith.constant 0 : i32
    %c0_i32_1 = arith.constant 0 : i32
    return %c0_i32, %c0_i32_0 : i32, i32
  }
  func.func @transform_7(%arg0: i32) -> (i32, i32) {
    %c0_i32 = arith.constant 0 : i32
    %c0_i32_0 = arith.constant 0 : i32
    %c0_i32_1 = arith.constant 0 : i32
    return %c0_i32, %c0_i32_0 : i32, i32
  }
  func.func @transform_8(%arg0: i32) -> (i32, i32) {
    %c0_i32 = arith.constant 0 : i32
    %c0_i32_0 = arith.constant 0 : i32
    %c0_i32_1 = arith.constant 0 : i32
    return %c0_i32, %c0_i32_0 : i32, i32
  }
  func.func @transform_9(%arg0: i32) -> (i32, i32) {
    %c0_i32 = arith.constant 0 : i32
    %c0_i32_0 = arith.constant 0 : i32
    %c0_i32_1 = arith.constant 0 : i32
    return %c0_i32, %c0_i32_0 : i32, i32
  }
  func.func @transform_10(%arg0: i32) -> (i32, i32) {
    %c0_i32 = arith.constant 0 : i32
    %c0_i32_0 = arith.constant 0 : i32
    %c0_i32_1 = arith.constant 0 : i32
    return %c0_i32, %c0_i32_0 : i32, i32
  }
  func.func @transform_11(%arg0: i32) -> (i32, i32) {
    %c0_i32 = arith.constant 0 : i32
    %c0_i32_0 = arith.constant 0 : i32
    %c0_i32_1 = arith.constant 0 : i32
    return %c0_i32, %c0_i32_0 : i32, i32
  }
  func.func @transform_12(%arg0: i32) -> (i32, i32) {
    %c0_i32 = arith.constant 0 : i32
    %c0_i32_0 = arith.constant 0 : i32
    %c0_i32_1 = arith.constant 0 : i32
    return %c0_i32, %c0_i32_0 : i32, i32
  }
  func.func @transform_13(%arg0: i32) -> (i32, i32) {
    %c0_i32 = arith.constant 0 : i32
    %c0_i32_0 = arith.constant 0 : i32
    %c0_i32_1 = arith.constant 0 : i32
    return %c0_i32, %c0_i32_0 : i32, i32
  }
  func.func @transform_14(%arg0: i32) -> (i32, i32) {
    %c0_i32 = arith.constant 0 : i32
    %c0_i32_0 = arith.constant 0 : i32
    %c0_i32_1 = arith.constant 0 : i32
    return %c0_i32, %c0_i32_0 : i32, i32
  }
  func.func @transform_15(%arg0: i32) -> (i32, i32) {
    %c0_i32 = arith.constant 0 : i32
    %c0_i32_0 = arith.constant 0 : i32
    %c0_i32_1 = arith.constant 0 : i32
    return %c0_i32, %c0_i32_0 : i32, i32
  }
  func.func @transform_16(%arg0: i32) -> (i32, i32) {
    %c0_i32 = arith.constant 0 : i32
    %c0_i32_0 = arith.constant 0 : i32
    %c0_i32_1 = arith.constant 0 : i32
    return %c0_i32, %c0_i32_0 : i32, i32
  }
  func.func @transform_17(%arg0: i32) -> (i32, i32) {
    %c0_i32 = arith.constant 0 : i32
    %c0_i32_0 = arith.constant 0 : i32
    %c0_i32_1 = arith.constant 0 : i32
    return %c0_i32, %c0_i32_0 : i32, i32
  }
  func.func @transform_18(%arg0: i32) -> (i32, i32) {
    %c0_i32 = arith.constant 0 : i32
    %c0_i32_0 = arith.constant 0 : i32
    %c0_i32_1 = arith.constant 0 : i32
    return %c0_i32, %c0_i32_0 : i32, i32
  }
  func.func @transform_19(%arg0: i32) -> (i32, i32) {
    %c0_i32 = arith.constant 0 : i32
    %c0_i32_0 = arith.constant 0 : i32
    %c0_i32_1 = arith.constant 0 : i32
    return %c0_i32, %c0_i32_0 : i32, i32
  }
  func.func @transform_20(%arg0: i32) -> (i32, i32) {
    %c0_i32 = arith.constant 0 : i32
    %c0_i32_0 = arith.constant 0 : i32
    %c0_i32_1 = arith.constant 0 : i32
    return %c0_i32, %c0_i32_0 : i32, i32
  }
  func.func @transform_21(%arg0: i32) -> (i32, i32) {
    %c0_i32 = arith.constant 0 : i32
    %c0_i32_0 = arith.constant 0 : i32
    %c0_i32_1 = arith.constant 0 : i32
    return %c0_i32, %c0_i32_0 : i32, i32
  }
  func.func @transform_22(%arg0: i32) -> (i32, i32) {
    %c0_i32 = arith.constant 0 : i32
    %c0_i32_0 = arith.constant 0 : i32
    %c0_i32_1 = arith.constant 0 : i32
    return %c0_i32, %c0_i32_0 : i32, i32
  }
  func.func @transform_23(%arg0: i32) -> (i32, i32) {
    %c0_i32 = arith.constant 0 : i32
    %c0_i32_0 = arith.constant 0 : i32
    %c0_i32_1 = arith.constant 0 : i32
    return %c0_i32, %c0_i32_0 : i32, i32
  }
  func.func @transform_24(%arg0: i32) -> (i32, i32) {
    %c0_i32 = arith.constant 0 : i32
    %c0_i32_0 = arith.constant 0 : i32
    %c0_i32_1 = arith.constant 0 : i32
    return %c0_i32, %c0_i32_0 : i32, i32
  }
  func.func @transform_25(%arg0: i32) -> (i32, i32) {
    %c0_i32 = arith.constant 0 : i32
    %c0_i32_0 = arith.constant 0 : i32
    %c0_i32_1 = arith.constant 0 : i32
    return %c0_i32, %c0_i32_0 : i32, i32
  }
  func.func @transform_26(%arg0: i32) -> (i32, i32) {
    %c0_i32 = arith.constant 0 : i32
    %c0_i32_0 = arith.constant 0 : i32
    %c0_i32_1 = arith.constant 0 : i32
    return %c0_i32, %c0_i32_0 : i32, i32
  }
  func.func @transform_27(%arg0: i32) -> (i32, i32) {
    %c0_i32 = arith.constant 0 : i32
    %c0_i32_0 = arith.constant 0 : i32
    %c0_i32_1 = arith.constant 0 : i32
    return %c0_i32, %c0_i32_0 : i32, i32
  }
  func.func @transform_28(%arg0: i32) -> (i32, i32) {
    %c0_i32 = arith.constant 0 : i32
    %c0_i32_0 = arith.constant 0 : i32
    %c0_i32_1 = arith.constant 0 : i32
    return %c0_i32, %c0_i32_0 : i32, i32
  }
  func.func @transform_29(%arg0: i32) -> (i32, i32) {
    %c0_i32 = arith.constant 0 : i32
    %c0_i32_0 = arith.constant 0 : i32
    %c0_i32_1 = arith.constant 0 : i32
    return %c0_i32, %c0_i32_0 : i32, i32
  }
  func.func @transform_30(%arg0: i32) -> (i32, i32) {
    %c0_i32 = arith.constant 0 : i32
    %c0_i32_0 = arith.constant 0 : i32
    %c0_i32_1 = arith.constant 0 : i32
    return %c0_i32, %c0_i32_0 : i32, i32
  }
  func.func @transform_31(%arg0: i32) -> (i32, i32) {
    %c0_i32 = arith.constant 0 : i32
    %c0_i32_0 = arith.constant 0 : i32
    %c0_i32_1 = arith.constant 0 : i32
    return %c0_i32, %c0_i32_0 : i32, i32
  }
  func.func @transform_32(%arg0: i32) -> (i32, i32) {
    %c0_i32 = arith.constant 0 : i32
    %c0_i32_0 = arith.constant 0 : i32
    %c0_i32_1 = arith.constant 0 : i32
    return %c0_i32, %c0_i32_0 : i32, i32
  }
  func.func @transform_33(%arg0: i32) -> (i32, i32, i32) {
    %c0_i32 = arith.constant 0 : i32
    %c0_i32_0 = arith.constant 0 : i32
    %c0_i32_1 = arith.constant 0 : i32
    return %arg0, %c0_i32, %c0_i32_0 : i32, i32, i32
  }
}

</mosaic_0001>

<bundles_post_ra>
// kernel: forward.1
= control target key start
LH: loop header
LB: loop body
LE: loop exit
PB: predicated region body
PF: predicated region fallthrough
CT: control target
= control target key end

     0   :  { %s10127_s6 = smov 1   ;;  %s10128_s10 = smov 2   ;;  %s11857_s0 = inlined_call_operand.smem [shape: u32[34], index: -1, kind: input, shape index: {}] }
   0x1   :  { %s10185_s5 = sld [smem:[%s11857_s0]]   ;;  %s10129_s14 = smov 3  }
   0x2   :  { %s10190_s9 = sld [smem:[%s11857_s0 + %s10127_s6]]   ;;  %s10130_s18 = smov 4  }
   0x3   :  { %s10195_s13 = sld [smem:[%s11857_s0 + %s10128_s10]]   ;;  %s10131_s22 = smov 5  }
   0x4   :  { %s10200_s17 = sld [smem:[%s11857_s0 + %s10129_s14]]   ;;  %s10132_s26 = smov 6  }
   0x5   :  { %s10205_s21 = sld [smem:[%s11857_s0 + %s10130_s18]]   ;;  %s10133_s30 = smov 7  }
   0x6   :  { %s10210_s25 = sld [smem:[%s11857_s0 + %s10131_s22]]   ;;  %s10134_s4 = smov 8  }
   0x7   :  { %s10215_s29 = sld [smem:[%s11857_s0 + %s10132_s26]]   ;;  %s10135_s10 = smov 9  }
   0x8   :  { %s10220_s3 = sld [smem:[%s11857_s0 + %s10133_s30]]   ;;  %s10136_s15 = smov 10  }
   0x9   :  { %s10225_s8 = sld [smem:[%s11857_s0 + %s10134_s4]]   ;;  %s10137_s20 = smov 11  }
   0xa   :  { %s10230_s14 = sld [smem:[%s11857_s0 + %s10135_s10]]   ;;  %s10138_s26 = smov 12  }
   0xb   :  { %s10235_s19 = sld [smem:[%s11857_s0 + %s10136_s15]]   ;;  %s10139_s1 = smov 13  }
   0xc   :  { %s10240_s24 = sld [smem:[%s11857_s0 + %s10137_s20]]   ;;  %s10140_s7 = smov 14  }
   0xd   :  { %s10245_s30 = sld [smem:[%s11857_s0 + %s10138_s26]]   ;;  %s10141_s15 = smov 15  }
   0xe   :  { %11885 = sst [smem:[#allocation20_spill]] %s10220_s3  ;;  %s10142_s22 = smov 16  }
   0xf   :  { %11886 = sst [smem:[#allocation21_spill]] %s10225_s8  ;;  %s10143_s28 = smov 17  }
  0x10   :  { %11887 = sst [smem:[#allocation22_spill]] %s10230_s14 }
  0x11   :  { %s10250_s6 = sld [smem:[%s11857_s0 + %s10139_s1]]  }
  0x12   :  { %11888 = sst [smem:[#allocation23_spill]] %s10240_s24 }
  0x13   :  { %s10255_s12 = sld [smem:[%s11857_s0 + %s10140_s7]]   ;;  %s10144_s7 = smov 18  }
  0x14   :  { %s10260_s20 = sld [smem:[%s11857_s0 + %s10141_s15]]   ;;  %s10145_s15 = smov 19  }
  0x15   :  { %s10265_s27 = sld [smem:[%s11857_s0 + %s10142_s22]]   ;;  %s10146_s22 = smov 20  }
  0x16   :  { %s10270_s4 = sld [smem:[%s11857_s0 + %s10143_s28]]   ;;  %s10147_s28 = smov 21  }
  0x17   :  { %11889 = sst [smem:[#allocation24_spill]] %s10250_s6 }
  0x18   :  { %s10275_s6 = sld [smem:[%s11857_s0 + %s10144_s7]]   ;;  %s10148_s7 = smov 22  }
  0x19   :  { %s10280_s14 = sld [smem:[%s11857_s0 + %s10145_s15]]   ;;  %s10149_s15 = smov 23  }
  0x1a   :  { %11890 = sst [smem:[#allocation25_spill]] %s10260_s20 }
  0x1b   :  { %s10285_s8 = sld [smem:[%s11857_s0 + %s10146_s22]]   ;;  %s10150_s22 = smov 24  }
  0x1c   :  { %11891 = sst [smem:[#allocation26_spill]] %s10270_s4 }
  0x1d   :  { %s10290_s4 = sld [smem:[%s11857_s0 + %s10147_s28]]   ;;  %s10151_s28 = smov 25  }
  0x1e   :  { %11892 = sst [smem:[#allocation27_spill]] %s10275_s6 }
  0x1f   :  { %11893 = sst [smem:[#allocation28_spill]] %s10280_s14 }
  0x20   :  { %s10295_s6 = sld [smem:[%s11857_s0 + %s10148_s7]]   ;;  %s10152_s7 = smov 26  }
  0x21   :  { %11894 = sst [smem:[#allocation29_spill]] %s10285_s8 }
  0x22   :  { %s10300_s14 = sld [smem:[%s11857_s0 + %s10149_s15]]   ;;  %s10153_s15 = smov 27  }
  0x23   :  { %11895 = sst [smem:[#allocation30_spill]] %s10290_s4 }
  0x24   :  { %s10305_s8 = sld [smem:[%s11857_s0 + %s10150_s22]]   ;;  %s10154_s22 = smov 28  }
  0x25   :  { %s10310_s4 = sld [smem:[%s11857_s0 + %s10151_s28]]   ;;  %s10155_s28 = smov 29  }
  0x26   :  { %s10315_s24 = sld [smem:[%s11857_s0 + %s10152_s7]]   ;;  %s10156_s7 = smov 30  }
  0x28   :  { %11896 = sst [smem:[#allocation31_spill]] %s10300_s14 }
  0x29   :  { %s10320_s14 = sld [smem:[%s11857_s0 + %s10153_s15]]   ;;  %s10157_s15 = smov 31  }
  0x2a   :  { %11897 = sst [smem:[#allocation32_spill]] %s10305_s8 }
  0x2b   :  { %11898 = sst [smem:[#allocation33_spill]] %s10310_s4 }
  0x2c   :  { %11899 = sst [smem:[#allocation34_spill]] %s10315_s24 }
  0x2d   :  { %s10325_s8 = sld [smem:[%s11857_s0 + %s10154_s22]]   ;;  %s10158_s22 = smov 32  }
  0x2e   :  { %s10330_s4 = sld [smem:[%s11857_s0 + %s10155_s28]]   ;;  %s10159_s28 = smov 33  }
  0x2f   :  { %11900 = sst [smem:[#allocation35_spill]] %s10320_s14 }
  0x30   :  { %s10335_s24 = sld [smem:[%s11857_s0 + %s10156_s7]]  }
  0x31   :  { %s10340_s14 = sld [smem:[%s11857_s0 + %s10157_s15]]  }
  0x32   :  { %s10350_s20 = sld [smem:[%s11857_s0 + %s10159_s28]]  }
  0x33   :  { %11901 = sst [smem:[#allocation36_spill]] %s10325_s8 }
  0x34   :  { %s10345_s8 = sld [smem:[%s11857_s0 + %s10158_s22]]  }
  0x35   :  { %72 = vsyncpa [#allocation3], 0 }
  0x36   :  { %73 = vsyncpa [#allocation5], 0 }
  0x37   :  { %74 = vsyncpa [#allocation8], 0 }
  0x38   :  { %75 = vsyncpa [#allocation11], 0 }
  0x39   :  { %76 = vsyncpa [#allocation14], 0  ;;  %s10352_s7 = smov 0  }
  0x3a LB: > { %s11902_s3 = sld [smem:[#allocation20_spill]]  ;;  %s10160_s10 = smov [#allocation4]   ;;  %s10125_s7 = sphi %s10352_s7, %s82_s7  }
  0x3b   : > { %s840_s0 = sshll.u32 %s10160_s10, 4  ;;  %s10358_s11 = sadd.s32 4294967295, %s10125_s7   ;;  %s10363_s0 = int_to_ptr.vmem [resolvable:$true] %s840_s0 }
  0x3c   : > { %p7714_p0 = scmp.ge.s32.totalorder %s10125_s7, 1  ;;  %p811_p1 = scmp.lt.s32.totalorder %s10125_s7, 3 }
  0x3d   : > { %p11873_p2 = scmp.eq.s32.totalorder %s10358_s11, 0  ;;  %s10161_s16 = smov [#allocation7]  }
  0x3e   : > { %p10365_p3 = pnand %p7714_p0, %p811_p1  ;;  %s868_s18 = sshll.u32 %s10161_s16, 4  ;;  %s10371_s18 = int_to_ptr.vmem [resolvable:$true] %s868_s18 }
  0x3f   : > { %s10162_s23 = smov [#allocation10]   ;;  %s9875_s28 = scalar_lea.hbm %s10205_s21, 3072 }
  0x40   : > { %s11903_s15 = scalar_select %p10365_p3, 1, 0 }
  0x41   : > { %p9198_p4 = pneg %p10365_p3  ;;  %s10379_s26 = sshll.u32 %s10162_s23, 4  ;;  %s913_s26 = int_to_ptr.vmem [resolvable:$true] %s10379_s26 }
  0x42   : > { %p9876_p6 = scmp.ne.s32.totalorder %s10205_s21, %s9875_s28  ;;  %p9882_p10 = scmp.lt.u32.totalorder %s9875_s28, %s10205_s21 }
  0x43   : > { %p10375_p5 = pnand %p11873_p2, %p9198_p4 }
  0x45   : > { %p10385_p7 = pneg %p10375_p5 }
  0x47   : > { %p9878_p8 = pnand %p10385_p7, %p9876_p6 }
  0x49   : > { %p9879_p9 = pneg %p9878_p8 }
  0x4b   : > { %p9884_p11 = pnand %p9882_p10, %p9879_p9 }
  0x4d   : > { %9887 = shalt.err (!%p9884_p11)
}
  0x4e   : > { %s9888_s2 = scalar_lea.vmem %s10363_s0, 3072  ;;  %p9896_p1 = scmp.lt.s32.totalorder %s10363_s0, %s10363_s0 }
  0x4f   : > { %p9889_p12 = scmp.ne.s32.totalorder %s10363_s0, %s9888_s2  ;;  %p9897_p4 = scmp.lt.s32.totalorder %s9888_s2, %s9888_s2 }
  0x51   : > { %p9891_p13 = pnand %p9889_p12, %p10385_p7  ;;  %p9898_p2 = por %p9897_p4, %p9896_p1 }
  0x53   : > { %p9892_p0 = pneg %p9891_p13 }
  0x55   : > { %p9899_p3 = pnand %p9898_p2, %p9892_p0 }
  0x57   : > { %9902 = shalt.err (!%p9899_p3)
}
  0x58   : > { %s10163_s10 = smov 192   ;;  %s10164_s16 = smov 12  }
  0x59   : > { %9204 = dma.hbm_to_vmem [thread:$0]  (!%p10375_p5), %s10205_s21, 3072, %s10363_s0, [#allocation5], %s10163_s10, %s10163_s10, %s10164_s16  }
  0x5a   : > { %s9903_s23 = scalar_lea.hbm %s11902_s3, 64 }
  0x5b   : > { %p9904_p6 = scmp.ne.s32.totalorder %s11902_s3, %s9903_s23  ;;  %p9910_p10 = scmp.lt.u32.totalorder %s9903_s23, %s11902_s3 }
  0x5d   : > { %p9906_p8 = pnand %p9904_p6, %p10385_p7 }
  0x5f   : > { %p9907_p9 = pneg %p9906_p8 }
  0x61   : > { %p9912_p11 = pnand %p9910_p10, %p9907_p9 }
  0x63   : > { %9915 = shalt.err (!%p9912_p11)
}
  0x64   : > { %s9916_s28 = scalar_lea.vmem %s10371_s18, 64  ;;  %p9924_p13 = scmp.lt.s32.totalorder %s10371_s18, %s10371_s18 }
  0x65   : > { %p9917_p2 = scmp.ne.s32.totalorder %s10371_s18, %s9916_s28  ;;  %p9925_p0 = scmp.lt.s32.totalorder %s9916_s28, %s9916_s28 }
  0x67   : > { %p9919_p3 = pnand %p9917_p2, %p10385_p7  ;;  %p9926_p1 = por %p9925_p0, %p9924_p13 }
  0x69   : > { %p9920_p12 = pneg %p9919_p3 }
  0x6b   : > { %p9927_p4 = pnand %p9926_p1, %p9920_p12 }
  0x6d   : > { %9930 = shalt.err (!%p9927_p4)
}
  0x6e   : > { %9210 = dma.hbm_to_vmem [thread:$0]  (!%p10375_p5), %s11902_s3, 64, %s10371_s18, [#allocation8]  }
  0x6f   : > { %s10165_s0 = smov [#allocation2]   ;;  %s9931_s10 = scalar_lea.hbm %s10265_s27, 256 }
  0x70   : > { %s827_s2 = sshll.u32 %s10165_s0, 4  ;;  %p9932_p6 = scmp.ne.s32.totalorder %s10265_s27, %s9931_s10  ;;  %s828_s2 = int_to_ptr.vmem [resolvable:$true] %s827_s2 }
  0x71   : > { %p9938_p10 = scmp.lt.u32.totalorder %s9931_s10, %s10265_s27 }
  0x72   : > { %p9934_p8 = pnand %p9932_p6, %p10385_p7 }
  0x74   : > { %p9935_p9 = pneg %p9934_p8 }
  0x76   : > { %p9940_p11 = pnand %p9938_p10, %p9935_p9 }
  0x78   : > { %9943 = shalt.err (!%p9940_p11)
}
  0x79   : > { %s9944_s16 = scalar_lea.vmem %s913_s26, 256  ;;  %p9952_p13 = scmp.lt.s32.totalorder %s913_s26, %s913_s26 }
  0x7a   : > { %p9945_p2 = scmp.ne.s32.totalorder %s913_s26, %s9944_s16  ;;  %p9953_p0 = scmp.lt.s32.totalorder %s9944_s16, %s9944_s16 }
  0x7c   : > { %p9947_p3 = pnand %p9945_p2, %p10385_p7  ;;  %p9954_p1 = por %p9953_p0, %p9952_p13 }
  0x7e   : > { %p9948_p12 = pneg %p9947_p3 }
  0x80   : > { %p9955_p4 = pnand %p9954_p1, %p9948_p12 }
  0x82   : > { %9958 = shalt.err (!%p9955_p4)
}
  0x83   : > { %s11875_s18 = smov 64   ;;  %s10167_s23 = smov 4  }
  0x84   : > { %9216 = dma.hbm_to_vmem [thread:$0]  (!%p10375_p5), %s10265_s27, 256, %s913_s26, [#allocation11], %s11875_s18, %s11875_s18, %s10167_s23  }
  0x85   : > { %s9959_s28 = scalar_lea.hbm %s10195_s13, 64 }
  0x86   : > { %p9960_p6 = scmp.ne.s32.totalorder %s10195_s13, %s9959_s28  ;;  %p9966_p10 = scmp.lt.u32.totalorder %s9959_s28, %s10195_s13 }
  0x88   : > { %p9962_p8 = pnand %p9960_p6, %p10385_p7 }
  0x8a   : > { %p9963_p9 = pneg %p9962_p8 }
  0x8c   : > { %p9968_p11 = pnand %p9966_p10, %p9963_p9 }
  0x8e   : > { %9971 = shalt.err (!%p9968_p11)
}
  0x8f   : > { %s9972_s0 = scalar_lea.vmem %s828_s2, 64  ;;  %p9980_p13 = scmp.lt.s32.totalorder %s828_s2, %s828_s2 }
  0x90   : > { %p9973_p2 = scmp.ne.s32.totalorder %s828_s2, %s9972_s0  ;;  %p9981_p0 = scmp.lt.s32.totalorder %s9972_s0, %s9972_s0 }
  0x92   : > { %p9975_p3 = pnand %p9973_p2, %p10385_p7  ;;  %p9982_p1 = por %p9981_p0, %p9980_p13 }
  0x94   : > { %p9976_p12 = pneg %p9975_p3 }
  0x96   : > { %p9983_p4 = pnand %p9982_p1, %p9976_p12 }
  0x98   : > { %9986 = shalt.err (!%p9983_p4)
}
  0x99   : > { %9201 = dma.hbm_to_vmem [thread:$0]  (!%p10375_p5), %s10195_s13, 64, %s828_s2, [#allocation3]  }
  0x9a   : > { %s10168_s26 = smov [#allocation6]   ;;  %s10169_s16 = smov [#allocation9]  }
  0x9b   : > { %s854_s10 = sshll.u32 %s10168_s26, 4  ;;  %s896_s28 = sshll.u32 %s10169_s16, 4  ;;  %s855_s10 = int_to_ptr.vmem [resolvable:$true] %s854_s10  ;;  %s897_s28 = int_to_ptr.vmem [resolvable:$true] %s896_s28 }
  0x9c   : > { %s9987_s18 = scalar_lea.hbm %s10210_s25, 64 }
  0x9d   : > { %p9988_p6 = scmp.ne.s32.totalorder %s10210_s25, %s9987_s18  ;;  %p9994_p10 = scmp.lt.u32.totalorder %s9987_s18, %s10210_s25 }
  0x9f   : > { %p9990_p8 = pnand %p9988_p6, %p10385_p7 }
  0xa1   : > { %p9991_p9 = pneg %p9990_p8 }
  0xa3   : > { %p9996_p11 = pnand %p9994_p10, %p9991_p9 }
  0xa5   : > { %9999 = shalt.err (!%p9996_p11)
}
  0xa6   : > { %s10000_s0 = scalar_lea.vmem %s855_s10, 64  ;;  %p10008_p13 = scmp.lt.s32.totalorder %s855_s10, %s855_s10 }
  0xa7   : > { %p10001_p2 = scmp.ne.s32.totalorder %s855_s10, %s10000_s0  ;;  %p10009_p0 = scmp.lt.s32.totalorder %s10000_s0, %s10000_s0 }
  0xa9   : > { %p10003_p3 = pnand %p10001_p2, %p10385_p7  ;;  %p10010_p1 = por %p10009_p0, %p10008_p13 }
  0xab   : > { %p10004_p12 = pneg %p10003_p3 }
  0xad   : > { %p10011_p4 = pnand %p10010_p1, %p10004_p12 }
  0xaf   : > { %10014 = shalt.err (!%p10011_p4)
}
  0xb0   : > { %9207 = dma.hbm_to_vmem [thread:$0]  (!%p10375_p5), %s10210_s25, 64, %s855_s10, [#allocation5]  }
  0xb1   : > { %s10015_s2 = scalar_lea.hbm %s10255_s12, 256 }
  0xb2   : > { %p10016_p6 = scmp.ne.s32.totalorder %s10255_s12, %s10015_s2  ;;  %p10022_p10 = scmp.lt.u32.totalorder %s10015_s2, %s10255_s12 }
  0xb4   : > { %p10018_p8 = pnand %p10016_p6, %p10385_p7 }
  0xb6   : > { %p10019_p9 = pneg %p10018_p8 }
  0xb8   : > { %p10024_p11 = pnand %p10022_p10, %p10019_p9 }
  0xba   : > { %10027 = shalt.err (!%p10024_p11)
}
  0xbb   : > { %s10028_s18 = scalar_lea.vmem %s897_s28, 256  ;;  %p10036_p13 = scmp.lt.s32.totalorder %s897_s28, %s897_s28 }
  0xbc   : > { %p10029_p2 = scmp.ne.s32.totalorder %s897_s28, %s10028_s18  ;;  %p10037_p0 = scmp.lt.s32.totalorder %s10028_s18, %s10028_s18 }
  0xbe   : > { %p10031_p3 = pnand %p10029_p2, %p10385_p7  ;;  %p10038_p1 = por %p10037_p0, %p10036_p13 }
  0xc0   : > { %p10032_p12 = pneg %p10031_p3 }
  0xc2   : > { %p10039_p4 = pnand %p10038_p1, %p10032_p12 }
  0xc4   : > { %10042 = shalt.err (!%p10039_p4)
}
  0xc5   : > { %s11906_s26 = smov 64   ;;  %s10170_s10 = smov [#allocation12]  }
  0xc6   : > { %9213 = dma.hbm_to_vmem [thread:$0]  (!%p10375_p5), %s10255_s12, 256, %s897_s28, [#allocation8], %s11906_s26, %s11906_s26, %s10167_s23  }
  0xc7   : > { %s940_s16 = sshll.u32 %s10170_s10, 4  ;;  %s10171_s0 = smov [#allocation13]   ;;  %s941_s16 = int_to_ptr.vmem [resolvable:$true] %s940_s16 }
  0xc8   : > { %s971_s2 = sshll.u32 %s10171_s0, 4  ;;  %s10043_s18 = scalar_lea.hbm %s10295_s6, 256  ;;  %s972_s2 = int_to_ptr.vmem [resolvable:$true] %s971_s2 }
  0xc9   : > { %p10044_p6 = scmp.ne.s32.totalorder %s10295_s6, %s10043_s18  ;;  %p10050_p10 = scmp.lt.u32.totalorder %s10043_s18, %s10295_s6 }
  0xcb   : > { %p10046_p8 = pnand %p10044_p6, %p10385_p7 }
  0xcd   : > { %p10047_p9 = pneg %p10046_p8 }
  0xcf   : > { %p10052_p11 = pnand %p10050_p10, %p10047_p9 }
  0xd1   : > { %10055 = shalt.err (!%p10052_p11)
}
  0xd2   : > { %s10056_s3 = scalar_lea.vmem %s941_s16, 256  ;;  %p10064_p13 = scmp.lt.s32.totalorder %s941_s16, %s941_s16 }
  0xd3   : > { %p10057_p2 = scmp.ne.s32.totalorder %s941_s16, %s10056_s3  ;;  %p10065_p0 = scmp.lt.s32.totalorder %s10056_s3, %s10056_s3 }
  0xd5   : > { %p10059_p3 = pnand %p10057_p2, %p10385_p7  ;;  %p10066_p1 = por %p10065_p0, %p10064_p13 }
  0xd7   : > { %p10060_p12 = pneg %p10059_p3 }
  0xd9   : > { %p10067_p4 = pnand %p10066_p1, %p10060_p12 }
  0xdb   : > { %10070 = shalt.err (!%p10067_p4)
}
  0xdc   : > { %9219 = dma.hbm_to_vmem [thread:$0]  (!%p10375_p5), %s10295_s6, 256, %s941_s16, [#allocation11], %s11906_s26, %s11906_s26, %s10167_s23  }
  0xdd   : > { %s10071_s28 = scalar_lea.hbm %s10330_s4, 4096 }
  0xde   : > { %p10072_p6 = scmp.ne.s32.totalorder %s10330_s4, %s10071_s28  ;;  %p10078_p10 = scmp.lt.u32.totalorder %s10071_s28, %s10330_s4 }
  0xe0   : > { %p10074_p8 = pnand %p10072_p6, %p10385_p7 }
  0xe2   : > { %p10075_p9 = pneg %p10074_p8 }
  0xe4   : > { %p10080_p11 = pnand %p10078_p10, %p10075_p9 }
  0xe6   : > { %10083 = shalt.err (!%p10080_p11)
}
  0xe7   : > { %s10084_s3 = scalar_lea.vmem %s972_s2, 4096  ;;  %p10092_p13 = scmp.lt.s32.totalorder %s972_s2, %s972_s2 }
  0xe8   : > { %p10085_p2 = scmp.ne.s32.totalorder %s972_s2, %s10084_s3  ;;  %p10093_p0 = scmp.lt.s32.totalorder %s10084_s3, %s10084_s3 }
  0xea   : > { %p10087_p3 = pnand %p10085_p2, %p10385_p7  ;;  %p10094_p1 = por %p10093_p0, %p10092_p13 }
  0xec   : > { %p10088_p12 = pneg %p10087_p3 }
  0xee   : > { %p10095_p4 = pnand %p10094_p1, %p10088_p12 }
  0xf0   : > { %10098 = shalt.err (!%p10095_p4)
}
  0xf1   : > { %9222 = dma.hbm_to_vmem [thread:$0]  (!%p10375_p5), %s10330_s4, 4096, %s972_s2, [#allocation14], %s11906_s26, %s11906_s26, %s10167_s23  }
  0xf2   : > { %p11907_p6 = scmp.ne.s32.totalorder %s11903_s15, 0 }
  0xf4   : > { %1004 = sbr.rel (%p11907_p6) target bundleno = 4678 (0x1246), region = 152 }
  0xfb   : > { %p11908_p8 = scmp.eq.s32.totalorder %s10358_s11, 0 }
  0xfd   : > { %10104 = dma.done.wait (%p11908_p8), [#allocation3], 64   ;;  %p11909_p7 = pmov %p11908_p8 }
  0xff   : > { %10106 = vsyncadd (%p11909_p7), [#allocation3], 4294967232  ;;  %p11910_p9 = pmov %p11909_p7 }
 0x100   : > { %p11911_p10 = pmov %p11909_p7 }
 0x101   : > { %10108 = dma.done.wait (%p11910_p9), [#allocation5], 3136  }
 0x102   : > { %10110 = vsyncadd (%p11911_p10), [#allocation5], 4294964160  ;;  %p11912_p11 = pmov %p11909_p7 }
 0x103   : > { %p11913_p5 = pmov %p11909_p7 }
 0x104   : > { %10112 = dma.done.wait (%p11912_p11), [#allocation8], 320  }
 0x105   : > { %10114 = vsyncadd (%p11913_p5), [#allocation8], 4294966976  ;;  %p11914_p2 = pmov %p11913_p5 }
 0x107   : > { %10116 = dma.done.wait (%p11914_p2), [#allocation11], 512   ;;  %p11915_p3 = pmov %p11914_p2 }
 0x108   : > { %p11916_p12 = pmov %p11914_p2 }
 0x109   : > { %10118 = vsyncadd (%p11915_p3), [#allocation11], 4294966784 }
 0x10a   : > { %10120 = dma.done.wait (%p11916_p12), [#allocation14], 4096   ;;  %p11917_p13 = pmov %p11914_p2 }
 0x10b   : > { %v9389_v0 = vld [vmem:[%s10190_s9 + $0x4] ss:$24 sps:$4 sm:$0xff]   ;;  %v9391_v1 = vld [vmem:[%s10190_s9] ss:$24 sps:$4 sm:$0xff]   ;;  %v9392_v2 = vld [vmem:[%s10190_s9 + $0x34] ss:$24 sps:$4 sm:$0xff]  }
 0x10c   : > { %10122 = vsyncadd (%p11917_p13), [#allocation14], 4294963200  ;;  %2287 = vmatprep.subr.bf16.mxu0 %v9389_v0  ;;  %v9394_v3 = vld [vmem:[%s10190_s9 + $0x30] ss:$24 sps:$4 sm:$0xff]   ;;  %v9395_v4 = vld [vmem:[%s10190_s9 + $0x64] ss:$24 sps:$4 sm:$0xff]  }
 0x10d   : > { %2288 = vmatpush1.bf16.msra.mxu0 %v9391_v1  ;;  %v9397_v5 = vld [vmem:[%s10190_s9 + $0x60] ss:$24 sps:$4 sm:$0xff]   ;;  %v9398_v6 = vld [vmem:[%s10190_s9 + $0x94] ss:$24 sps:$4 sm:$0xff]   ;;  %p1116_p0 = scmp.lt.s32.totalorder %s10358_s11, 1  ;;  %s11918_s1 = sld [smem:[#allocation25_spill]] }
 0x10e   : > { %2289 = vmatprep.subr.bf16.mxu0 %v9392_v2  ;;  %v9400_v7 = vld [vmem:[%s10190_s9 + $0x90] ss:$24 sps:$4 sm:$0xff]   ;;  %v9401_v8 = vld [vmem:[%s10190_s9 + $0xc4] ss:$24 sps:$4 sm:$0xff]   ;;  %v9403_v9 = vld [vmem:[%s10190_s9 + $0xc0] ss:$24 sps:$4 sm:$0xff]  }
 0x10f   : > { %s12076_s11 = smov (!%p1116_p0, %s10358_s11), 1  ;;  %v9404_v10 = vld [vmem:[%s10190_s9 + $0xf4] ss:$24 sps:$4 sm:$0xff]   ;;  %v9406_v11 = vld [vmem:[%s10190_s9 + $0xf0] ss:$24 sps:$4 sm:$0xff]   ;;  %s11919_s23 = sld [smem:[#allocation23_spill]] }
 0x110   : > { %s8128_s15 = sshll.u32 %s12076_s11, 5  ;;  %v9407_v12 = vld [vmem:[%s10190_s9 + $0x124] ss:$24 sps:$4 sm:$0xff]   ;;  %v9439_v14 = vld [vmem:[%s10190_s9 + $0x8] ss:$24 sps:$4 sm:$0xff]   ;;  %vm2544_vm0 = vcmask 261120  }
 0x111   : > { %2290 = vmatpush1.bf16.msra.mxu0 %v9394_v3  ;;  %s10530_s22 = scalar_lea.vmem %s10185_s5, %s8128_s15  ;;  %v9437_v13 = vld [vmem:[%s10190_s9 + $0xc] ss:$24 sps:$4 sm:$0xff]   ;;  %v9409_v16 = vld [vmem:[%s10190_s9 + $0x120] ss:$24 sps:$4 sm:$0xff]   ;;  %v9443_v19 = vld [vmem:[%s10190_s9 + $0x3c] ss:$24 sps:$4 sm:$0xff]  }
 0x112   : > { %2291 = vmatprep.subr.bf16.mxu0 %v9395_v4  ;;  %v1128_v15 = vld [vmem:[%s10530_s22 + $0x8] sm:$0xff]  ;;  %2369 = vmatprep.subr.bf16.mxu1 %v9437_v13  ;;  %v9445_v20 = vld [vmem:[%s10190_s9 + $0x38] ss:$24 sps:$4 sm:$0xff]   ;;  %v9413_v22 = vld [vmem:[%s10190_s9 + $0x184] ss:$24 sps:$4 sm:$0xff]   ;;  %vm2628_vm1 = vcmask 64512  }
 0x113   : > { %v10537_v17 = vpack.c.bf16 %v1128_v15, %v1128_v15  ;;  %v9410_v18 = vld [vmem:[%s10190_s9 + $0x154] ss:$24 sps:$4 sm:$0xff]   ;;  %2370 = vmatpush1.bf16.msra.mxu1 %v9439_v14  ;;  %v9412_v21 = vld [vmem:[%s10190_s9 + $0x150] ss:$24 sps:$4 sm:$0xff]   ;;  %v9415_v26 = vld [vmem:[%s10190_s9 + $0x180] ss:$24 sps:$4 sm:$0xff]  }
 0x114   : > { %2371 = vmatprep.subr.bf16.mxu1 %v9443_v19  ;;  %v9449_v23 = vld [vmem:[%s10190_s9 + $0x6c] ss:$24 sps:$4 sm:$0xff]   ;;  %v9451_v24 = vld [vmem:[%s10190_s9 + $0x68] ss:$24 sps:$4 sm:$0xff]   ;;  %v9455_v25 = vld [vmem:[%s10190_s9 + $0x9c] ss:$24 sps:$4 sm:$0xff]  }
 0x115   : > { %2292 = vmatpush1.bf16.msra.mxu0 %v9397_v5  ;;  %2319 = vmatprep.mubr.bf16.mxu0 %v10537_v17  ;;  %v9416_v27 = vld [vmem:[%s10190_s9 + $0x1b4] ss:$24 sps:$4 sm:$0xff]   ;;  %v9457_v28 = vld [vmem:[%s10190_s9 + $0x98] ss:$24 sps:$4 sm:$0xff]   ;;  %v9419_v31 = vld [vmem:[%s10190_s9 + $0x1e4] ss:$24 sps:$4 sm:$0xff]  }
 0x116   : > { %2293 = vmatprep.subr.bf16.mxu0 %v9398_v6  ;;  %2401 = vmatprep.mubr.bf16.mxu1 %v10537_v17  ;;  %v9461_v29 = vld [vmem:[%s10190_s9 + $0xcc] ss:$24 sps:$4 sm:$0xff]   ;;  %v9418_v30 = vld [vmem:[%s10190_s9 + $0x1b0] ss:$24 sps:$4 sm:$0xff]   ;;  %v9467_v33 = vld [vmem:[%s10190_s9 + $0xfc] ss:$24 sps:$4 sm:$0xff]  }
 0x117   : > { %2372 = vmatpush1.bf16.msra.mxu1 %v9445_v20  ;;  %v9463_v32 = vld [vmem:[%s10190_s9 + $0xc8] ss:$24 sps:$4 sm:$0xff]   ;;  %v9422_v35 = vld [vmem:[%s10190_s9 + $0x214] ss:$24 sps:$4 sm:$0xff]   ;;  %v9469_v36 = vld [vmem:[%s10190_s9 + $0xf8] ss:$24 sps:$4 sm:$0xff]  }
 0x118   : > { %2373 = vmatprep.subr.bf16.mxu1 %v9449_v23  ;;  %v9421_v34 = vld [vmem:[%s10190_s9 + $0x1e0] ss:$24 sps:$4 sm:$0xff]   ;;  %v9473_v37 = vld [vmem:[%s10190_s9 + $0x12c] ss:$24 sps:$4 sm:$0xff]   ;;  %v9424_v38 = vld [vmem:[%s10190_s9 + $0x210] ss:$24 sps:$4 sm:$0xff]  }
 0x119   : > { %2294 = vmatpush1.bf16.msra.mxu0 %v9400_v7  ;;  %v9425_v39 = vld [vmem:[%s10190_s9 + $0x244] ss:$24 sps:$4 sm:$0xff]   ;;  %v9475_v40 = vld [vmem:[%s10190_s9 + $0x128] ss:$24 sps:$4 sm:$0xff]   ;;  %v9428_v43 = vld [vmem:[%s10190_s9 + $0x274] ss:$24 sps:$4 sm:$0xff]  }
 0x11a   : > { %2295 = vmatprep.subr.bf16.mxu0 %v9401_v8  ;;  %v9479_v41 = vld [vmem:[%s10190_s9 + $0x15c] ss:$24 sps:$4 sm:$0xff]   ;;  %v9427_v42 = vld [vmem:[%s10190_s9 + $0x240] ss:$24 sps:$4 sm:$0xff]   ;;  %v9485_v45 = vld [vmem:[%s10190_s9 + $0x18c] ss:$24 sps:$4 sm:$0xff]  }
 0x11b   : > { %2374 = vmatpush1.bf16.msra.mxu1 %v9451_v24  ;;  %v9481_v44 = vld [vmem:[%s10190_s9 + $0x158] ss:$24 sps:$4 sm:$0xff]   ;;  %v9431_v47 = vld [vmem:[%s10190_s9 + $0x2a4] ss:$24 sps:$4 sm:$0xff]   ;;  %v9487_v48 = vld [vmem:[%s10190_s9 + $0x188] ss:$24 sps:$4 sm:$0xff]  }
 0x11c   : > { %2375 = vmatprep.subr.bf16.mxu1 %v9455_v25  ;;  %v9430_v46 = vld [vmem:[%s10190_s9 + $0x270] ss:$24 sps:$4 sm:$0xff]   ;;  %v9491_v49 = vld [vmem:[%s10190_s9 + $0x1bc] ss:$24 sps:$4 sm:$0xff]   ;;  %v9433_v50 = vld [vmem:[%s10190_s9 + $0x2a0] ss:$24 sps:$4 sm:$0xff]  }
 0x11d   : > { %2296 = vmatpush1.bf16.msra.mxu0 %v9403_v9  ;;  %v9434_v51 = vld [vmem:[%s10190_s9 + $0x2d4] ss:$24 sps:$4 sm:$0xff]   ;;  %v9436_v52 = vld [vmem:[%s10190_s9 + $0x2d0] ss:$24 sps:$4 sm:$0xff]   ;;  %v1127_v55 = vld [vmem:[%s10530_s22] sm:$0xff]  ;;  %vm2635_vm2 = vcmask 1043456  }
 0x11e   : > { %2297 = vmatprep.subr.bf16.mxu0 %v9404_v10  ;;  %v9493_v53 = vld [vmem:[%s10190_s9 + $0x1b8] ss:$24 sps:$4 sm:$0xff]   ;;  %v9497_v54 = vld [vmem:[%s10190_s9 + $0x1ec] ss:$24 sps:$4 sm:$0xff]   ;;  %v9499_v57 = vld [vmem:[%s10190_s9 + $0x1e8] ss:$24 sps:$4 sm:$0xff]   ;;  %v10581_v58 = vpack.c.bf16 %v1127_v55, %v1127_v55 }
 0x11f   : > { %2376 = vmatpush1.bf16.msra.mxu1 %v9457_v28  ;;  %v9442_v56 = vld [vmem:[%s10190_s9 + $0x304] ss:$24 sps:$4 sm:$0xff]   ;;  %v9440_v60 = vld [vmem:[%s10190_s9 + $0x300] ss:$24 sps:$4 sm:$0xff]   ;;  %v9448_v61 = vld [vmem:[%s10190_s9 + $0x334] ss:$24 sps:$4 sm:$0xff]  }
 0x120   : > { %2377 = vmatprep.subr.bf16.mxu1 %v9461_v29  ;;  %v9503_v59 = vld [vmem:[%s10190_s9 + $0x21c] ss:$24 sps:$4 sm:$0xff]   ;;  %v9505_v62 = vld [vmem:[%s10190_s9 + $0x218] ss:$24 sps:$4 sm:$0xff]   ;;  %v9509_v63 = vld [vmem:[%s10190_s9 + $0x24c] ss:$24 sps:$4 sm:$0xff]  }
 0x121   : > { %2298 = vmatpush1.bf16.msra.mxu0 %v9406_v11  ;;  %v1130_v0 = vld [vmem:[%s10530_s22 + $0x18] sm:$0xff]  ;;  %v9446_v1 = vld [vmem:[%s10190_s9 + $0x330] ss:$24 sps:$4 sm:$0xff]   ;;  %v9460_v7 = vld [vmem:[%s10190_s9 + $0x394] ss:$24 sps:$4 sm:$0xff]   ;;  %vm10174_vm3 = vmmov 0  }
 0x122   : > { %2299 = vmatprep.subr.bf16.mxu0 %v9407_v12  ;;  %v10591_v2 = vpack.c.bf16 %v1130_v0, %v1130_v0  ;;  %v9454_v3 = vld [vmem:[%s10190_s9 + $0x364] ss:$24 sps:$4 sm:$0xff]   ;;  %v9511_v4 = vld [vmem:[%s10190_s9 + $0x248] ss:$24 sps:$4 sm:$0xff]   ;;  %v9517_v8 = vld [vmem:[%s10190_s9 + $0x278] ss:$24 sps:$4 sm:$0xff]  }
 0x123   : > { %2378 = vmatpush1.bf16.msra.mxu1 %v9463_v32  ;;  %v9515_v5 = vld [vmem:[%s10190_s9 + $0x27c] ss:$24 sps:$4 sm:$0xff]   ;;  %v9452_v6 = vld [vmem:[%s10190_s9 + $0x360] ss:$24 sps:$4 sm:$0xff]   ;;  %v9521_v9 = vld [vmem:[%s10190_s9 + $0x2ac] ss:$24 sps:$4 sm:$0xff]  }
 0x124   : > { %2379 = vmatprep.subr.bf16.mxu1 %v9467_v33  ;;  %v9458_v10 = vld [vmem:[%s10190_s9 + $0x390] ss:$24 sps:$4 sm:$0xff]   ;;  %v9466_v11 = vld [vmem:[%s10190_s9 + $0x3c4] ss:$24 sps:$4 sm:$0xff]   ;;  %v9464_v14 = vld [vmem:[%s10190_s9 + $0x3c0] ss:$24 sps:$4 sm:$0xff]  }
 0x125   : > { %2300 = vmatpush1.bf16.msra.mxu0 %v9409_v16  ;;  %v9523_v12 = vld [vmem:[%s10190_s9 + $0x2a8] ss:$24 sps:$4 sm:$0xff]   ;;  %v9527_v13 = vld [vmem:[%s10190_s9 + $0x2dc] ss:$24 sps:$4 sm:$0xff]   ;;  %v9529_v16 = vld [vmem:[%s10190_s9 + $0x2d8] ss:$24 sps:$4 sm:$0xff]  }
 0x126   : > { %2301 = vmatprep.subr.bf16.mxu0 %v9410_v18  ;;  %v9472_v15 = vld [vmem:[%s10190_s9 + $0x3f4] ss:$24 sps:$4 sm:$0xff]   ;;  %v9470_v19 = vld [vmem:[%s10190_s9 + $0x3f0] ss:$24 sps:$4 sm:$0xff]   ;;  %v9478_v20 = vld [vmem:[%s10190_s9 + $0x424] ss:$24 sps:$4 sm:$0xff]  }
 0x127   : > { %2380 = vmatpush1.bf16.msra.mxu1 %v9469_v36  ;;  %v9535_v18 = vld [vmem:[%s10190_s9 + $0x30c] ss:$24 sps:$4 sm:$0xff]   ;;  %v9476_v23 = vld [vmem:[%s10190_s9 + $0x420] ss:$24 sps:$4 sm:$0xff]   ;;  %s11920_s26 = sld [smem:[#allocation21_spill]]  ;;  %s11921_s10 = sld [smem:[#allocation22_spill]] }
 0x128   : > { %2381 = vmatprep.subr.bf16.mxu1 %v9473_v37  ;;  %v9484_v24 = vld [vmem:[%s10190_s9 + $0x454] ss:$24 sps:$4 sm:$0xff]   ;;  %v9539_v25 = vld [vmem:[%s10190_s9 + $0x338] ss:$24 sps:$4 sm:$0xff]   ;;  %v9490_v28 = vld [vmem:[%s10190_s9 + $0x484] ss:$24 sps:$4 sm:$0xff]  }
 0x129   : > { %2302 = vmatpush1.bf16.msra.mxu0 %v9412_v21  ;;  %v9533_v21 = vld [vmem:[%s10190_s9 + $0x308] ss:$24 sps:$4 sm:$0xff]   ;;  %v9496_v32 = vld [vmem:[%s10190_s9 + $0x4b4] ss:$24 sps:$4 sm:$0xff]   ;;  %v9551_v33 = vld [vmem:[%s10190_s9 + $0x398] ss:$24 sps:$4 sm:$0xff]  }
 0x12a   : > { %2303 = vmatprep.subr.bf16.mxu0 %v9413_v22  ;;  %v9541_v22 = vld [vmem:[%s10190_s9 + $0x33c] ss:$24 sps:$4 sm:$0xff]   ;;  %v9545_v29 = vld [vmem:[%s10190_s9 + $0x368] ss:$24 sps:$4 sm:$0xff]   ;;  %s11922_s16 = sld [smem:[#allocation29_spill]]  ;;  %s11923_s0 = sld [smem:[#allocation24_spill]] }
 0x12b   : > { %2382 = vmatpush1.bf16.msra.mxu1 %v9475_v40  ;;  %v9502_v36 = vld [vmem:[%s10190_s9 + $0x4e4] ss:$24 sps:$4 sm:$0xff]   ;;  %v9557_v37 = vld [vmem:[%s10190_s9 + $0x3c8] ss:$24 sps:$4 sm:$0xff]   ;;  %v9508_v40 = vld [vmem:[%s10190_s9 + $0x514] ss:$24 sps:$4 sm:$0xff]  }
 0x12c   : > { %2383 = vmatprep.subr.bf16.mxu1 %v9479_v41  ;;  %v9563_v41 = vld [vmem:[%s10190_s9 + $0x3f8] ss:$24 sps:$4 sm:$0xff]   ;;  %vm3561_vm4 = vcmask 523264   ;;  %s11924_s2 = sld [smem:[#allocation26_spill]]  ;;  %s11878_s18 = smov 64   ;;  %vm7513_vm5 = vcmask 7168  }
 0x12d   : > { %2304 = vmatpush1.bf16.msra.mxu0 %v9415_v26  ;;  %v9547_v26 = vld [vmem:[%s10190_s9 + $0x36c] ss:$24 sps:$4 sm:$0xff]   ;;  %v9524_v55 = vld [vmem:[%s10190_s9 + $0x5a0] ss:$24 sps:$4 sm:$0xff]   ;;  %s11925_s28 = sld [smem:[#allocation30_spill]]  ;;  %s11926_s3 = sld [smem:[#allocation28_spill]] }
 0x12e   : > { %2305 = vmatprep.subr.bf16.mxu0 %v9416_v27  ;;  %v9482_v27 = vld [vmem:[%s10190_s9 + $0x450] ss:$24 sps:$4 sm:$0xff]   ;;  %s11927_s15 = sld [smem:[#allocation32_spill]]  ;;  %vm7515_vm6 = vcmask 1024  }
 0x12f   : > { %2384 = vmatpush1.bf16.msra.mxu1 %v9481_v44  ;;  %v9514_v44 = vld [vmem:[%s10190_s9 + $0x544] ss:$24 sps:$4 sm:$0xff]  }
 0x130   : > { %2385 = vmatprep.subr.bf16.mxu1 %v9485_v45  ;;  %v9569_v45 = vld [vmem:[%s10190_s9 + $0x428] ss:$24 sps:$4 sm:$0xff]  }
 0x131   : > { %2306 = vmatpush1.bf16.msra.mxu0 %v9418_v30  ;;  %v9553_v30 = vld [vmem:[%s10190_s9 + $0x39c] ss:$24 sps:$4 sm:$0xff]  }
 0x132   : > { %2307 = vmatprep.subr.bf16.mxu0 %v9419_v31  ;;  %v9488_v31 = vld [vmem:[%s10190_s9 + $0x480] ss:$24 sps:$4 sm:$0xff]  }
 0x133   : > { %2386 = vmatpush1.bf16.msra.mxu1 %v9487_v48  ;;  %v9520_v48 = vld [vmem:[%s10190_s9 + $0x574] ss:$24 sps:$4 sm:$0xff]  }
 0x134   : > { %2387 = vmatprep.subr.bf16.mxu1 %v9491_v49  ;;  %v9575_v49 = vld [vmem:[%s10190_s9 + $0x458] ss:$24 sps:$4 sm:$0xff]  }
 0x135   : > { %2308 = vmatpush1.bf16.msra.mxu0 %v9421_v34  ;;  %v9559_v34 = vld [vmem:[%s10190_s9 + $0x3cc] ss:$24 sps:$4 sm:$0xff]  }
 0x136   : > { %2309 = vmatprep.subr.bf16.mxu0 %v9422_v35  ;;  %v9494_v35 = vld [vmem:[%s10190_s9 + $0x4b0] ss:$24 sps:$4 sm:$0xff]  }
 0x137   : > { %2388 = vmatpush1.bf16.msra.mxu1 %v9493_v53  ;;  %v9581_v53 = vld [vmem:[%s10190_s9 + $0x488] ss:$24 sps:$4 sm:$0xff]  }
 0x138   : > { %2389 = vmatprep.subr.bf16.mxu1 %v9497_v54  ;;  %v9589_v54 = vld [vmem:[%s10190_s9 + $0x4bc] ss:$24 sps:$4 sm:$0xff]  }
 0x139   : > { %2310 = vmatpush1.bf16.msra.mxu0 %v9424_v38  ;;  %v9565_v38 = vld [vmem:[%s10190_s9 + $0x3fc] ss:$24 sps:$4 sm:$0xff]  }
 0x13a   : > { %2311 = vmatprep.subr.bf16.mxu0 %v9425_v39  ;;  %v9500_v39 = vld [vmem:[%s10190_s9 + $0x4e0] ss:$24 sps:$4 sm:$0xff]  }
 0x13b   : > { %2390 = vmatpush1.bf16.msra.mxu1 %v9499_v57  ;;  %v9587_v57 = vld [vmem:[%s10190_s9 + $0x4b8] ss:$24 sps:$4 sm:$0xff]  }
 0x13c   : > { %2391 = vmatprep.subr.bf16.mxu1 %v9503_v59  ;;  %v9595_v59 = vld [vmem:[%s10190_s9 + $0x4ec] ss:$24 sps:$4 sm:$0xff]  }
 0x13d   : > { %2312 = vmatpush1.bf16.msra.mxu0 %v9427_v42  ;;  %v9571_v42 = vld [vmem:[%s10190_s9 + $0x42c] ss:$24 sps:$4 sm:$0xff]  }
 0x13e   : > { %2313 = vmatprep.subr.bf16.mxu0 %v9428_v43  ;;  %v9506_v43 = vld [vmem:[%s10190_s9 + $0x510] ss:$24 sps:$4 sm:$0xff]  }
 0x13f   : > { %2392 = vmatpush1.bf16.msra.mxu1 %v9505_v62  ;;  %v9538_v62 = vld [vmem:[%s10190_s9 + $0x14] ss:$24 sps:$4 sm:$0xff]  }
 0x140   : > { %2393 = vmatprep.subr.bf16.mxu1 %v9509_v63  ;;  %v9593_v63 = vld [vmem:[%s10190_s9 + $0x4e8] ss:$24 sps:$4 sm:$0xff]  }
 0x141   : > { %2314 = vmatpush1.bf16.msra.mxu0 %v9430_v46  ;;  %v9577_v46 = vld [vmem:[%s10190_s9 + $0x45c] ss:$24 sps:$4 sm:$0xff]  }
 0x142   : > { %2315 = vmatprep.subr.bf16.mxu0 %v9431_v47  ;;  %v9512_v47 = vld [vmem:[%s10190_s9 + $0x540] ss:$24 sps:$4 sm:$0xff]  }
 0x143   : > { %2394 = vmatpush1.bf16.msra.mxu1 %v9511_v4  ;;  %v9544_v4 = vld [vmem:[%s10190_s9 + $0x44] ss:$24 sps:$4 sm:$0xff]  }
 0x144   : > { %2395 = vmatprep.subr.bf16.mxu1 %v9515_v5  ;;  %v9599_v5 = vld [vmem:[%s10190_s9 + $0x518] ss:$24 sps:$4 sm:$0xff]  }
 0x145   : > { %2316 = vmatpush1.bf16.msra.mxu0 %v9433_v50  ;;  %v9583_v50 = vld [vmem:[%s10190_s9 + $0x48c] ss:$24 sps:$4 sm:$0xff]  }
 0x146   : > { %2317 = vmatprep.subr.bf16.mxu0 %v9434_v51  ;;  %v9518_v51 = vld [vmem:[%s10190_s9 + $0x570] ss:$24 sps:$4 sm:$0xff]  }
 0x147   : > { %2396 = vmatpush1.bf16.msra.mxu1 %v9517_v8  ;;  %v9550_v8 = vld [vmem:[%s10190_s9 + $0x74] ss:$24 sps:$4 sm:$0xff]  }
 0x148   : > { %2397 = vmatprep.subr.bf16.mxu1 %v9521_v9  ;;  %v9605_v9 = vld [vmem:[%s10190_s9 + $0x548] ss:$24 sps:$4 sm:$0xff]  }
 0x149   : > { %2318 = vmatpush1.bf16.msra.mxu0 %v9436_v52  ;;  %v9526_v52 = vld [vmem:[%s10190_s9 + $0x5a4] ss:$24 sps:$4 sm:$0xff]  }
 0x14a   : > { %2328 = vmatprep.subr.bf16.mxu0 %v9442_v56  ;;  %v9532_v56 = vld [vmem:[%s10190_s9 + $0x5d4] ss:$24 sps:$4 sm:$0xff]  }
 0x14b   : > { %2398 = vmatpush1.bf16.msra.mxu1 %v9523_v12  ;;  %v9556_v12 = vld [vmem:[%s10190_s9 + $0xa4] ss:$24 sps:$4 sm:$0xff]  }
 0x14c   : > { %2320 = vmatmul.mubr.bf16.vlgmr.msra.gmra.mrb[0].mxu0 %v10581_v58  ;;  %2399 = vmatprep.subr.bf16.mxu1 %v9527_v13  ;;  %v9611_v13 = vld [vmem:[%s10190_s9 + $0x578] ss:$24 sps:$4 sm:$0xff]  }
 0x14d   : > { %2329 = vmatpush1.bf16.msra.mxu0 %v9440_v60  ;;  %2360 = vmatprep.mubr.bf16.mxu0 %v10591_v2  ;;  %v9530_v60 = vld [vmem:[%s10190_s9 + $0x5d0] ss:$24 sps:$4 sm:$0xff]  }
 0x14e   : > { %2330 = vmatprep.subr.bf16.mxu0 %v9448_v61  ;;  %v1129_v61 = vld [vmem:[%s10530_s22 + $0x10] sm:$0xff] }
 0x14f   : > { %2400 = vmatpush1.bf16.msra.mxu1 %v9529_v16  ;;  %v10655_v0 = vpack.c.bf16 %v1129_v61, %v1129_v61  ;;  %v9617_v16 = vld [vmem:[%s10190_s9 + $0x5a8] ss:$24 sps:$4 sm:$0xff]  }
 0x150   : > { %2410 = vmatprep.subr.bf16.mxu1 %v9535_v18  ;;  %v9625_v18 = vld [vmem:[%s10190_s9 + $0x5dc] ss:$24 sps:$4 sm:$0xff]   ;;  %v9656_v61 = vld [vmem:[%s10190_s9 + $0x4c0] ss:$24 sps:$4 sm:$0xff]  }
 0x151   : > { %2331 = vmatpush1.bf16.msra.mxu0 %v9446_v1  ;;  %v9601_v1 = vld [vmem:[%s10190_s9 + $0x51c] ss:$24 sps:$4 sm:$0xff]  }
 0x152   : > { %2332 = vmatprep.subr.bf16.mxu0 %v9454_v3  ;;  %2402 = vmatmul.mubr.bf16.vlgmr.msra.gmra.mrb[0].mxu1 %v10581_v58  ;;  %v9536_v3 = vld [vmem:[%s10190_s9 + $0x10] ss:$24 sps:$4 sm:$0xff]  }
 0x153   : > { %2411 = vmatpush1.bf16.msra.mxu1 %v9533_v21  ;;  %2442 = vmatprep.mubr.bf16.mxu1 %v10591_v2  ;;  %v9623_v21 = vld [vmem:[%s10190_s9 + $0x5d8] ss:$24 sps:$4 sm:$0xff]  }
 0x154   : > { %2412 = vmatprep.subr.bf16.mxu1 %v9541_v22  ;;  %v9566_v22 = vld [vmem:[%s10190_s9 + $0x100] ss:$24 sps:$4 sm:$0xff]  }
 0x155   : > { %2333 = vmatpush1.bf16.msra.mxu0 %v9452_v6  ;;  %v9542_v6 = vld [vmem:[%s10190_s9 + $0x40] ss:$24 sps:$4 sm:$0xff]  }
 0x156   : > { %2334 = vmatprep.subr.bf16.mxu0 %v9460_v7  ;;  %v9607_v7 = vld [vmem:[%s10190_s9 + $0x54c] ss:$24 sps:$4 sm:$0xff]  }
 0x157   : > { %2413 = vmatpush1.bf16.msra.mxu1 %v9539_v25  ;;  %v9580_v25 = vld [vmem:[%s10190_s9 + $0x164] ss:$24 sps:$4 sm:$0xff]  }
 0x158   : > { %2414 = vmatprep.subr.bf16.mxu1 %v9547_v26  ;;  %v9578_v26 = vld [vmem:[%s10190_s9 + $0x160] ss:$24 sps:$4 sm:$0xff]  }
 0x159   : > { %2335 = vmatpush1.bf16.msra.mxu0 %v9458_v10  ;;  %v9613_v10 = vld [vmem:[%s10190_s9 + $0x57c] ss:$24 sps:$4 sm:$0xff]  }
 0x15a   : > { %2336 = vmatprep.subr.bf16.mxu0 %v9466_v11  ;;  %v9548_v11 = vld [vmem:[%s10190_s9 + $0x70] ss:$24 sps:$4 sm:$0xff]  }
 0x15b   : > { %2415 = vmatpush1.bf16.msra.mxu1 %v9545_v29  ;;  %v9592_v29 = vld [vmem:[%s10190_s9 + $0x1c4] ss:$24 sps:$4 sm:$0xff]  }
 0x15c   : > { %2416 = vmatprep.subr.bf16.mxu1 %v9553_v30  ;;  %v9590_v30 = vld [vmem:[%s10190_s9 + $0x1c0] ss:$24 sps:$4 sm:$0xff]  }
 0x15d   : > { %2337 = vmatpush1.bf16.msra.mxu0 %v9464_v14  ;;  %v9619_v14 = vld [vmem:[%s10190_s9 + $0x5ac] ss:$24 sps:$4 sm:$0xff]  }
 0x15e   : > { %2338 = vmatprep.subr.bf16.mxu0 %v9472_v15  ;;  %v9554_v15 = vld [vmem:[%s10190_s9 + $0xa0] ss:$24 sps:$4 sm:$0xff]  }
 0x15f   : > { %2417 = vmatpush1.bf16.msra.mxu1 %v9551_v33  ;;  %v9604_v33 = vld [vmem:[%s10190_s9 + $0x224] ss:$24 sps:$4 sm:$0xff]  }
 0x160   : > { %2418 = vmatprep.subr.bf16.mxu1 %v9559_v34  ;;  %v9602_v34 = vld [vmem:[%s10190_s9 + $0x220] ss:$24 sps:$4 sm:$0xff]  }
 0x161   : > { %2339 = vmatpush1.bf16.msra.mxu0 %v9470_v19  ;;  %v9560_v19 = vld [vmem:[%s10190_s9 + $0xd0] ss:$24 sps:$4 sm:$0xff]  }
 0x162   : > { %2340 = vmatprep.subr.bf16.mxu0 %v9478_v20  ;;  %v9568_v20 = vld [vmem:[%s10190_s9 + $0x104] ss:$24 sps:$4 sm:$0xff]  }
 0x163   : > { %2419 = vmatpush1.bf16.msra.mxu1 %v9557_v37  ;;  %v9616_v37 = vld [vmem:[%s10190_s9 + $0x284] ss:$24 sps:$4 sm:$0xff]  }
 0x164   : > { %2420 = vmatprep.subr.bf16.mxu1 %v9565_v38  ;;  %v9614_v38 = vld [vmem:[%s10190_s9 + $0x280] ss:$24 sps:$4 sm:$0xff]  }
 0x165   : > { %2341 = vmatpush1.bf16.msra.mxu0 %v9476_v23  ;;  %v9574_v23 = vld [vmem:[%s10190_s9 + $0x134] ss:$24 sps:$4 sm:$0xff]  }
 0x166   : > { %2342 = vmatprep.subr.bf16.mxu0 %v9484_v24  ;;  %v9572_v24 = vld [vmem:[%s10190_s9 + $0x130] ss:$24 sps:$4 sm:$0xff]  }
 0x167   : > { %2421 = vmatpush1.bf16.msra.mxu1 %v9563_v41  ;;  %v9628_v41 = vld [vmem:[%s10190_s9 + $0x2e4] ss:$24 sps:$4 sm:$0xff]  }
 0x168   : > { %2422 = vmatprep.subr.bf16.mxu1 %v9571_v42  ;;  %v9626_v42 = vld [vmem:[%s10190_s9 + $0x2e0] ss:$24 sps:$4 sm:$0xff]  }
 0x169   : > { %2343 = vmatpush1.bf16.msra.mxu0 %v9482_v27  ;;  %v9586_v27 = vld [vmem:[%s10190_s9 + $0x194] ss:$24 sps:$4 sm:$0xff]  }
 0x16a   : > { %2344 = vmatprep.subr.bf16.mxu0 %v9490_v28  ;;  %v9584_v28 = vld [vmem:[%s10190_s9 + $0x190] ss:$24 sps:$4 sm:$0xff]  }
 0x16b   : > { %2423 = vmatpush1.bf16.msra.mxu1 %v9569_v45  ;;  %v9634_v45 = vld [vmem:[%s10190_s9 + $0x344] ss:$24 sps:$4 sm:$0xff]  }
 0x16c   : > { %2424 = vmatprep.subr.bf16.mxu1 %v9577_v46  ;;  %v9632_v46 = vld [vmem:[%s10190_s9 + $0x340] ss:$24 sps:$4 sm:$0xff]  }
 0x16d   : > { %2345 = vmatpush1.bf16.msra.mxu0 %v9488_v31  ;;  %v9598_v31 = vld [vmem:[%s10190_s9 + $0x1f4] ss:$24 sps:$4 sm:$0xff]  }
 0x16e   : > { %2346 = vmatprep.subr.bf16.mxu0 %v9496_v32  ;;  %v9596_v32 = vld [vmem:[%s10190_s9 + $0x1f0] ss:$24 sps:$4 sm:$0xff]  }
 0x16f   : > { %2425 = vmatpush1.bf16.msra.mxu1 %v9575_v49  ;;  %v9640_v49 = vld [vmem:[%s10190_s9 + $0x3a4] ss:$24 sps:$4 sm:$0xff]  }
 0x170   : > { %2426 = vmatprep.subr.bf16.mxu1 %v9583_v50  ;;  %v9638_v50 = vld [vmem:[%s10190_s9 + $0x3a0] ss:$24 sps:$4 sm:$0xff]  }
 0x171   : > { %2347 = vmatpush1.bf16.msra.mxu0 %v9494_v35  ;;  %v9610_v35 = vld [vmem:[%s10190_s9 + $0x254] ss:$24 sps:$4 sm:$0xff]  }
 0x172   : > { %2348 = vmatprep.subr.bf16.mxu0 %v9502_v36  ;;  %v9608_v36 = vld [vmem:[%s10190_s9 + $0x250] ss:$24 sps:$4 sm:$0xff]  }
 0x173   : > { %2427 = vmatpush1.bf16.msra.mxu1 %v9581_v53  ;;  %v9649_v53 = vld [vmem:[%s10190_s9 + $0x434] ss:$24 sps:$4 sm:$0xff]  }
 0x174   : > { %2428 = vmatprep.subr.bf16.mxu1 %v9589_v54  ;;  %v9647_v54 = vld [vmem:[%s10190_s9 + $0x430] ss:$24 sps:$4 sm:$0xff]  }
 0x175   : > { %2349 = vmatpush1.bf16.msra.mxu0 %v9500_v39  ;;  %v9622_v39 = vld [vmem:[%s10190_s9 + $0x2b4] ss:$24 sps:$4 sm:$0xff]  }
 0x176   : > { %2350 = vmatprep.subr.bf16.mxu0 %v9508_v40  ;;  %v9620_v40 = vld [vmem:[%s10190_s9 + $0x2b0] ss:$24 sps:$4 sm:$0xff]  }
 0x177   : > { %2429 = vmatpush1.bf16.msra.mxu1 %v9587_v57  ;;  %v9655_v57 = vld [vmem:[%s10190_s9 + $0x494] ss:$24 sps:$4 sm:$0xff]  }
 0x178   : > { %2430 = vmatprep.subr.bf16.mxu1 %v9595_v59  ;;  %v9653_v59 = vld [vmem:[%s10190_s9 + $0x490] ss:$24 sps:$4 sm:$0xff]  }
 0x179   : > { %2351 = vmatpush1.bf16.msra.mxu0 %v9506_v43  ;;  %v9631_v43 = vld [vmem:[%s10190_s9 + $0x314] ss:$24 sps:$4 sm:$0xff]  }
 0x17a   : > { %2352 = vmatprep.subr.bf16.mxu0 %v9514_v44  ;;  %v9629_v44 = vld [vmem:[%s10190_s9 + $0x310] ss:$24 sps:$4 sm:$0xff]  }
 0x17b   : > { %2431 = vmatpush1.bf16.msra.mxu1 %v9593_v63  ;;  %v9659_v63 = vld [vmem:[%s10190_s9 + $0x4f0] ss:$24 sps:$4 sm:$0xff]  }
 0x17c   : > { %2432 = vmatprep.subr.bf16.mxu1 %v9601_v1  ;;  %v9664_v1 = vld [vmem:[%s10190_s9 + $0x524] ss:$24 sps:$4 sm:$0xff]  }
 0x17d   : > { %2353 = vmatpush1.bf16.msra.mxu0 %v9512_v47  ;;  %v9637_v47 = vld [vmem:[%s10190_s9 + $0x374] ss:$24 sps:$4 sm:$0xff]  }
 0x17e   : > { %2354 = vmatprep.subr.bf16.mxu0 %v9520_v48  ;;  %v9635_v48 = vld [vmem:[%s10190_s9 + $0x370] ss:$24 sps:$4 sm:$0xff]  }
 0x17f   : > { %2433 = vmatpush1.bf16.msra.mxu1 %v9599_v5  ;;  %v9665_v5 = vld [vmem:[%s10190_s9 + $0x550] ss:$24 sps:$4 sm:$0xff]  }
 0x180   : > { %2434 = vmatprep.subr.bf16.mxu1 %v9607_v7  ;;  %v9668_v7 = vld [vmem:[%s10190_s9 + $0x580] ss:$24 sps:$4 sm:$0xff]  }
 0x181   : > { %2355 = vmatpush1.bf16.msra.mxu0 %v9518_v51  ;;  %v9643_v51 = vld [vmem:[%s10190_s9 + $0x3d4] ss:$24 sps:$4 sm:$0xff]  }
 0x182   : > { %2356 = vmatprep.subr.bf16.mxu0 %v9526_v52  ;;  %v9646_v52 = vld [vmem:[%s10190_s9 + $0x404] ss:$24 sps:$4 sm:$0xff]  }
 0x183   : > { %2435 = vmatpush1.bf16.msra.mxu1 %v9605_v9  ;;  %v9671_v9 = vld [vmem:[%s10190_s9 + $0x5b0] ss:$24 sps:$4 sm:$0xff]  }
 0x184   : > { %2436 = vmatprep.subr.bf16.mxu1 %v9613_v10  ;;  %v9676_v10 = vld [vmem:[%s10190_s9 + $0x5e4] ss:$24 sps:$4 sm:$0xff]  }
 0x185   : > { %2357 = vmatpush1.bf16.msra.mxu0 %v9524_v55  ;;  %v9652_v55 = vld [vmem:[%s10190_s9 + $0x464] ss:$24 sps:$4 sm:$0xff]  }
 0x186   : > { %2358 = vmatprep.subr.bf16.mxu0 %v9532_v56  ;;  %v9650_v56 = vld [vmem:[%s10190_s9 + $0x460] ss:$24 sps:$4 sm:$0xff]  }
 0x187   : > { %2437 = vmatpush1.bf16.msra.mxu1 %v9611_v13 }
 0x188   : > { %2438 = vmatprep.subr.bf16.mxu1 %v9619_v14  ;;  %v9873_v14 = vld [vmem:[%s10530_s22 + $0x8] sm:$0xff] }
 0x189   : > { %2359 = vmatpush1.bf16.msra.mxu0 %v9530_v60  ;;  %v9658_v60 = vld [vmem:[%s10190_s9 + $0x4c4] ss:$24 sps:$4 sm:$0xff]  }
 0x18a   : > { %2451 = vmatprep.subr.bf16.mxu0 %v9538_v62  ;;  %v9661_v62 = vld [vmem:[%s10190_s9 + $0x4f4] ss:$24 sps:$4 sm:$0xff]  }
 0x18b   : > { %2439 = vmatpush1.bf16.msra.mxu1 %v9617_v16  ;;  %v9874_v16 = vld [vmem:[%s10530_s22] sm:$0xff]  ;;  %s11928_s22 = sld [smem:[#allocation27_spill]] }
 0x18c   : > { %2361 = vmatmul.mubr.bf16.vlgmr.msra.gmra.mrb[0].mxu0 %v10655_v0  ;;  %2440 = vmatprep.subr.bf16.mxu1 %v9625_v18 }
 0x18d   : > { %2452 = vmatpush1.bf16.msra.mxu0 %v9536_v3  ;;  %2483 = vmatprep.mubr.bf16.mxu0 %v10537_v17  ;;  %v9562_v17 = vld [vmem:[%s10190_s9 + $0xd4] ss:$24 sps:$4 sm:$0xff]   ;;  %v9662_v3 = vld [vmem:[%s10190_s9 + $0x520] ss:$24 sps:$4 sm:$0xff]  }
 0x18e   : > { %2453 = vmatprep.subr.bf16.mxu0 %v9544_v4  ;;  %v9667_v4 = vld [vmem:[%s10190_s9 + $0x554] ss:$24 sps:$4 sm:$0xff]  }
 0x18f   : > { %2441 = vmatpush1.bf16.msra.mxu1 %v9623_v21  ;;  %v2689_v21 = vld [vmem:[%s10215_s29] sm:$0xff] }
 0x191   : > { %2454 = vmatpush1.bf16.msra.mxu0 %v9542_v6  ;;  %v9670_v6 = vld [vmem:[%s10190_s9 + $0x584] ss:$24 sps:$4 sm:$0xff]  }
 0x192   : > { %2455 = vmatprep.subr.bf16.mxu0 %v9550_v8  ;;  %2443 = vmatmul.mubr.bf16.vlgmr.msra.gmra.mrb[0].mxu1 %v10655_v0  ;;  %v9673_v8 = vld [vmem:[%s10190_s9 + $0x5b4] ss:$24 sps:$4 sm:$0xff]  }
 0x195   : > { %2456 = vmatpush1.bf16.msra.mxu0 %v9548_v11  ;;  %v9674_v11 = vld [vmem:[%s10190_s9 + $0x5e0] ss:$24 sps:$4 sm:$0xff]  }
 0x196   : > { %2457 = vmatprep.subr.bf16.mxu0 %v9556_v12 }
 0x199   : > { %2458 = vmatpush1.bf16.msra.mxu0 %v9554_v15 }
 0x19a   : > { %2459 = vmatprep.subr.bf16.mxu0 %v9562_v17 }
 0x19d   : > { %2460 = vmatpush1.bf16.msra.mxu0 %v9560_v19 }
 0x19e   : > { %2461 = vmatprep.subr.bf16.mxu0 %v9568_v20  ;;  %v10172_v20 = vmov 0  }
 0x19f   : > { %2580 = vmatprep.mubr.bf16.mxu1 %v10172_v20  ;;  %9297 = vset.pattern.permute.xlu0 %v10172_v20 }
 0x1a0   : > { %9298 = vset.pattern.permute.xlu1 %v10172_v20 }
 0x1a1   : > { %2462 = vmatpush1.bf16.msra.mxu0 %v9566_v22  ;;  %v2595_v22 = vld [vmem:[%s10245_s30 + $0x8] sm:$0xff] }
 0x1a2   : > { %2463 = vmatprep.subr.bf16.mxu0 %v9574_v23  ;;  %v3040_v23 = vld [vmem:[%s10235_s19 + $0x8] sm:$0xff] }
 0x1a5   : > { %2464 = vmatpush1.bf16.msra.mxu0 %v9572_v24 }
 0x1a6   : > { %2465 = vmatprep.subr.bf16.mxu0 %v9580_v25  ;;  %v2597_v25 = vld [vmem:[%s10245_s30 + $0x18] sm:$0xff] }
 0x1a9   : > { %2466 = vmatpush1.bf16.msra.mxu0 %v9578_v26 }
 0x1aa   : > { %2467 = vmatprep.subr.bf16.mxu0 %v9586_v27 }
 0x1ad   : > { %2468 = vmatpush1.bf16.msra.mxu0 %v9584_v28 }
 0x1ae   : > { %2469 = vmatprep.subr.bf16.mxu0 %v9592_v29  ;;  %v3042_v29 = vld [vmem:[%s10235_s19 + $0x18] sm:$0xff] }
 0x1b1   : > { %2470 = vmatpush1.bf16.msra.mxu0 %v9590_v30  ;;  %v3419_v30 = vld [vmem:[%s11918_s1 + $0x8] sm:$0xff] }
 0x1b2   : > { %2471 = vmatprep.subr.bf16.mxu0 %v9598_v31  ;;  %v3421_v31 = vld [vmem:[%s11918_s1 + $0x18] sm:$0xff] }
 0x1b5   : > { %2472 = vmatpush1.bf16.msra.mxu0 %v9596_v32 }
 0x1b6   : > { %2473 = vmatprep.subr.bf16.mxu0 %v9604_v33 }
 0x1b9   : > { %2474 = vmatpush1.bf16.msra.mxu0 %v9602_v34 }
 0x1ba   : > { %2475 = vmatprep.subr.bf16.mxu0 %v9610_v35 }
 0x1bd   : > { %2476 = vmatpush1.bf16.msra.mxu0 %v9608_v36 }
 0x1be   : > { %2477 = vmatprep.subr.bf16.mxu0 %v9616_v37 }
 0x1c1   : > { %2478 = vmatpush1.bf16.msra.mxu0 %v9614_v38  ;;  %v2533_v38 = vld [vmem:[#allocation2] sm:$0xf] }
 0x1c2   : > { %2479 = vmatprep.subr.bf16.mxu0 %v9622_v39  ;;  %v9677_v39 = vld [vmem:[%s11919_s23] sm:$0xff]  }
 0x1c5   : > { %2480 = vmatpush1.bf16.msra.mxu0 %v9620_v40 }
 0x1c6   : > { %2481 = vmatprep.subr.bf16.mxu0 %v9628_v41 }
 0x1c9   : > { %2482 = vmatpush1.bf16.msra.mxu0 %v9626_v42 }
 0x1ca   : > { %2492 = vmatprep.subr.bf16.mxu0 %v9631_v43 }
 0x1cc   : > { %2484 = vmatmul.mubr.bf16.vlgmr.msra.gmra.mrb[4].mxu0 %v10581_v58  ;;  %v9641_v58 = vld [vmem:[%s10190_s9 + $0x3d0] ss:$24 sps:$4 sm:$0xff]  }
 0x1cd   : > { %2493 = vmatpush1.bf16.msra.mxu0 %v9629_v44  ;;  %2524 = vmatprep.mubr.bf16.mxu0 %v10591_v2  ;;  %v9644_v2 = vld [vmem:[%s10190_s9 + $0x400] ss:$24 sps:$4 sm:$0xff]  }
 0x1ce   : > { %2494 = vmatprep.subr.bf16.mxu0 %v9634_v45 }
 0x1d1   : > { %2495 = vmatpush1.bf16.msra.mxu0 %v9632_v46 }
 0x1d2   : > { %2496 = vmatprep.subr.bf16.mxu0 %v9637_v47 }
 0x1d5   : > { %2497 = vmatpush1.bf16.msra.mxu0 %v9635_v48 }
 0x1d6   : > { %2498 = vmatprep.subr.bf16.mxu0 %v9640_v49  ;;  %v9678_v49 = vld [vmem:[%s11919_s23 + $0x8] sm:$0xff]  }
 0x1d9   : > { %2499 = vmatpush1.bf16.msra.mxu0 %v9638_v50  ;;  %v10173_v50 = vmov 0.0  }
 0x1da   : > { %2500 = vmatprep.subr.bf16.mxu0 %v9643_v51  ;;  %v9681_v51 = vld [vmem:[#allocation4 + $0x4] ss:$12 sps:$4 sm:$0xff]  }
 0x1dd   : > { %2501 = vmatpush1.bf16.msra.mxu0 %v9641_v58  ;;  %v2688_v58 = vld [vmem:[#allocation6] sm:$0xf] }
 0x1de   : > { %2502 = vmatprep.subr.bf16.mxu0 %v9646_v52  ;;  %v9679_v52 = vld [vmem:[#allocation4] ss:$12 sps:$4 sm:$0xff]  }
 0x1e1   : > { %2503 = vmatpush1.bf16.msra.mxu0 %v9644_v2  ;;  %v9684_v2 = vld [vmem:[#allocation4 + $0x1c] ss:$12 sps:$4 sm:$0xff]  }
 0x1e2   : > { %2504 = vmatprep.subr.bf16.mxu0 %v9649_v53  ;;  %v9682_v53 = vld [vmem:[#allocation4 + $0x18] ss:$12 sps:$4 sm:$0xff]  }
 0x1e5   : > { %2505 = vmatpush1.bf16.msra.mxu0 %v9647_v54  ;;  %v9687_v54 = vld [vmem:[#allocation4 + $0x34] ss:$12 sps:$4 sm:$0xff]  }
 0x1e6   : > { %2506 = vmatprep.subr.bf16.mxu0 %v9652_v55  ;;  %v9685_v55 = vld [vmem:[#allocation4 + $0x30] ss:$12 sps:$4 sm:$0xff]  }
 0x1e9   : > { %2507 = vmatpush1.bf16.msra.mxu0 %v9650_v56  ;;  %v9690_v56 = vld [vmem:[#allocation4 + $0x4c] ss:$12 sps:$4 sm:$0xff]  }
 0x1ea   : > { %2508 = vmatprep.subr.bf16.mxu0 %v9655_v57  ;;  %v9688_v57 = vld [vmem:[#allocation4 + $0x48] ss:$12 sps:$4 sm:$0xff]  }
 0x1ed   : > { %2509 = vmatpush1.bf16.msra.mxu0 %v9653_v59  ;;  %v9693_v59 = vld [vmem:[#allocation4 + $0x64] ss:$12 sps:$4 sm:$0xff]  }
 0x1ee   : > { %2510 = vmatprep.subr.bf16.mxu0 %v9658_v60  ;;  %v9691_v60 = vld [vmem:[#allocation4 + $0x60] ss:$12 sps:$4 sm:$0xff]  }
 0x1f1   : > { %2511 = vmatpush1.bf16.msra.mxu0 %v9656_v61  ;;  %v9696_v61 = vld [vmem:[#allocation4 + $0x7c] ss:$12 sps:$4 sm:$0xff]  }
 0x1f2   : > { %2512 = vmatprep.subr.bf16.mxu0 %v9661_v62  ;;  %v9694_v62 = vld [vmem:[#allocation4 + $0x78] ss:$12 sps:$4 sm:$0xff]  }
 0x1f5   : > { %2513 = vmatpush1.bf16.msra.mxu0 %v9659_v63  ;;  %v9699_v63 = vld [vmem:[#allocation4 + $0x94] ss:$12 sps:$4 sm:$0xff]  }
 0x1f6   : > { %2514 = vmatprep.subr.bf16.mxu0 %v9664_v1  ;;  %v9697_v1 = vld [vmem:[#allocation4 + $0x90] ss:$12 sps:$4 sm:$0xff]  }
 0x1f9   : > { %2515 = vmatpush1.bf16.msra.mxu0 %v9662_v3  ;;  %v9702_v3 = vld [vmem:[#allocation4 + $0xac] ss:$12 sps:$4 sm:$0xff]  }
 0x1fa   : > { %2516 = vmatprep.subr.bf16.mxu0 %v9667_v4  ;;  %v9700_v4 = vld [vmem:[#allocation4 + $0xa8] ss:$12 sps:$4 sm:$0xff]  }
 0x1fd   : > { %2517 = vmatpush1.bf16.msra.mxu0 %v9665_v5 }
 0x1fe   : > { %2518 = vmatprep.subr.bf16.mxu0 %v9670_v6 }
 0x201   : > { %2519 = vmatpush1.bf16.msra.mxu0 %v9668_v7 }
 0x202   : > { %2520 = vmatprep.subr.bf16.mxu0 %v9673_v8 }
 0x205   : > { %2521 = vmatpush1.bf16.msra.mxu0 %v9671_v9 }
 0x206   : > { %2522 = vmatprep.subr.bf16.mxu0 %v9676_v10 }
 0x209   : > { %2523 = vmatpush1.bf16.msra.mxu0 %v9674_v11 }
 0x20c   : > { %2525 = vmatmul.mubr.bf16.vlgmr.msra.gmra.mrb[4].mxu0 %v10655_v0  ;;  %v2538_v0 = vld [vmem:[%s10200_s17] sm:$0xff] }
 0x20d   : > { %2541 = vperm.xlu0 %9297, %v2538_v0   ;;  %v9710_v0 = vld [vmem:[#allocation4 + $0xb0] ss:$12 sps:$4 sm:$0xff]  }
 0x211   : > { %2692 = vperm.xlu0 %9297, %v2689_v21   ;;  %v2984_v21 = vld [vmem:[%s11920_s26] sm:$0xff]  ;;  %s11929_s26 = sld [smem:[#allocation31_spill]] }
 0x212   : > { %2987 = vperm.xlu1 %9298, %v2984_v21   ;;  %v9724_v21 = vld [vmem:[%s11923_s0 + $0x10] ss:$8 sps:$4 sm:$0xff]  }
 0x215   : > { %2605 = vperm.xlu0 %9297, %v2595_v22   ;;  %v2594_v22 = vld [vmem:[%s10245_s30] sm:$0xff] }
 0x216   : > { %2600 = vperm.xlu1 %9298, %v2594_v22   ;;  %v9718_v22 = vld [vmem:[%s11922_s16 + $0x18] sm:$0xff]  }
 0x219   : > { %3050 = vperm.xlu0 %9297, %v3040_v23   ;;  %v3039_v23 = vld [vmem:[%s10235_s19] sm:$0xff] }
 0x21a   : > { %3045 = vperm.xlu1 %9298, %v3039_v23   ;;  %v9719_v23 = vld [vmem:[%s11922_s16 + $0x20] sm:$0xff]  }
 0x21d   : > { %2615 = vperm.xlu0 %9297, %v2597_v25   ;;  %v3041_v25 = vld [vmem:[%s10235_s19 + $0x10] sm:$0xff] }
 0x221   : > { %3060 = vperm.xlu0 %9297, %v3042_v29  }
 0x225   : > { %3429 = vperm.xlu0 %9297, %v3419_v30  }
 0x229   : > { %3439 = vperm.xlu0 %9297, %v3421_v31  }
 0x25f   : > { %v2362_v12 = vpop.f32.mrb[0].mxu0 }
 0x260   : > { %v2364_v13 = vpop.f32.mrb[1].mxu0  ;;  %v2534_v18 = vpack.c.bf16 %v2362_v12, %v9874_v16  ;;  %v9703_v12 = vld [vmem:[#allocation4 + $0x8] ss:$12 sps:$4 sm:$0xff]  }
 0x261   : > { %v2535_v15 = vpack.c.bf16 %v2364_v13, %v9873_v14  ;;  %v2366_v17 = vpop.f32.mrb[2].mxu0  ;;  %v9704_v14 = vld [vmem:[#allocation4 + $0x20] ss:$12 sps:$4 sm:$0xff]   ;;  %v9707_v16 = vld [vmem:[#allocation4 + $0x68] ss:$12 sps:$4 sm:$0xff]  }
 0x262   : > { %v2367_v19 = vpop.f32.mrb[3].mxu0  ;;  %v9706_v17 = vld [vmem:[#allocation4 + $0x50] ss:$12 sps:$4 sm:$0xff]  }
 0x263   : > { %2548 = vmatprep.subr.bf16.mxu1 %v2535_v15  ;;  %v9705_v15 = vld [vmem:[#allocation4 + $0x38] ss:$12 sps:$4 sm:$0xff]  }
 0x264   : > { %2549 = vmatpush1.bf16.msra.mxu1 %v2534_v18  ;;  %v9708_v18 = vld [vmem:[#allocation4 + $0x80] ss:$12 sps:$4 sm:$0xff]   ;;  %v9709_v19 = vld [vmem:[#allocation4 + $0x98] ss:$12 sps:$4 sm:$0xff]  }
 0x265   : > { %v2444_v24 = vpop.f32.mrb[0].mxu1 }
 0x266   : > { %v2446_v26 = vpop.f32.mrb[1].mxu1 }
 0x267   : > { %v2448_v27 = vpop.f32.mrb[2].mxu1 }
 0x268   : > { %v2449_v28 = vpop.f32.mrb[3].mxu1  ;;  %v3420_v27 = vld [vmem:[%s11918_s1 + $0x10] sm:$0xff] }
 0x28c   : > { %v2542_v40 = vpop.permute.xlu0 %2541 }
 0x290   : > { %v2693_v5 = vpop.permute.xlu0 %2692 }
 0x2df   : > { %v2526_v32 = vpop.f32.mrb[4].mxu0 }
 0x2e0   : > { %v2536_v33 = vpack.c.bf16 %v2526_v32, %v2444_v24  ;;  %v2528_v34 = vpop.f32.mrb[5].mxu0  ;;  %v2596_v24 = vld [vmem:[%s10245_s30 + $0x10] sm:$0xff] }
 0x2e1   : > { %v2537_v35 = vpack.c.bf16 %v2528_v34, %v2446_v26  ;;  %v2530_v36 = vpop.f32.mrb[6].mxu0  ;;  %2610 = vperm.xlu1 %9298, %v2596_v24   ;;  %v3418_v26 = vld [vmem:[%s11918_s1] sm:$0xff]  ;;  %v9720_v24 = vld [vmem:[%s11922_s16 + $0x28] sm:$0xff]   ;;  %s11960_s1 = smov 64  }
 0x2e2   : > { %v2531_v37 = vpop.f32.mrb[7].mxu0 }
 0x2e3   : > { %2550 = vmatprep.subr.bf16.mxu1 %v2537_v35 }
 0x2e4   : > { %2551 = vmatpush1.bf16.msra.mxu1 %v2536_v33 }
 0x2e5   : > { %3055 = vperm.xlu1 %9298, %v3041_v25   ;;  %v9727_v25 = vld [vmem:[%s11922_s16 + $0x30] sm:$0xff]  }
 0x2e7   : > { %7929 = vmatmul.mubr.msk.bf16.vlgmr.msra.gmra.mrb[4].mxu1 %vm2544_vm0, %v2533_v38  ;;  %v2981_v38 = vld [vmem:[#allocation7] sm:$0xf] }
 0x2e8   : > { %8496 = vmatprep.mubr.msk.bf16.mxu1 %vm2628_vm1, %v9677_v39  ;;  %v9711_v39 = vld [vmem:[%s11921_s10] sm:$0xff]  }
 0x2e9   : > { %3424 = vperm.xlu1 %9298, %v3418_v26   ;;  %v9728_v26 = vld [vmem:[%s11922_s16 + $0x38] sm:$0xff]  }
 0x2ed   : > { %3434 = vperm.xlu1 %9298, %v3420_v27   ;;  %v9731_v27 = vld [vmem:[%s11923_s0 + $0x24] ss:$8 sps:$4 sm:$0xff]  }
 0x3ba   : > { %v2582_v41 = vpop.f32.mrb[4].mxu1 }
 0x3bb   : > { %v2583_v42 = vadd.f32 %v2582_v41, %v2542_v40  ;;  %v2584_v43 = vpop.f32.mrb[5].mxu1  ;;  %v2988_v40 = vpop.permute.xlu1 %2987 }
 0x3bc   : > { %v2585_v44 = vpop.f32.mrb[6].mxu1 }
 0x3bd   : > { %v2588_v45 = vmax.f32 %v2583_v42, 0.0  ;;  %v2586_v46 = vpop.f32.mrb[7].mxu1 }
 0x3bf   : > { %v2593_v47 = vpack.c.bf16 %v2588_v45, %v2588_v45 }
 0x3c1   : > { %9164 = vmatprep.subr.msk.bf16.mxu1 %vm2635_vm2, %v2593_v47  ;;  %v2637_v48 = vsel %vm2635_vm2, %v2593_v47, 0 }
 0x3c2   : > { %8495 = vmatpush3.bf16.msra.mxu1 %v2637_v48 }
 0x3c3   : > { %8500 = vmatprep.subr.bf16.mxu1 %v10173_v50 }
 0x3c5   : > { %8497 = vmatmul.mubr.msk.bf16.vlgmr.msra.gmra.mrb[8].mxu1 %vm2628_vm1, %v9678_v49  ;;  %v9712_v49 = vld [vmem:[%s11921_s10 + $0x8] sm:$0xff]  }
 0x3c6   : > { %8501 = vmatpush3.bf16.msra.mxu1 %v2637_v48  ;;  %8502 = vmatprep.mubr.msk.bf16.mxu1 %vm10174_vm3, %v10173_v50 }
 0x3c7   : > { %2900 = vmatprep.subr.bf16.mxu1 %v9681_v51  ;;  %v9715_v51 = vld [vmem:[%s11922_s16] sm:$0xff]  }
 0x3cd   : > { %8503 = vmatmul.mubr.msk.bf16.vlgmr.msra.gmra.mrb[12].mxu1 %vm2628_vm1, %v2688_v58  ;;  %v2601_v58 = vpop.permute.xlu1 %2600 }
 0x3ce   : > { %2901 = vmatpush1.bf16.msra.mxu1 %v9679_v52  ;;  %2932 = vmatprep.mubr.bf16.mxu1 %v10172_v20  ;;  %v2606_v52 = vpop.permute.xlu0 %2605 }
 0x3cf   : > { %2902 = vmatprep.subr.bf16.mxu1 %v9684_v2 }
 0x3d1   : > { %v3046_v2 = vpop.permute.xlu1 %3045 }
 0x3d2   : > { %2903 = vmatpush1.bf16.msra.mxu1 %v9682_v53  ;;  %v3051_v53 = vpop.permute.xlu0 %3050 }
 0x3d3   : > { %2904 = vmatprep.subr.bf16.mxu1 %v9687_v54 }
 0x3d5   : > { %v2611_v54 = vpop.permute.xlu1 %2610 }
 0x3d6   : > { %2905 = vmatpush1.bf16.msra.mxu1 %v9685_v55  ;;  %v2616_v55 = vpop.permute.xlu0 %2615 }
 0x3d7   : > { %2906 = vmatprep.subr.bf16.mxu1 %v9690_v56 }
 0x3d9   : > { %v3056_v56 = vpop.permute.xlu1 %3055 }
 0x3da   : > { %2907 = vmatpush1.bf16.msra.mxu1 %v9688_v57  ;;  %v8900_v57 = vadd.f32 %v3056_v56, %v2611_v54 }
 0x3db   : > { %2908 = vmatprep.subr.bf16.mxu1 %v9693_v59  ;;  %v3061_v59 = vpop.permute.xlu0 %3060 }
 0x3de   : > { %2909 = vmatpush1.bf16.msra.mxu1 %v9691_v60  ;;  %v8902_v60 = vadd.f32 %v3046_v2, %v2601_v58 }
 0x3df   : > { %2910 = vmatprep.subr.bf16.mxu1 %v9696_v61 }
 0x3e2   : > { %2911 = vmatpush1.bf16.msra.mxu1 %v9694_v62  ;;  %v8904_v62 = vadd.f32 %v3061_v59, %v2616_v55 }
 0x3e3   : > { %2912 = vmatprep.subr.bf16.mxu1 %v9699_v63 }
 0x3e6   : > { %2913 = vmatpush1.bf16.msra.mxu1 %v9697_v1 }
 0x3e7   : > { %2914 = vmatprep.subr.bf16.mxu1 %v9702_v3  ;;  %v8906_v3 = vadd.f32 %v3051_v53, %v2606_v52 }
 0x3ea   : > { %2915 = vmatpush1.bf16.msra.mxu1 %v9700_v4 }
 0x3eb   : > { %8506 = vmatprep.subr.bf16.mxu1 %v10173_v50 }
 0x4a0   : > { %v2732_v6 = vpop.f32.mrb[12].mxu1 }
 0x4a1   : > { %v2733_v7 = vadd.f32 %v2732_v6, %v2693_v5  ;;  %v8504_v8 = vpop.f32.mrb[13].mxu1 }
 0x4a2   : > { %v2735_v9 = vpop.f32.mrb[14].mxu1 }
 0x4a3   : > { %v2738_v10 = vmax.f32 %v2733_v7, 0.0  ;;  %v8505_v11 = vpop.f32.mrb[15].mxu1 }
 0x4a5   : > { %v2739_v13 = vpack.c.bf16 %v2738_v10, %v2738_v10 }
 0x4a7   : > { %2933 = vmatmul.mubr.bf16.vlgmr.msra.gmra.mrb[16].mxu1 %v2739_v13 }
 0x4a8   : > { %8507 = vmatpush3.bf16.msra.mxu1 %v9703_v12  ;;  %8522 = vmatprep.mubr.msk.bf16.mxu1 %vm10174_vm3, %v10173_v50 }
 0x4a9   : > { %8508 = vmatprep.subr.bf16.mxu1 %v10173_v50 }
 0x4ac   : > { %8509 = vmatpush3.bf16.msra.mxu1 %v9704_v14 }
 0x4ad   : > { %8510 = vmatprep.subr.bf16.mxu1 %v10173_v50 }
 0x4b0   : > { %8511 = vmatpush3.bf16.msra.mxu1 %v9705_v15  ;;  %v9723_v15 = vld [vmem:[%s11923_s0 + $0x4] ss:$8 sps:$4 sm:$0xff]  }
 0x4b1   : > { %8512 = vmatprep.subr.bf16.mxu1 %v10173_v50 }
 0x4b4   : > { %8513 = vmatpush3.bf16.msra.mxu1 %v9706_v17  ;;  %v9714_v17 = vld [vmem:[#allocation9 + $0x8] sm:$0xff]  }
 0x4b5   : > { %8514 = vmatprep.subr.bf16.mxu1 %v10173_v50 }
 0x4b8   : > { %8515 = vmatpush3.bf16.msra.mxu1 %v9707_v16  ;;  %v9716_v16 = vld [vmem:[%s11922_s16 + $0x8] sm:$0xff]  }
 0x4b9   : > { %8516 = vmatprep.subr.bf16.mxu1 %v10173_v50 }
 0x4bc   : > { %8517 = vmatpush3.bf16.msra.mxu1 %v9708_v18  ;;  %v9717_v18 = vld [vmem:[%s11922_s16 + $0x10] sm:$0xff]  }
 0x4bd   : > { %8518 = vmatprep.subr.bf16.mxu1 %v10173_v50 }
 0x4c0   : > { %8519 = vmatpush3.bf16.msra.mxu1 %v9709_v19  ;;  %v9721_v19 = vld [vmem:[%s11923_s0] ss:$8 sps:$4 sm:$0xff]  }
 0x4c1   : > { %8520 = vmatprep.subr.bf16.mxu1 %v10173_v50 }
 0x4c4   : > { %8521 = vmatpush3.bf16.msra.mxu1 %v9710_v0  ;;  %v9726_v0 = vld [vmem:[%s11923_s0 + $0x14] ss:$8 sps:$4 sm:$0xff]  }
 0x4c5   : > { %8526 = vmatprep.subr.bf16.mxu1 %v10173_v50 }
 0x4c7   : > { %8523 = vmatmul.mubr.bf16.vlgmr.msra.gmra.mrb[20].mxu1 %v2739_v13 }
 0x4c8   : > { %8530 = vmatprep.mubr.msk.bf16.mxu1 %vm10174_vm3, %v10173_v50 }
 0x57a   : > { %v2934_v28 = vpop.f32.mrb[16].mxu1 }
 0x57b   : > { %v2982_v29 = vpack.c.bf16 %v2934_v28, %v2738_v10  ;;  %v2936_v30 = vpop.f32.mrb[17].mxu1  ;;  %v9729_v28 = vld [vmem:[%s11923_s0 + $0x20] ss:$8 sps:$4 sm:$0xff]  }
 0x57c   : > { %v2938_v31 = vpop.f32.mrb[18].mxu1 }
 0x57d   : > { %v2939_v32 = vpop.f32.mrb[19].mxu1  ;;  %8527 = vmatpush3.bf16.msra.mxu1 %v2982_v29  ;;  %v9734_v29 = vld [vmem:[%s11923_s0 + $0x34] ss:$8 sps:$4 sm:$0xff]   ;;  %v3425_v31 = vpop.permute.xlu1 %3424 }
 0x57e   : > { %8528 = vmatprep.subr.bf16.mxu1 %v10173_v50  ;;  %v9713_v50 = vld [vmem:[#allocation9] sm:$0xff]   ;;  %v3430_v32 = vpop.permute.xlu0 %3429 }
 0x57f   : > { %8564 = vmatprep.mubr.msk.bf16.mxu0 %vm2544_vm0, %v9713_v50 }
 0x59a   : > { %v2975_v33 = vpop.f32.mrb[20].mxu1 }
 0x59b   : > { %v2983_v34 = vpack.c.bf16 %v2975_v33, %v2936_v30  ;;  %v8524_v35 = vpop.f32.mrb[21].mxu1  ;;  %v9732_v30 = vld [vmem:[%s11923_s0 + $0x30] ss:$8 sps:$4 sm:$0xff]   ;;  %v3435_v33 = vpop.permute.xlu1 %3434  ;;  %s10176_s0 = smov 96  }
 0x59c   : > { %v2978_v36 = vpop.f32.mrb[22].mxu1 }
 0x59d   : > { %v8525_v37 = vpop.f32.mrb[23].mxu1  ;;  %8529 = vmatpush3.bf16.msra.mxu1 %v2983_v34 }
 0x59e   : > { %v3440_v37 = vpop.permute.xlu0 %3439 }
 0x5a0   : > { %8531 = vmatmul.mubr.msk.bf16.vlgmr.msra.gmra.mrb[24].mxu1 %vm2544_vm0, %v2981_v38 }
 0x5a1   : > { %8536 = vmatprep.mubr.msk.bf16.mxu1 %vm2628_vm1, %v9711_v39 }
 0x673   : > { %v3027_v41 = vpop.f32.mrb[24].mxu1 }
 0x674   : > { %v3028_v42 = vadd.f32 %v3027_v41, %v2988_v40  ;;  %v8532_v43 = vpop.f32.mrb[25].mxu1 }
 0x675   : > { %v3030_v44 = vpop.f32.mrb[26].mxu1 }
 0x676   : > { %v3033_v45 = vmax.f32 %v3028_v42, 0.0  ;;  %v8533_v46 = vpop.f32.mrb[27].mxu1 }
 0x678   : > { %v3038_v47 = vpack.c.bf16 %v3033_v45, %v3033_v45 }
 0x67a   : > { %9165 = vmatprep.subr.msk.bf16.mxu1 %vm2635_vm2, %v3038_v47  ;;  %v3080_v48 = vsel %vm2635_vm2, %v3038_v47, 0 }
 0x67b   : > { %8535 = vmatpush3.bf16.msra.mxu1 %v3080_v48 }
 0x67e   : > { %8537 = vmatmul.mubr.msk.bf16.vlgmr.msra.gmra.mrb[8].mxu1 %vm2628_vm1, %v9712_v49 }
 0x67f   : > { %8544 = vmatprep.mubr.msk.bf16.mxu1 %vm2544_vm0, %v9715_v51 }
 0x751   : > { %v8538_v61 = vpop.f32.mrb[8].mxu1 }
 0x752   : > { %v8901_v63 = vadd.f32 %v8900_v57, %v8538_v61  ;;  %v3116_v1 = vpop.f32.mrb[9].mxu1  ;;  %v3649_v57 = vld [vmem:[%s11924_s2 + $0x10] sm:$0xff] }
 0x753   : > { %v8903_v4 = vadd.f32 %v8902_v60, %v3116_v1  ;;  %v8539_v5 = vpop.f32.mrb[10].mxu1  ;;  %v3157_v1 = vld [vmem:[%s11925_s28] sm:$0xff] }
 0x754   : > { %v8905_v6 = vadd.f32 %v8904_v62, %v8539_v5  ;;  %v3119_v7 = vpop.f32.mrb[11].mxu1  ;;  %v3137_v9 = vmax.f32 %v8901_v63, 0.0  ;;  %v9735_v63 = vld [vmem:[#allocation10] sm:$0xff]  }
 0x755   : > { %v8907_v8 = vadd.f32 %v8906_v3, %v3119_v7  ;;  %v3135_v11 = vmax.f32 %v8903_v4, 0.0  ;;  %v3648_v3 = vld [vmem:[%s11924_s2 + $0x8] sm:$0xff]  ;;  %v3754_v4 = vld [vmem:[%s11926_s3] sm:$0xff]  ;;  %v3650_v5 = vld [vmem:[%s11924_s2 + $0x18] sm:$0xff] }
 0x756   : > { %v3138_v10 = vmax.f32 %v8905_v6, 0.0  ;;  %v3159_v6 = vld [vmem:[%s11925_s28 + $0x10] sm:$0xff]  ;;  %v3158_v7 = vld [vmem:[%s11925_s28 + $0x8] sm:$0xff] }
 0x757   : > { %v3136_v12 = vmax.f32 %v8907_v8, 0.0  ;;  %v3756_v8 = vld [vmem:[%s11926_s3 + $0x10] sm:$0xff] }
 0x758   : > { %v3156_v13 = vpack.c.bf16 %v3138_v10, %v3137_v9  ;;  %v3755_v9 = vld [vmem:[%s11926_s3 + $0x8] sm:$0xff]  ;;  %v3161_v10 = vld [vmem:[%s11925_s28 + $0x20] sm:$0xff] }
 0x759   : > { %v3155_v14 = vpack.c.bf16 %v3136_v12, %v3135_v11  ;;  %v3160_v11 = vld [vmem:[%s11925_s28 + $0x18] sm:$0xff]  ;;  %v3758_v12 = vld [vmem:[%s11926_s3 + $0x20] sm:$0xff] }
 0x75b   : > { %8540 = vmatprep.subr.bf16.mxu1 %v3155_v14  ;;  %8560 = vmatprep.subr.bf16.mxu0 %v3155_v14 }
 0x75c   : > { %8541 = vmatpush3.bf16.msra.mxu1 %v3155_v14  ;;  %8561 = vmatpush3.bf16.msra.mxu0 %v3155_v14  ;;  %v3163_v14 = vld [vmem:[%s11925_s28 + $0x30] sm:$0xff] }
 0x75d   : > { %8542 = vmatprep.subr.bf16.mxu1 %v3156_v13  ;;  %8562 = vmatprep.subr.bf16.mxu0 %v3156_v13 }
 0x760   : > { %8543 = vmatpush3.bf16.msra.mxu1 %v3156_v13  ;;  %8563 = vmatpush3.bf16.msra.mxu0 %v3156_v13  ;;  %v3757_v13 = vld [vmem:[%s11926_s3 + $0x18] sm:$0xff] }
 0x761   : > { %3568 = vmatprep.subr.bf16.mxu1 %v9723_v15  ;;  %v3162_v15 = vld [vmem:[%s11925_s28 + $0x28] sm:$0xff] }
 0x763   : > { %8565 = vmatmul.mubr.msk.bf16.vlgmr.msra.gmra.mrb[8].mxu0 %vm2544_vm0, %v9714_v17  ;;  %8545 = vmatmul.mubr.msk.bf16.vlgmr.msra.gmra.mrb[28].mxu1 %vm2544_vm0, %v9716_v16  ;;  %v3760_v17 = vld [vmem:[%s11926_s3 + $0x30] sm:$0xff]  ;;  %v3759_v16 = vld [vmem:[%s11926_s3 + $0x28] sm:$0xff] }
 0x764   : > { %8548 = vmatprep.mubr.msk.bf16.mxu1 %vm2544_vm0, %v9717_v18  ;;  %3569 = vmatpush1.bf16.msra.mxu1 %v9721_v19  ;;  %v3165_v18 = vld [vmem:[%s11925_s28 + $0x40] sm:$0xff]  ;;  %v3164_v19 = vld [vmem:[%s11925_s28 + $0x38] sm:$0xff] }
 0x765   : > { %3570 = vmatprep.subr.bf16.mxu1 %v9726_v0  ;;  %8584 = vmatprep.mubr.bf16.mxu0 %v9735_v63  ;;  %v3762_v0 = vld [vmem:[%s11926_s3 + $0x40] sm:$0xff] }
 0x768   : > { %3571 = vmatpush1.bf16.msra.mxu1 %v9724_v21  ;;  %v3761_v21 = vld [vmem:[%s11926_s3 + $0x38] sm:$0xff] }
 0x769   : > { %3572 = vmatprep.subr.bf16.mxu1 %v9731_v27  ;;  %v3168_v27 = vld [vmem:[%s11925_s28 + $0x58] sm:$0xff] }
 0x76b   : > { %8549 = vmatmul.mubr.msk.bf16.gmra.mrb[32].mxu1 %vm2544_vm0, %v9718_v22  ;;  %v3167_v22 = vld [vmem:[%s11925_s28 + $0x50] sm:$0xff] }
 0x76c   : > { %8552 = vmatprep.mubr.msk.bf16.mxu1 %vm2544_vm0, %v9719_v23  ;;  %3573 = vmatpush1.bf16.msra.mxu1 %v9729_v28  ;;  %v3166_v23 = vld [vmem:[%s11925_s28 + $0x48] sm:$0xff]  ;;  %v3766_v28 = vld [vmem:[%s11926_s3 + $0x60] sm:$0xff] }
 0x76d   : > { %3574 = vmatprep.subr.bf16.mxu1 %v9734_v29  ;;  %v3765_v29 = vld [vmem:[%s11926_s3 + $0x58] sm:$0xff] }
 0x770   : > { %3575 = vmatpush1.bf16.msra.mxu1 %v9732_v30  ;;  %v3171_v30 = vld [vmem:[%s11925_s28 + $0x70] sm:$0xff] }
 0x773   : > { %8553 = vmatmul.mubr.msk.bf16.gmra.mrb[36].mxu1 %vm2544_vm0, %v9720_v24  ;;  %v3764_v24 = vld [vmem:[%s11926_s3 + $0x50] sm:$0xff] }
 0x774   : > { %8556 = vmatprep.mubr.msk.bf16.mxu1 %vm2544_vm0, %v9727_v25  ;;  %v3763_v25 = vld [vmem:[%s11926_s3 + $0x48] sm:$0xff] }
 0x77b   : > { %8557 = vmatmul.mubr.msk.bf16.gmra.mrb[40].mxu1 %vm2544_vm0, %v9728_v26  ;;  %v3169_v26 = vld [vmem:[%s11925_s28 + $0x60] sm:$0xff] }
 0x77c   : > { %3600 = vmatprep.mubr.bf16.mxu1 %v10172_v20 }
 0x836   : > { %v8566_v34 = vpop.f32.mrb[8].mxu0 }
 0x837   : > { %v3501_v35 = vadd.f32 %v8566_v34, %v3435_v33  ;;  %v3492_v36 = vpop.f32.mrb[9].mxu0  ;;  %v3767_v33 = vld [vmem:[%s11926_s3 + $0x68] sm:$0xff]  ;;  %v4996_v34 = vld [vmem:[%s11927_s15] sm:$0xff] }
 0x838   : > { %v3493_v38 = vadd.f32 %v3492_v36, %v3425_v31  ;;  %v8567_v39 = vpop.f32.mrb[10].mxu0  ;;  %v3170_v31 = vld [vmem:[%s11925_s28 + $0x68] sm:$0xff]  ;;  %v4998_v36 = vld [vmem:[%s11927_s15 + $0x10] sm:$0xff] }
 0x839   : > { %v3504_v40 = vadd.f32 %v8567_v39, %v3440_v37  ;;  %v3495_v41 = vpop.f32.mrb[11].mxu0  ;;  %v3509_v43 = vmax.f32 %v3501_v35, 0.0  ;;  %v3172_v35 = vld [vmem:[%s11925_s28 + $0x78] sm:$0xff]  ;;  %v4997_v39 = vld [vmem:[%s11927_s15 + $0x8] sm:$0xff] }
 0x83a   : > { %v3496_v42 = vadd.f32 %v3495_v41, %v3430_v32  ;;  %v3507_v45 = vmax.f32 %v3493_v38, 0.0  ;;  %v3768_v32 = vld [vmem:[%s11926_s3 + $0x70] sm:$0xff]  ;;  %v3769_v37 = vld [vmem:[%s11926_s3 + $0x78] sm:$0xff]  ;;  %v5000_v38 = vld [vmem:[%s11927_s15 + $0x20] sm:$0xff] }
 0x83b   : > { %v3510_v44 = vmax.f32 %v3504_v40, 0.0  ;;  %v5002_v40 = vld [vmem:[%s11927_s15 + $0x30] sm:$0xff]  ;;  %v4999_v41 = vld [vmem:[%s11927_s15 + $0x18] sm:$0xff] }
 0x83c   : > { %v3508_v46 = vmax.f32 %v3496_v42, 0.0  ;;  %v5004_v42 = vld [vmem:[%s11927_s15 + $0x40] sm:$0xff] }
 0x83d   : > { %v3512_v47 = vpack.c.bf16 %v3510_v44, %v3509_v43  ;;  %v5001_v43 = vld [vmem:[%s11927_s15 + $0x28] sm:$0xff]  ;;  %v5006_v44 = vld [vmem:[%s11927_s15 + $0x50] sm:$0xff] }
 0x83e   : > { %v3511_v48 = vpack.c.bf16 %v3508_v46, %v3507_v45  ;;  %v5003_v45 = vld [vmem:[%s11927_s15 + $0x38] sm:$0xff]  ;;  %v5008_v46 = vld [vmem:[%s11927_s15 + $0x60] sm:$0xff] }
 0x840   : > { %7992 = vmatmul.mubr.msk.bf16.vlgmr.msra.gmra.mrb[44].mxu1 %vm3561_vm4, %v3511_v48  ;;  %8568 = vmatprep.subr.bf16.mxu0 %v3511_v48 }
 0x841   : > { %8569 = vmatpush3.bf16.msra.mxu0 %v3511_v48  ;;  %3610 = vmatprep.mubr.bf16.mxu1 %v10172_v20  ;;  %v3647_v20 = vld [vmem:[%s11924_s2] sm:$0xff]  ;;  %v5010_v48 = vld [vmem:[%s11927_s15 + $0x70] sm:$0xff]  ;;  %s11961_s2 = sld [smem:[#allocation34_spill]] }
 0x842   : > { %8570 = vmatprep.subr.bf16.mxu0 %v3512_v47 }
 0x845   : > { %8571 = vmatpush3.bf16.msra.mxu0 %v3512_v47 }
 0x848   : > { %7993 = vmatmul.mubr.msk.bf16.gmra.mrb[48].mxu1 %vm3561_vm4, %v3512_v47  ;;  %v5005_v47 = vld [vmem:[%s11927_s15 + $0x48] sm:$0xff] }
 0x913   : > { %v3602_v49 = vpop.f32.mrb[44].mxu1 }
 0x914   : > { %v3604_v50 = vpop.f32.mrb[45].mxu1 }
 0x915   : > { %v3606_v51 = vpop.f32.mrb[46].mxu1 }
 0x916   : > { %v9299_v58 = vpack.i.bf16 %v3606_v51, %v3602_v49  ;;  %v3641_v52 = vpack.c.bf16 %v3606_v51, %v3602_v49  ;;  %v3608_v2 = vpop.f32.mrb[47].mxu1  ;;  %v5007_v49 = vld [vmem:[%s11927_s15 + $0x58] sm:$0xff] }
 0x917   : > { %v10817_v53 = vpack.c.bf16 %v3608_v2, %v3604_v50  ;;  %v5009_v50 = vld [vmem:[%s11927_s15 + $0x68] sm:$0xff]  ;;  %v5011_v51 = vld [vmem:[%s11927_s15 + $0x78] sm:$0xff] }
 0x918   : > { %9300 = vrot.lane.b32.xlu1 %v9299_v58, %s11878_s18  ;;  %8572 = vmatprep.subr.bf16.mxu0 %v3641_v52 }
 0x919   : > { %8573 = vmatpush3.bf16.msra.mxu0 %v3641_v52 }
 0x91b   : > { %v3612_v54 = vpop.f32.mrb[48].mxu1 }
 0x91c   : > { %3653 = vperm.xlu1 %9298, %v3647_v20   ;;  %v3614_v55 = vpop.f32.mrb[49].mxu1 }
 0x91d   : > { %v3616_v56 = vpop.f32.mrb[50].mxu1 }
 0x91e   : > { %v9304_v59 = vpack.i.bf16 %v3616_v56, %v3612_v54  ;;  %v3642_v60 = vpack.c.bf16 %v3616_v56, %v3612_v54  ;;  %v3618_v61 = vpop.f32.mrb[51].mxu1 }
 0x91f   : > { %v10822_v62 = vpack.c.bf16 %v3618_v61, %v3614_v55 }
 0x920   : > { %3663 = vperm.xlu1 %9298, %v3649_v57   ;;  %9305 = vrot.lane.b32.xlu0 %v9304_v59, %s11878_s18  ;;  %v9736_v59 = vld [vmem:[#allocation10 + $0x8] sm:$0xff]   ;;  %s11959_s18 = sld [smem:[#allocation33_spill]] }
 0x921   : > { %8574 = vmatprep.subr.bf16.mxu0 %v3642_v60 }
 0x922   : > { %8575 = vmatpush3.bf16.msra.mxu0 %v3642_v60  ;;  %v9737_v60 = vld [vmem:[%s11928_s22] sm:$0xff]  }
 0x923   : > { %8592 = vmatprep.mubr.msk.bf16.mxu1 %vm2544_vm0, %v9737_v60 }
 0x924   : > { %3175 = vperm.xlu1 %9298, %v3157_v1   ;;  %3658 = vperm.xlu0 %9297, %v3648_v3  }
 0x928   : > { %3772 = vperm.xlu1 %9298, %v3754_v4   ;;  %3668 = vperm.xlu0 %9297, %v3650_v5  }
 0x92c   : > { %3185 = vperm.xlu1 %9298, %v3159_v6   ;;  %3180 = vperm.xlu0 %9297, %v3158_v7  }
 0x930   : > { %3782 = vperm.xlu1 %9298, %v3756_v8   ;;  %3777 = vperm.xlu0 %9297, %v3755_v9  }
 0x934   : > { %3195 = vperm.xlu1 %9298, %v3161_v10   ;;  %3190 = vperm.xlu0 %9297, %v3160_v11  }
 0x938   : > { %3792 = vperm.xlu1 %9298, %v3758_v12   ;;  %3787 = vperm.xlu0 %9297, %v3757_v13  }
 0x93c   : > { %3205 = vperm.xlu1 %9298, %v3163_v14   ;;  %3200 = vperm.xlu0 %9297, %v3162_v15  }
 0x940   : > { %3802 = vperm.xlu1 %9298, %v3760_v17   ;;  %3797 = vperm.xlu0 %9297, %v3759_v16   ;;  %v9738_v17 = vld [vmem:[%s11928_s22 + $0x8] sm:$0xff]   ;;  %v9739_v16 = vld [vmem:[%s11928_s22 + $0x10] sm:$0xff]  }
 0x944   : > { %3215 = vperm.xlu1 %9298, %v3165_v18   ;;  %3210 = vperm.xlu0 %9297, %v3164_v19   ;;  %v9740_v18 = vld [vmem:[%s11928_s22 + $0x18] sm:$0xff]   ;;  %v9741_v19 = vld [vmem:[%s11928_s22 + $0x20] sm:$0xff]  }
 0x948   : > { %3812 = vperm.xlu1 %9298, %v3762_v0   ;;  %3807 = vperm.xlu0 %9297, %v3761_v21   ;;  %v9742_v0 = vld [vmem:[%s11928_s22 + $0x28] sm:$0xff]   ;;  %v9743_v21 = vld [vmem:[%s11928_s22 + $0x30] sm:$0xff]  }
 0x94c   : > { %3225 = vperm.xlu1 %9298, %v3167_v22   ;;  %3220 = vperm.xlu0 %9297, %v3166_v23   ;;  %v9744_v22 = vld [vmem:[%s11928_s22 + $0x38] sm:$0xff]  }
 0x94d   : > { %v9745_v23 = vld [vmem:[#allocation13] sm:$0xff]  }
 0x950   : > { %3822 = vperm.xlu1 %9298, %v3764_v24   ;;  %3817 = vperm.xlu0 %9297, %v3763_v25  }
 0x954   : > { %3235 = vperm.xlu1 %9298, %v3169_v26   ;;  %3230 = vperm.xlu0 %9297, %v3168_v27  }
 0x958   : > { %3832 = vperm.xlu1 %9298, %v3766_v28   ;;  %3827 = vperm.xlu0 %9297, %v3765_v29  }
 0x95c   : > { %3245 = vperm.xlu1 %9298, %v3171_v30   ;;  %3240 = vperm.xlu0 %9297, %v3170_v31  }
 0x960   : > { %3842 = vperm.xlu1 %9298, %v3768_v32   ;;  %3837 = vperm.xlu0 %9297, %v3767_v33  }
 0x964   : > { %5014 = vperm.xlu1 %9298, %v4996_v34   ;;  %3250 = vperm.xlu0 %9297, %v3172_v35  }
 0x968   : > { %5024 = vperm.xlu1 %9298, %v4998_v36   ;;  %3847 = vperm.xlu0 %9297, %v3769_v37  }
 0x96c   : > { %5034 = vperm.xlu1 %9298, %v5000_v38   ;;  %5019 = vperm.xlu0 %9297, %v4997_v39  }
 0x970   : > { %5044 = vperm.xlu1 %9298, %v5002_v40   ;;  %5029 = vperm.xlu0 %9297, %v4999_v41  }
 0x974   : > { %5054 = vperm.xlu1 %9298, %v5004_v42   ;;  %5039 = vperm.xlu0 %9297, %v5001_v43  }
 0x978   : > { %5064 = vperm.xlu1 %9298, %v5006_v44   ;;  %5049 = vperm.xlu0 %9297, %v5003_v45  }
 0x97c   : > { %5074 = vperm.xlu1 %9298, %v5008_v46   ;;  %5059 = vperm.xlu0 %9297, %v5005_v47  }
 0x980   : > { %5084 = vperm.xlu1 %9298, %v5010_v48   ;;  %5069 = vperm.xlu0 %9297, %v5007_v49  }
 0x984   : > { %5079 = vperm.xlu0 %9297, %v5009_v50  }
 0x988   : > { %5089 = vperm.xlu0 %9297, %v5011_v51  }
 0x98a   : > { %v9301_v58 = vpop.permute.xlu1 %9300 }
 0x98b   : > { %v9303_v52 = vunpack.i.h.bf16 %v9301_v58  ;;  %v9302_v2 = vunpack.i.l.bf16 %v9301_v58 }
 0x98d   : > { %v3643_v20 = vpack.c.bf16 %v9303_v52, %v9302_v2 }
 0x98f   : > { %8576 = vmatprep.subr.bf16.mxu0 %v3643_v20 }
 0x990   : > { %8577 = vmatpush3.bf16.msra.mxu0 %v3643_v20 }
 0x992   : > { %v9306_v54 = vpop.permute.xlu0 %9305 }
 0x993   : > { %v9308_v55 = vunpack.i.h.bf16 %v9306_v54  ;;  %v9307_v56 = vunpack.i.l.bf16 %v9306_v54 }
 0x995   : > { %v3644_v57 = vpack.c.bf16 %v9308_v55, %v9307_v56 }
 0x997   : > { %8578 = vmatprep.subr.bf16.mxu0 %v3644_v57 }
 0x998   : > { %8579 = vmatpush3.bf16.msra.mxu0 %v3644_v57 }
 0x999   : > { %8580 = vmatprep.subr.bf16.mxu0 %v10817_v53 }
 0x99b   : > { %v3654_v61 = vpop.permute.xlu1 %3653 }
 0x99c   : > { %8581 = vmatpush3.bf16.msra.mxu0 %v10817_v53 }
 0x99d   : > { %8582 = vmatprep.subr.bf16.mxu0 %v10822_v62 }
 0x99f   : > { %v3664_v1 = vpop.permute.xlu1 %3663 }
 0x9a0   : > { %8583 = vmatpush3.bf16.msra.mxu0 %v10822_v62 }
 0x9a3   : > { %8585 = vmatmul.mubr.bf16.vlgmr.msra.gmra.mrb[12].mxu0 %v9736_v59  ;;  %v3659_v63 = vpop.permute.xlu0 %3658  ;;  %v3176_v24 = vpop.permute.xlu1 %3175 }
 0x9a4   : > { %8624 = vmatprep.mubr.bf16.mxu0 %v9745_v23 }
 0x9a7   : > { %v3669_v6 = vpop.permute.xlu0 %3668  ;;  %v3773_v26 = vpop.permute.xlu1 %3772 }
 0x9a8   : > { %v8910_v49 = vadd.f32 %v3773_v26, %v3176_v24 }
 0x9ab   : > { %v3181_v25 = vpop.permute.xlu0 %3180  ;;  %v3186_v28 = vpop.permute.xlu1 %3185 }
 0x9af   : > { %v3778_v27 = vpop.permute.xlu0 %3777  ;;  %v3783_v30 = vpop.permute.xlu1 %3782 }
 0x9b0   : > { %v8908_v48 = vadd.f32 %v3783_v30, %v3186_v28  ;;  %v8914_v2 = vadd.f32 %v3778_v27, %v3181_v25 }
 0x9b3   : > { %v3191_v29 = vpop.permute.xlu0 %3190  ;;  %v3196_v32 = vpop.permute.xlu1 %3195 }
 0x9b7   : > { %v3788_v31 = vpop.permute.xlu0 %3787  ;;  %v3793_v34 = vpop.permute.xlu1 %3792 }
 0x9b8   : > { %v8912_v51 = vadd.f32 %v3788_v31, %v3191_v29 }
 0x9bb   : > { %v3201_v33 = vpop.permute.xlu0 %3200  ;;  %v3206_v36 = vpop.permute.xlu1 %3205 }
 0x9bf   : > { %v3798_v35 = vpop.permute.xlu0 %3797  ;;  %v3803_v38 = vpop.permute.xlu1 %3802 }
 0x9c3   : > { %v3211_v37 = vpop.permute.xlu0 %3210  ;;  %v3216_v40 = vpop.permute.xlu1 %3215 }
 0x9c7   : > { %v3808_v39 = vpop.permute.xlu0 %3807  ;;  %v3813_v42 = vpop.permute.xlu1 %3812 }
 0x9c8   : > { %v8926_v25 = vadd.f32 %v3813_v42, %v3216_v40 }
 0x9cb   : > { %v10895_v41 = vpop.permute.xlu0 %3220  ;;  %v3226_v44 = vpop.permute.xlu1 %3225 }
 0x9cf   : > { %v3818_v43 = vpop.permute.xlu0 %3817  ;;  %v3823_v46 = vpop.permute.xlu1 %3822 }
 0x9d0   : > { %v8924_v23 = vadd.f32 %v3823_v46, %v3226_v44 }
 0x9d3   : > { %v3231_v45 = vpop.permute.xlu0 %3230  ;;  %v10897_v20 = vpop.permute.xlu1 %3235 }
 0x9d7   : > { %v3828_v47 = vpop.permute.xlu0 %3827 }
 0x9d8   : > { %v8928_v29 = vadd.f32 %v3828_v47, %v3231_v45 }
 0x9db   : > { %v10899_v59 = vpop.permute.xlu0 %3240 }
 0xa76   : > { %v8586_v3 = vpop.f32.mrb[12].mxu0 }
 0xa77   : > { %v3726_v4 = vadd.f32 %v8586_v3, %v3664_v1  ;;  %v3717_v5 = vpop.f32.mrb[13].mxu0 }
 0xa78   : > { %v3718_v7 = vadd.f32 %v3717_v5, %v3654_v61  ;;  %v8587_v53 = vpop.f32.mrb[14].mxu0 }
 0xa79   : > { %v3729_v8 = vadd.f32 %v8587_v53, %v3669_v6  ;;  %v3720_v9 = vpop.f32.mrb[15].mxu0  ;;  %v3734_v62 = vmax.f32 %v3726_v4, 0.0  ;;  %v8916_v4 = vadd.f32 %v3803_v38, %v3206_v36  ;;  %v8918_v6 = vadd.f32 %v3793_v34, %v3196_v32 }
 0xa7a   : > { %v3721_v10 = vadd.f32 %v3720_v9, %v3659_v63  ;;  %v3732_v12 = vmax.f32 %v3718_v7, 0.0  ;;  %v3833_v7 = vpop.permute.xlu1 %3832  ;;  %v8920_v9 = vadd.f32 %v3808_v39, %v3211_v37  ;;  %v8930_v32 = vadd.f32 %v3818_v43, %v10895_v41 }
 0xa7b   : > { %v3735_v11 = vmax.f32 %v3729_v8, 0.0  ;;  %v8934_v46 = vadd.f32 %v3833_v7, %v10897_v20  ;;  %v9750_v7 = vld [vmem:[#allocation13 + $0x28] sm:$0xff]  }
 0xa7c   : > { %v3733_v13 = vmax.f32 %v3721_v10, 0.0 }
 0xa7d   : > { %v3753_v14 = vpack.c.bf16 %v3735_v11, %v3734_v62  ;;  %v8922_v11 = vadd.f32 %v3798_v35, %v3201_v33 }
 0xa7e   : > { %v3752_v15 = vpack.c.bf16 %v3733_v13, %v3732_v12  ;;  %v3838_v12 = vpop.permute.xlu0 %3837 }
 0xa80   : > { %8588 = vmatprep.subr.bf16.mxu1 %v3752_v15 }
 0xa81   : > { %8589 = vmatpush3.bf16.msra.mxu1 %v3752_v15 }
 0xa82   : > { %8590 = vmatprep.subr.bf16.mxu1 %v3753_v14  ;;  %v3251_v26 = vpop.permute.xlu0 %3250 }
 0xa85   : > { %8591 = vmatpush3.bf16.msra.mxu1 %v3753_v14 }
 0xa86   : > { %v3848_v41 = vpop.permute.xlu0 %3847 }
 0xa88   : > { %8593 = vmatmul.mubr.msk.bf16.vlgmr.msra.gmra.mrb[28].mxu1 %vm2544_vm0, %v9738_v17 }
 0xa89   : > { %8596 = vmatprep.mubr.msk.bf16.mxu1 %vm2544_vm0, %v9739_v16 }
 0xa90   : > { %8597 = vmatmul.mubr.msk.bf16.gmra.mrb[32].mxu1 %vm2544_vm0, %v9740_v18 }
 0xa91   : > { %8600 = vmatprep.mubr.msk.bf16.mxu1 %vm2544_vm0, %v9741_v19 }
 0xa98   : > { %8601 = vmatmul.mubr.msk.bf16.gmra.mrb[36].mxu1 %vm2544_vm0, %v9742_v0  ;;  %v3246_v0 = vpop.permute.xlu1 %3245 }
 0xa99   : > { %8604 = vmatprep.mubr.msk.bf16.mxu1 %vm2544_vm0, %v9743_v21 }
 0xa9c   : > { %v3843_v37 = vpop.permute.xlu1 %3842 }
 0xa9d   : > { %v8932_v44 = vadd.f32 %v3843_v37, %v3246_v0  ;;  %v9766_v0 = vld [vmem:[%s11929_s26 + $0x18] sm:$0xff]  }
 0xaa0   : > { %8605 = vmatmul.mubr.msk.bf16.gmra.mrb[40].mxu1 %vm2544_vm0, %v9744_v22 }
 0xb5b   : > { %v8594_v50 = vpop.f32.mrb[28].mxu1 }
 0xb5c   : > { %v8909_v58 = vadd.f32 %v8908_v48, %v8594_v50  ;;  %v3948_v52 = vpop.f32.mrb[29].mxu1 }
 0xb5d   : > { %v8911_v54 = vadd.f32 %v8910_v49, %v3948_v52  ;;  %v8595_v55 = vpop.f32.mrb[30].mxu1  ;;  %v8936_v49 = vadd.f32 %v3848_v41, %v3251_v26  ;;  %v9772_v26 = vld [vmem:[#allocation12 + $0x8] sm:$0xff]  }
 0xb5e   : > { %v8913_v56 = vadd.f32 %v8912_v51, %v8595_v55  ;;  %v3951_v57 = vpop.f32.mrb[31].mxu1  ;;  %v4029_v61 = vmax.f32 %v8909_v58, 0.0  ;;  %v8938_v58 = vadd.f32 %v3838_v12, %v10899_v59  ;;  %v9746_v59 = vld [vmem:[#allocation13 + $0x8] sm:$0xff]  }
 0xb5f   : > { %v8915_v60 = vadd.f32 %v8914_v2, %v3951_v57  ;;  %v4027_v1 = vmax.f32 %v8911_v54, 0.0  ;;  %v9758_v12 = vld [vmem:[#allocation13 + $0x68] sm:$0xff]  }
 0xb60   : > { %v4030_v63 = vmax.f32 %v8913_v56, 0.0 }
 0xb61   : > { %v4028_v3 = vmax.f32 %v8915_v60, 0.0 }
 0xb62   : > { %v10901_v5 = vpack.c.bf16 %v4030_v63, %v4029_v61 }
 0xb63   : > { %v10903_v53 = vpack.c.bf16 %v4028_v3, %v4027_v1  ;;  %v8598_v8 = vpop.f32.mrb[32].mxu1  ;;  %v9747_v3 = vld [vmem:[#allocation13 + $0x10] sm:$0xff]  }
 0xb64   : > { %v8917_v10 = vadd.f32 %v8916_v4, %v8598_v8  ;;  %v3964_v62 = vpop.f32.mrb[33].mxu1  ;;  %v9748_v4 = vld [vmem:[#allocation13 + $0x18] sm:$0xff]   ;;  %v9751_v8 = vld [vmem:[#allocation13 + $0x30] sm:$0xff]  }
 0xb65   : > { %v8919_v13 = vadd.f32 %v8918_v6, %v3964_v62  ;;  %v8599_v14 = vpop.f32.mrb[34].mxu1  ;;  %8608 = vmatprep.subr.bf16.mxu0 %v10903_v53  ;;  %8884 = vmatprep.subr.bf16.mxu1 %v10903_v53  ;;  %v9749_v6 = vld [vmem:[#allocation13 + $0x20] sm:$0xff]   ;;  %v9756_v62 = vld [vmem:[#allocation13 + $0x58] sm:$0xff]  }
 0xb66   : > { %v8921_v15 = vadd.f32 %v8920_v9, %v8599_v14  ;;  %v3967_v17 = vpop.f32.mrb[35].mxu1  ;;  %8609 = vmatpush3.bf16.msra.mxu0 %v10903_v53  ;;  %8892 = vmatpush3.bf16.msra.mxu1 %v10903_v53  ;;  %v4033_v18 = vmax.f32 %v8917_v10, 0.0  ;;  %v9754_v9 = vld [vmem:[#allocation13 + $0x48] sm:$0xff]   ;;  %v9755_v10 = vld [vmem:[#allocation13 + $0x50] sm:$0xff]   ;;  %v9760_v14 = vld [vmem:[#allocation13 + $0x78] sm:$0xff]  }
 0xb67   : > { %v8923_v16 = vadd.f32 %v8922_v11, %v3967_v17  ;;  %8610 = vmatprep.subr.bf16.mxu0 %v10901_v5  ;;  %8885 = vmatprep.subr.bf16.mxu1 %v10901_v5  ;;  %v4031_v21 = vmax.f32 %v8919_v13, 0.0  ;;  %v9757_v11 = vld [vmem:[#allocation13 + $0x60] sm:$0xff]   ;;  %v9759_v13 = vld [vmem:[#allocation13 + $0x70] sm:$0xff]   ;;  %v9762_v17 = vld [vmem:[#allocation13 + $0x88] sm:$0xff]  }
 0xb68   : > { %v4034_v19 = vmax.f32 %v8921_v15, 0.0  ;;  %v9761_v15 = vld [vmem:[#allocation13 + $0x80] sm:$0xff]  }
 0xb69   : > { %v4032_v22 = vmax.f32 %v8923_v16, 0.0  ;;  %v9763_v16 = vld [vmem:[%s11929_s26] sm:$0xff]  }
 0xb6a   : > { %v10911_v24 = vpack.c.bf16 %v4034_v19, %v4033_v18  ;;  %8611 = vmatpush3.bf16.msra.mxu0 %v10901_v5  ;;  %8893 = vmatpush3.bf16.msra.mxu1 %v10901_v5  ;;  %v9764_v18 = vld [vmem:[%s11929_s26 + $0x8] sm:$0xff]   ;;  %v9765_v19 = vld [vmem:[%s11929_s26 + $0x10] sm:$0xff]  }
 0xb6b   : > { %v10915_v27 = vpack.c.bf16 %v4032_v22, %v4031_v21  ;;  %v8602_v28 = vpop.f32.mrb[36].mxu1  ;;  %v9767_v21 = vld [vmem:[%s11929_s26 + $0x20] sm:$0xff]   ;;  %v9768_v22 = vld [vmem:[%s11929_s26 + $0x28] sm:$0xff]  }
 0xb6c   : > { %v8925_v30 = vadd.f32 %v8924_v23, %v8602_v28  ;;  %v3980_v31 = vpop.f32.mrb[37].mxu1  ;;  %v9769_v23 = vld [vmem:[%s11929_s26 + $0x30] sm:$0xff]  }
 0xb6d   : > { %v8927_v33 = vadd.f32 %v8926_v25, %v3980_v31  ;;  %v8603_v34 = vpop.f32.mrb[38].mxu1  ;;  %8612 = vmatprep.subr.bf16.mxu0 %v10915_v27  ;;  %8886 = vmatprep.subr.bf16.mxu1 %v10915_v27  ;;  %v9771_v25 = vld [vmem:[#allocation12] sm:$0xff]  }
 0xb6e   : > { %v8929_v35 = vadd.f32 %v8928_v29, %v8603_v34  ;;  %v3983_v36 = vpop.f32.mrb[39].mxu1  ;;  %8613 = vmatpush3.bf16.msra.mxu0 %v10915_v27  ;;  %8894 = vmatpush3.bf16.msra.mxu1 %v10915_v27  ;;  %v4037_v39 = vmax.f32 %v8925_v30, 0.0 }
 0xb6f   : > { %v8931_v38 = vadd.f32 %v8930_v32, %v3983_v36  ;;  %8614 = vmatprep.subr.bf16.mxu0 %v10911_v24  ;;  %8887 = vmatprep.subr.bf16.mxu1 %v10911_v24  ;;  %v4035_v42 = vmax.f32 %v8927_v33, 0.0 }
 0xb70   : > { %v4038_v40 = vmax.f32 %v8929_v35, 0.0 }
 0xb71   : > { %v4036_v43 = vmax.f32 %v8931_v38, 0.0 }
 0xb72   : > { %v4112_v45 = vpack.c.bf16 %v4038_v40, %v4037_v39  ;;  %8615 = vmatpush3.bf16.msra.mxu0 %v10911_v24  ;;  %8895 = vmatpush3.bf16.msra.mxu1 %v10911_v24 }
 0xb73   : > { %v4111_v47 = vpack.c.bf16 %v4036_v43, %v4035_v42  ;;  %v8606_v48 = vpop.f32.mrb[40].mxu1 }
 0xb74   : > { %v8933_v50 = vadd.f32 %v8932_v44, %v8606_v48  ;;  %v3996_v51 = vpop.f32.mrb[41].mxu1 }
 0xb75   : > { %v8935_v52 = vadd.f32 %v8934_v46, %v3996_v51  ;;  %v8607_v2 = vpop.f32.mrb[42].mxu1  ;;  %8616 = vmatprep.subr.bf16.mxu0 %v4111_v47  ;;  %8888 = vmatprep.subr.bf16.mxu1 %v4111_v47 }
 0xb76   : > { %v8937_v54 = vadd.f32 %v8936_v49, %v8607_v2  ;;  %v3999_v55 = vpop.f32.mrb[43].mxu1  ;;  %8617 = vmatpush3.bf16.msra.mxu0 %v4111_v47  ;;  %8896 = vmatpush3.bf16.msra.mxu1 %v4111_v47  ;;  %v4041_v57 = vmax.f32 %v8933_v50, 0.0 }
 0xb77   : > { %v8939_v56 = vadd.f32 %v8938_v58, %v3999_v55  ;;  %8618 = vmatprep.subr.bf16.mxu0 %v4112_v45  ;;  %8889 = vmatprep.subr.bf16.mxu1 %v4112_v45  ;;  %v4039_v60 = vmax.f32 %v8935_v52, 0.0  ;;  %v5020_v55 = vpop.permute.xlu0 %5019 }
 0xb78   : > { %v4042_v20 = vmax.f32 %v8937_v54, 0.0  ;;  %v5015_v54 = vpop.permute.xlu1 %5014 }
 0xb79   : > { %v4040_v61 = vmax.f32 %v8939_v56, 0.0 }
 0xb7a   : > { %v4114_v63 = vpack.c.bf16 %v4042_v20, %v4041_v57  ;;  %8619 = vmatpush3.bf16.msra.mxu0 %v4112_v45  ;;  %8897 = vmatpush3.bf16.msra.mxu1 %v4112_v45 }
 0xb7b   : > { %v4113_v1 = vpack.c.bf16 %v4040_v61, %v4039_v60 }
 0xb7c   : > { %v5025_v61 = vpop.permute.xlu1 %5024 }
 0xb7d   : > { %8620 = vmatprep.subr.bf16.mxu0 %v4113_v1  ;;  %8890 = vmatprep.subr.bf16.mxu1 %v4113_v1 }
 0xb7e   : > { %8621 = vmatpush3.bf16.msra.mxu0 %v4113_v1  ;;  %8898 = vmatpush3.bf16.msra.mxu1 %v4113_v1 }
 0xb7f   : > { %8622 = vmatprep.subr.bf16.mxu0 %v4114_v63  ;;  %8891 = vmatprep.subr.bf16.mxu1 %v4114_v63 }
 0xb82   : > { %8623 = vmatpush3.bf16.msra.mxu0 %v4114_v63  ;;  %8899 = vmatpush3.bf16.msra.mxu1 %v4114_v63 }
 0xb83   : > { %8688 = vmatprep.subr.bf16.mxu0 %v10903_v53 }
 0xb85   : > { %8625 = vmatmul.mubr.bf16.vlgmr.msra.gmra.mrb[16].mxu0 %v9746_v59 }
 0xb86   : > { %8689 = vmatpush3.bf16.msra.mxu0 %v10903_v53  ;;  %8628 = vmatprep.mubr.bf16.mxu0 %v9747_v3  ;;  %v9752_v53 = vld [vmem:[#allocation13 + $0x38] sm:$0xff]   ;;  %v5035_v3 = vpop.permute.xlu1 %5034 }
 0xb87   : > { %8690 = vmatprep.subr.bf16.mxu0 %v10901_v5 }
 0xb8a   : > { %8691 = vmatpush3.bf16.msra.mxu0 %v10901_v5  ;;  %v9753_v5 = vld [vmem:[#allocation13 + $0x40] sm:$0xff]  }
 0xb8b   : > { %8692 = vmatprep.subr.bf16.mxu0 %v10915_v27 }
 0xb8d   : > { %8629 = vmatmul.mubr.bf16.gmra.mrb[20].mxu0 %v9748_v4 }
 0xb8e   : > { %8693 = vmatpush3.bf16.msra.mxu0 %v10915_v27  ;;  %8632 = vmatprep.mubr.bf16.mxu0 %v9749_v6 }
 0xb8f   : > { %8694 = vmatprep.subr.bf16.mxu0 %v10911_v24 }
 0xb92   : > { %8695 = vmatpush3.bf16.msra.mxu0 %v10911_v24  ;;  %v9770_v24 = vld [vmem:[%s11929_s26 + $0x38] sm:$0xff]  }
 0xb93   : > { %8696 = vmatprep.subr.bf16.mxu0 %v4111_v47 }
 0xb95   : > { %8633 = vmatmul.mubr.bf16.gmra.mrb[24].mxu0 %v9750_v7 }
 0xb96   : > { %8697 = vmatpush3.bf16.msra.mxu0 %v4111_v47  ;;  %8636 = vmatprep.mubr.bf16.mxu0 %v9751_v8  ;;  %v5045_v8 = vpop.permute.xlu1 %5044 }
 0xb97   : > { %8698 = vmatprep.subr.bf16.mxu0 %v4112_v45 }
 0xb9a   : > { %8699 = vmatpush3.bf16.msra.mxu0 %v4112_v45 }
 0xb9b   : > { %8700 = vmatprep.subr.bf16.mxu0 %v4113_v1 }
 0xb9d   : > { %8637 = vmatmul.mubr.bf16.gmra.mrb[28].mxu0 %v9752_v53 }
 0xb9e   : > { %8701 = vmatpush3.bf16.msra.mxu0 %v4113_v1  ;;  %8640 = vmatprep.mubr.bf16.mxu0 %v9753_v5 }
 0xb9f   : > { %8702 = vmatprep.subr.bf16.mxu0 %v4114_v63 }
 0xba2   : > { %8703 = vmatpush3.bf16.msra.mxu0 %v4114_v63  ;;  %v5030_v63 = vpop.permute.xlu0 %5029 }
 0xba3   : > { %8720 = vmatprep.subr.bf16.mxu0 %v9771_v25 }
 0xba5   : > { %8641 = vmatmul.mubr.bf16.gmra.mrb[32].mxu0 %v9754_v9 }
 0xba6   : > { %8644 = vmatprep.mubr.bf16.mxu0 %v9755_v10  ;;  %v5040_v7 = vpop.permute.xlu0 %5039 }
 0xbaa   : > { %v5050_v10 = vpop.permute.xlu0 %5049 }
 0xbad   : > { %8645 = vmatmul.mubr.bf16.gmra.mrb[36].mxu0 %v9756_v62 }
 0xbae   : > { %8648 = vmatprep.mubr.bf16.mxu0 %v9757_v11 }
 0xbb5   : > { %8649 = vmatmul.mubr.bf16.gmra.mrb[40].mxu0 %v9758_v12 }
 0xbb6   : > { %8652 = vmatprep.mubr.bf16.mxu0 %v9759_v13 }
 0xbbd   : > { %8653 = vmatmul.mubr.bf16.gmra.mrb[44].mxu0 %v9760_v14 }
 0xbbe   : > { %8656 = vmatprep.mubr.bf16.mxu0 %v9761_v15 }
 0xbc5   : > { %8657 = vmatmul.mubr.bf16.gmra.mrb[48].mxu0 %v9762_v17 }
 0xbc6   : > { %8704 = vmatprep.mubr.bf16.mxu0 %v9763_v16  ;;  %v5055_v16 = vpop.permute.xlu1 %5054 }
 0xbcd   : > { %8705 = vmatmul.mubr.bf16.vlgmr.msra.gmra.mrb[52].mxu0 %v9764_v18 }
 0xbce   : > { %8708 = vmatprep.mubr.bf16.mxu0 %v9765_v19  ;;  %8721 = vmatpush3.bf16.msra.mxu0 %v9771_v25 }
 0xbcf   : > { %8722 = vmatprep.subr.bf16.mxu0 %v9772_v26 }
 0xbd2   : > { %8723 = vmatpush3.bf16.msra.mxu0 %v9772_v26 }
 0xbd5   : > { %8709 = vmatmul.mubr.bf16.gmra.mrb[56].mxu0 %v9766_v0 }
 0xbd6   : > { %8712 = vmatprep.mubr.bf16.mxu0 %v9767_v21  ;;  %v5060_v21 = vpop.permute.xlu0 %5059 }
 0xbdd   : > { %8713 = vmatmul.mubr.bf16.gmra.mrb[60].mxu0 %v9768_v22 }
 0xbde   : > { %8716 = vmatprep.mubr.bf16.mxu0 %v9769_v23 }
 0xbe5   : > { %8717 = vmatmul.mubr.bf16.gmra.mrb[64].mxu0 %v9770_v24 }
 0xc58   : > { %v10944_v27 = vpop.f32.mrb[16].mxu0 }
 0xc59   : > { %v10946_v28 = vpop.f32.mrb[17].mxu0 }
 0xc5a   : > { %v10948_v29 = vpop.f32.mrb[18].mxu0 }
 0xc5b   : > { %v10950_v30 = vpop.f32.mrb[19].mxu0 }
 0xc60   : > { %v10952_v31 = vpop.f32.mrb[20].mxu0 }
 0xc61   : > { %v10954_v32 = vpop.f32.mrb[21].mxu0 }
 0xc62   : > { %v10956_v33 = vpop.f32.mrb[22].mxu0 }
 0xc63   : > { %v10958_v34 = vpop.f32.mrb[23].mxu0 }
 0xc64   : > { %11930 = vst [vmem:[#allocation37_spill] sm:$0xff] %v10958_v34 }
 0xc68   : > { %v10960_v35 = vpop.f32.mrb[24].mxu0 }
 0xc69   : > { %11931 = vst [vmem:[#allocation38_spill] sm:$0xff] %v10960_v35  ;;  %v10962_v36 = vpop.f32.mrb[25].mxu0 }
 0xc6a   : > { %11932 = vst [vmem:[#allocation39_spill] sm:$0xff] %v10962_v36  ;;  %v10964_v37 = vpop.f32.mrb[26].mxu0 }
 0xc6b   : > { %11933 = vst [vmem:[#allocation40_spill] sm:$0xff] %v10964_v37  ;;  %v10966_v38 = vpop.f32.mrb[27].mxu0 }
 0xc6c   : > { %11934 = vst [vmem:[#allocation41_spill] sm:$0xff] %v10966_v38 }
 0xc70   : > { %v10968_v39 = vpop.f32.mrb[28].mxu0 }
 0xc71   : > { %11935 = vst [vmem:[#allocation42_spill] sm:$0xff] %v10968_v39  ;;  %v10970_v40 = vpop.f32.mrb[29].mxu0 }
 0xc72   : > { %11936 = vst [vmem:[#allocation43_spill] sm:$0xff] %v10970_v40  ;;  %v10972_v41 = vpop.f32.mrb[30].mxu0 }
 0xc73   : > { %11937 = vst [vmem:[#allocation44_spill] sm:$0xff] %v10972_v41  ;;  %v10974_v42 = vpop.f32.mrb[31].mxu0 }
 0xc74   : > { %11938 = vst [vmem:[#allocation45_spill] sm:$0xff] %v10974_v42 }
 0xc78   : > { %v10976_v43 = vpop.f32.mrb[32].mxu0 }
 0xc79   : > { %11939 = vst [vmem:[#allocation46_spill] sm:$0xff] %v10976_v43  ;;  %v10978_v44 = vpop.f32.mrb[33].mxu0 }
 0xc7a   : > { %11940 = vst [vmem:[#allocation47_spill] sm:$0xff] %v10978_v44  ;;  %v10980_v45 = vpop.f32.mrb[34].mxu0 }
 0xc7b   : > { %11941 = vst [vmem:[#allocation48_spill] sm:$0xff] %v10980_v45  ;;  %v10982_v46 = vpop.f32.mrb[35].mxu0 }
 0xc7c   : > { %11942 = vst [vmem:[#allocation49_spill] sm:$0xff] %v10982_v46  ;;  %v4174_v46 = vld [vmem:[%s10335_s24 + $0x1d8] sm:$0xff] }
 0xc80   : > { %v10984_v47 = vpop.f32.mrb[36].mxu0 }
 0xc81   : > { %11943 = vst [vmem:[#allocation50_spill] sm:$0xff] %v10984_v47  ;;  %v10986_v48 = vpop.f32.mrb[37].mxu0 }
 0xc82   : > { %11944 = vst [vmem:[#allocation51_spill] sm:$0xff] %v10986_v48  ;;  %v10988_v49 = vpop.f32.mrb[38].mxu0 }
 0xc83   : > { %11945 = vst [vmem:[#allocation52_spill] sm:$0xff] %v10988_v49  ;;  %v10990_v50 = vpop.f32.mrb[39].mxu0 }
 0xc84   : > { %11946 = vst [vmem:[#allocation53_spill] sm:$0xff] %v10990_v50 }
 0xc88   : > { %v10992_v51 = vpop.f32.mrb[40].mxu0 }
 0xc89   : > { %11947 = vst [vmem:[#allocation54_spill] sm:$0xff] %v10992_v51  ;;  %v10994_v58 = vpop.f32.mrb[41].mxu0 }
 0xc8a   : > { %11948 = vst [vmem:[#allocation55_spill] sm:$0xff] %v10994_v58  ;;  %v10996_v52 = vpop.f32.mrb[42].mxu0 }
 0xc8b   : > { %11949 = vst [vmem:[#allocation56_spill] sm:$0xff] %v10996_v52  ;;  %v10998_v2 = vpop.f32.mrb[43].mxu0 }
 0xc8c   : > { %11950 = vst [vmem:[#allocation57_spill] sm:$0xff] %v10998_v2 }
 0xc90   : > { %v11000_v56 = vpop.f32.mrb[44].mxu0 }
 0xc91   : > { %11951 = vst [vmem:[#allocation58_spill] sm:$0xff] %v11000_v56  ;;  %v11002_v57 = vpop.f32.mrb[45].mxu0 }
 0xc92   : > { %11952 = vst [vmem:[#allocation59_spill] sm:$0xff] %v11002_v57  ;;  %v11004_v20 = vpop.f32.mrb[46].mxu0 }
 0xc93   : > { %11953 = vst [vmem:[#allocation60_spill] sm:$0xff] %v11004_v20  ;;  %v11006_v60 = vpop.f32.mrb[47].mxu0 }
 0xc94   : > { %11954 = vst [vmem:[#allocation61_spill] sm:$0xff] %v11006_v60 }
 0xc98   : > { %v11008_v1 = vpop.f32.mrb[48].mxu0 }
 0xc99   : > { %11955 = vst [vmem:[#allocation62_spill] sm:$0xff] %v11008_v1  ;;  %v11010_v59 = vpop.f32.mrb[49].mxu0  ;;  %v4170_v1 = vld [vmem:[%s10335_s24 + $0x1b8] sm:$0xff] }
 0xc9a   : > { %11956 = vst [vmem:[#allocation63_spill] sm:$0xff] %v11010_v59  ;;  %v11012_v4 = vpop.f32.mrb[50].mxu0 }
 0xc9b   : > { %11957 = vst [vmem:[#allocation64_spill] sm:$0xff] %v11012_v4  ;;  %v11014_v6 = vpop.f32.mrb[51].mxu0 }
 0xc9c   : > { %11958 = vst [vmem:[#allocation65_spill] sm:$0xff] %v11014_v6 }
 0xca0   : > { %v8706_v53 = vpop.f32.mrb[52].mxu0 }
 0xca1   : > { %v5183_v5 = vadd.f32 %v8706_v53, %v5025_v61  ;;  %v5174_v9 = vpop.f32.mrb[53].mxu0 }
 0xca2   : > { %v5175_v62 = vadd.f32 %v5174_v9, %v5015_v54  ;;  %v8707_v11 = vpop.f32.mrb[54].mxu0 }
 0xca3   : > { %v5186_v12 = vadd.f32 %v8707_v11, %v5030_v63  ;;  %v5177_v13 = vpop.f32.mrb[55].mxu0  ;;  %v5239_v15 = vmax.f32 %v5183_v5, 0.0  ;;  %v5065_v63 = vpop.permute.xlu1 %5064 }
 0xca4   : > { %v5178_v14 = vadd.f32 %v5177_v13, %v5020_v55  ;;  %v5237_v18 = vmax.f32 %v5175_v62, 0.0  ;;  %v5070_v62 = vpop.permute.xlu0 %5069 }
 0xca5   : > { %v5240_v17 = vmax.f32 %v5186_v12, 0.0 }
 0xca6   : > { %v5238_v19 = vmax.f32 %v5178_v14, 0.0 }
 0xca7   : > { %v11016_v0 = vpack.c.bf16 %v5240_v17, %v5239_v15  ;;  %v5075_v17 = vpop.permute.xlu1 %5074 }
 0xca8   : > { %v11018_v22 = vpack.c.bf16 %v5238_v19, %v5237_v18  ;;  %v8710_v23 = vpop.f32.mrb[56].mxu0 }
 0xca9   : > { %v5199_v24 = vadd.f32 %v8710_v23, %v5045_v8  ;;  %v5190_v25 = vpop.f32.mrb[57].mxu0  ;;  %v5080_v23 = vpop.permute.xlu0 %5079 }
 0xcaa   : > { %v5191_v26 = vadd.f32 %v5190_v25, %v5035_v3  ;;  %v8711_v61 = vpop.f32.mrb[58].mxu0  ;;  %8724 = vmatprep.mubr.msk.bf16.mxu0 %vm2544_vm0, %v11018_v22 }
 0xcab   : > { %v5202_v54 = vadd.f32 %v8711_v61, %v5050_v10  ;;  %v5193_v55 = vpop.f32.mrb[59].mxu0  ;;  %8725 = vmatmul.mubr.msk.bf16.vlgmr.msra.gmra.mrb[68].mxu0 %vm2544_vm0, %v11016_v0  ;;  %v5243_v5 = vmax.f32 %v5199_v24, 0.0 }
 0xcac   : > { %v5194_v53 = vadd.f32 %v5193_v55, %v5040_v7  ;;  %v5241_v11 = vmax.f32 %v5191_v26, 0.0 }
 0xcad   : > { %v5244_v9 = vmax.f32 %v5202_v54, 0.0 }
 0xcae   : > { %v5242_v12 = vmax.f32 %v5194_v53, 0.0 }
 0xcaf   : > { %v11024_v13 = vpack.c.bf16 %v5244_v9, %v5243_v5 }
 0xcb0   : > { %v11026_v8 = vpack.c.bf16 %v5242_v12, %v5241_v11  ;;  %v8714_v3 = vpop.f32.mrb[60].mxu0  ;;  %v5090_v11 = vpop.permute.xlu0 %5089 }
 0xcb1   : > { %v5215_v14 = vadd.f32 %v8714_v3, %v5065_v63  ;;  %v5206_v15 = vpop.f32.mrb[61].mxu0  ;;  %v5085_v63 = vpop.permute.xlu1 %5084 }
 0xcb2   : > { %v5207_v10 = vadd.f32 %v5206_v15, %v5055_v16  ;;  %v8715_v18 = vpop.f32.mrb[62].mxu0  ;;  %8728 = vmatprep.mubr.msk.bf16.mxu0 %vm2544_vm0, %v11026_v8 }
 0xcb3   : > { %v5218_v19 = vadd.f32 %v8715_v18, %v5070_v62  ;;  %v5209_v7 = vpop.f32.mrb[63].mxu0  ;;  %8729 = vmatmul.mubr.msk.bf16.gmra.mrb[72].mxu0 %vm2544_vm0, %v11024_v13  ;;  %v5247_v25 = vmax.f32 %v5215_v14, 0.0 }
 0xcb4   : > { %v5210_v24 = vadd.f32 %v5209_v7, %v5060_v21  ;;  %v5245_v61 = vmax.f32 %v5207_v10, 0.0 }
 0xcb5   : > { %v5248_v26 = vmax.f32 %v5218_v19, 0.0 }
 0xcb6   : > { %v5246_v54 = vmax.f32 %v5210_v24, 0.0 }
 0xcb7   : > { %v11032_v55 = vpack.c.bf16 %v5248_v26, %v5247_v25  ;;  %v9797_v25 = vld [vmem:[#allocation13 + $0x90] sm:$0xff]   ;;  %v9798_v26 = vld [vmem:[#allocation13 + $0x98] sm:$0xff]  }
 0xcb8   : > { %v11034_v53 = vpack.c.bf16 %v5246_v54, %v5245_v61  ;;  %v8718_v16 = vpop.f32.mrb[64].mxu0  ;;  %8660 = vmatprep.mubr.bf16.mxu1 %v9797_v25  ;;  %v9800_v61 = vld [vmem:[#allocation13 + $0xa8] sm:$0xff]   ;;  %v9801_v54 = vld [vmem:[#allocation13 + $0xb0] sm:$0xff]  }
 0xcb9   : > { %v5231_v5 = vadd.f32 %v8718_v16, %v5085_v63  ;;  %v5222_v9 = vpop.f32.mrb[65].mxu0  ;;  %8661 = vmatmul.mubr.bf16.vlgmr.msra.gmra.mrb[52].mxu1 %v9798_v26  ;;  %v9802_v63 = vld [vmem:[#allocation13 + $0xb8] sm:$0xff]   ;;  %v9803_v16 = vld [vmem:[#allocation13 + $0xc0] sm:$0xff]  }
 0xcba   : > { %v5223_v62 = vadd.f32 %v5222_v9, %v5075_v17  ;;  %v8719_v12 = vpop.f32.mrb[66].mxu0  ;;  %8732 = vmatprep.mubr.msk.bf16.mxu0 %vm2544_vm0, %v11034_v53  ;;  %v9775_v17 = vld [vmem:[%s11959_s18 + $0x4] ss:$16 sps:$4 sm:$0xff]  }
 0xcbb   : > { %v5234_v21 = vadd.f32 %v8719_v12, %v5090_v11  ;;  %v5225_v3 = vpop.f32.mrb[67].mxu0  ;;  %8733 = vmatmul.mubr.msk.bf16.gmra.mrb[76].mxu0 %vm2544_vm0, %v11032_v55  ;;  %v5251_v15 = vmax.f32 %v5231_v5, 0.0  ;;  %v9804_v5 = vld [vmem:[#allocation13 + $0xc8] sm:$0xff]  }
 0xcbc   : > { %v5226_v14 = vadd.f32 %v5225_v3, %v5080_v23  ;;  %v5249_v18 = vmax.f32 %v5223_v62, 0.0  ;;  %v9799_v23 = vld [vmem:[#allocation13 + $0xa0] sm:$0xff]  }
 0xcbd   : > { %v5252_v10 = vmax.f32 %v5234_v21, 0.0  ;;  %8664 = vmatprep.mubr.bf16.mxu1 %v9799_v23 }
 0xcbe   : > { %v5250_v19 = vmax.f32 %v5226_v14, 0.0  ;;  %v9805_v14 = vld [vmem:[#allocation13 + $0xd0] sm:$0xff]  }
 0xcbf   : > { %v11040_v7 = vpack.c.bf16 %v5252_v10, %v5251_v15 }
 0xcc0   : > { %v11042_v24 = vpack.c.bf16 %v5250_v19, %v5249_v18  ;;  %v9806_v18 = vld [vmem:[#allocation13 + $0xd8] sm:$0xff]  }
 0xcc1   : > { %8665 = vmatmul.mubr.bf16.gmra.mrb[56].mxu1 %v9800_v61 }
 0xcc2   : > { %8736 = vmatprep.mubr.msk.bf16.mxu0 %vm2544_vm0, %v11042_v24  ;;  %8668 = vmatprep.mubr.bf16.mxu1 %v9801_v54  ;;  %v9807_v54 = vld [vmem:[#allocation13 + $0xe0] sm:$0xff]  }
 0xcc3   : > { %8737 = vmatmul.mubr.msk.bf16.gmra.mrb[80].mxu0 %vm2544_vm0, %v11040_v7 }
 0xcc4   : > { %5854 = vmatprep.mubr.bf16.mxu0 %v9775_v17 }
 0xcc9   : > { %8669 = vmatmul.mubr.bf16.gmra.mrb[60].mxu1 %v9802_v63 }
 0xcca   : > { %8672 = vmatprep.mubr.bf16.mxu1 %v9803_v16 }
 0xcd1   : > { %8673 = vmatmul.mubr.bf16.gmra.mrb[64].mxu1 %v9804_v5  ;;  %v9808_v5 = vld [vmem:[#allocation13 + $0xe8] sm:$0xff]  }
 0xcd2   : > { %8676 = vmatprep.mubr.bf16.mxu1 %v9805_v14 }
 0xcd9   : > { %8677 = vmatmul.mubr.bf16.gmra.mrb[68].mxu1 %v9806_v18 }
 0xcda   : > { %8680 = vmatprep.mubr.bf16.mxu1 %v9807_v54  ;;  %v9776_v54 = vld [vmem:[%s11959_s18 + $0x24] ss:$16 sps:$4 sm:$0xff]  }
 0xce1   : > { %8681 = vmatmul.mubr.bf16.gmra.mrb[72].mxu1 %v9808_v5  ;;  %v5570_v5 = vld [vmem:[%s11961_s2 + $0x20] sm:$0xff] }
 0xd7e   : > { %v8726_v9 = vpop.f32.mrb[68].mxu0 }
 0xd7f   : > { %v5335_v11 = vpop.f32.mrb[69].mxu0 }
 0xd80   : > { %v8727_v62 = vpop.f32.mrb[70].mxu0 }
 0xd81   : > { %v9324_v12 = vpack.i.bf16 %v8727_v62, %v8726_v9  ;;  %v5543_v21 = vpack.c.bf16 %v8727_v62, %v8726_v9  ;;  %v5338_v3 = vpop.f32.mrb[71].mxu0 }
 0xd82   : > { %v9319_v15 = vpack.i.bf16 %v5338_v3, %v5335_v11  ;;  %v5542_v10 = vpack.c.bf16 %v5338_v3, %v5335_v11 }
 0xd84   : > { %9320 = vrot.lane.b32.xlu0 %v9319_v15, %s10176_s0  ;;  %9310 = vrot.lane.b32.xlu1 %v9319_v15, %s11960_s1  ;;  %v9810_v15 = vld [vmem:[#allocation13 + $0xf8] sm:$0xff]  }
 0xd85   : > { %8250 = vmatprep.subr.bf16.mxu0 %v5542_v10 }
 0xd86   : > { %8251 = vmatpush3.bf16.msra.mxu0 %v11018_v22  ;;  %v8730_v19 = vpop.f32.mrb[72].mxu0 }
 0xd87   : > { %8252 = vmatprep.subr.bf16.mxu0 %v5543_v21  ;;  %v5351_v17 = vpop.f32.mrb[73].mxu0  ;;  %v9809_v21 = vld [vmem:[#allocation13 + $0xf0] sm:$0xff]  }
 0xd88   : > { %9325 = vrot.lane.b32.xlu0 %v9324_v12, %s10176_s0  ;;  %9315 = vrot.lane.b32.xlu1 %v9324_v12, %s11960_s1  ;;  %v8731_v25 = vpop.f32.mrb[74].mxu0 }
 0xd89   : > { %v9344_v26 = vpack.i.bf16 %v8731_v25, %v8730_v19  ;;  %v5545_v23 = vpack.c.bf16 %v8731_v25, %v8730_v19  ;;  %v5354_v61 = vpop.f32.mrb[75].mxu0  ;;  %8684 = vmatprep.mubr.bf16.mxu1 %v9809_v21  ;;  %v9813_v25 = vld [vmem:[%s11959_s18 + $0xc] ss:$16 sps:$4 sm:$0xff]   ;;  %v9782_v21 = vld [vmem:[%s11959_s18 + $0x64] ss:$16 sps:$4 sm:$0xff]  }
 0xd8a   : > { %v9339_v63 = vpack.i.bf16 %v5354_v61, %v5351_v17  ;;  %v5544_v16 = vpack.c.bf16 %v5354_v61, %v5351_v17  ;;  %8253 = vmatpush3.bf16.msra.mxu0 %v11016_v0  ;;  %8685 = vmatmul.mubr.bf16.gmra.mrb[76].mxu1 %v9810_v15  ;;  %v5566_v61 = vld [vmem:[%s11961_s2] sm:$0xff]  ;;  %v5579_v15 = vld [vmem:[%s11961_s2 + $0x68] sm:$0xff] }
 0xd8b   : > { %5951 = vmatprep.mubr.bf16.mxu1 %v9813_v25  ;;  %v4115_v25 = vld [vmem:[%s10335_s24] sm:$0xff] }
 0xd8c   : > { %9340 = vrot.lane.b32.xlu0 %v9339_v63, %s10176_s0  ;;  %9330 = vrot.lane.b32.xlu1 %v9339_v63, %s11960_s1  ;;  %v5568_v63 = vld [vmem:[%s11961_s2 + $0x10] sm:$0xff] }
 0xd8d   : > { %8254 = vmatprep.subr.bf16.mxu0 %v5544_v16  ;;  %v5571_v16 = vld [vmem:[%s11961_s2 + $0x28] sm:$0xff] }
 0xd8e   : > { %8255 = vmatpush3.bf16.msra.mxu0 %v11026_v8  ;;  %v8734_v22 = vpop.f32.mrb[76].mxu0 }
 0xd8f   : > { %8256 = vmatprep.subr.bf16.mxu0 %v5545_v23  ;;  %v5367_v9 = vpop.f32.mrb[77].mxu0 }
 0xd90   : > { %9345 = vrot.lane.b32.xlu0 %v9344_v26, %s10176_s0  ;;  %9335 = vrot.lane.b32.xlu1 %v9344_v26, %s11960_s1  ;;  %v8735_v11 = vpop.f32.mrb[78].mxu0 }
 0xd91   : > { %v9364_v62 = vpack.i.bf16 %v8735_v11, %v8734_v22  ;;  %v5547_v0 = vpack.c.bf16 %v8735_v11, %v8734_v22  ;;  %v5370_v12 = vpop.f32.mrb[79].mxu0  ;;  %v9778_v22 = vld [vmem:[%s11959_s18 + $0x20] ss:$16 sps:$4 sm:$0xff]  }
 0xd92   : > { %v9359_v3 = vpack.i.bf16 %v5370_v12, %v5367_v9  ;;  %v5546_v14 = vpack.c.bf16 %v5370_v12, %v5367_v9  ;;  %8257 = vmatpush3.bf16.msra.mxu0 %v11024_v13  ;;  %v9779_v9 = vld [vmem:[%s11959_s18 + $0x44] ss:$16 sps:$4 sm:$0xff]   ;;  %v9781_v12 = vld [vmem:[%s11959_s18 + $0x40] ss:$16 sps:$4 sm:$0xff]  }
 0xd93   : > { %v5572_v11 = vld [vmem:[%s11961_s2 + $0x30] sm:$0xff] }
 0xd94   : > { %9360 = vrot.lane.b32.xlu0 %v9359_v3, %s10176_s0  ;;  %9350 = vrot.lane.b32.xlu1 %v9359_v3, %s11960_s1  ;;  %v5577_v3 = vld [vmem:[%s11961_s2 + $0x58] sm:$0xff] }
 0xd95   : > { %8258 = vmatprep.subr.bf16.mxu0 %v5546_v14  ;;  %v5576_v14 = vld [vmem:[%s11961_s2 + $0x50] sm:$0xff] }
 0xd96   : > { %8259 = vmatpush3.bf16.msra.mxu0 %v11034_v53  ;;  %v8738_v8 = vpop.f32.mrb[80].mxu0  ;;  %v9773_v53 = vld [vmem:[%s11959_s18] ss:$16 sps:$4 sm:$0xff]  }
 0xd97   : > { %8260 = vmatprep.subr.bf16.mxu0 %v5547_v0  ;;  %v5383_v10 = vpop.f32.mrb[81].mxu0  ;;  %v5574_v0 = vld [vmem:[%s11961_s2 + $0x40] sm:$0xff] }
 0xd98   : > { %9365 = vrot.lane.b32.xlu0 %v9364_v62, %s10176_s0  ;;  %9355 = vrot.lane.b32.xlu1 %v9364_v62, %s11960_s1  ;;  %v8739_v18 = vpop.f32.mrb[82].mxu0  ;;  %v5575_v62 = vld [vmem:[%s11961_s2 + $0x48] sm:$0xff] }
 0xd99   : > { %v9384_v13 = vpack.i.bf16 %v8739_v18, %v8738_v8  ;;  %v5549_v19 = vpack.c.bf16 %v8739_v18, %v8738_v8  ;;  %v5386_v17 = vpop.f32.mrb[83].mxu0  ;;  %v5578_v8 = vld [vmem:[%s11961_s2 + $0x60] sm:$0xff] }
 0xd9a   : > { %v9379_v26 = vpack.i.bf16 %v5386_v17, %v5383_v10  ;;  %v5548_v23 = vpack.c.bf16 %v5386_v17, %v5383_v10  ;;  %8261 = vmatpush3.bf16.msra.mxu0 %v11032_v55  ;;  %v5567_v55 = vld [vmem:[%s11961_s2 + $0x8] sm:$0xff]  ;;  %v9784_v10 = vld [vmem:[%s11959_s18 + $0x60] ss:$16 sps:$4 sm:$0xff]   ;;  %v9785_v18 = vld [vmem:[%s11959_s18 + $0x84] ss:$16 sps:$4 sm:$0xff]  }
 0xd9b   : > { %v4116_v17 = vld [vmem:[%s10335_s24 + $0x8] sm:$0xff] }
 0xd9c   : > { %9380 = vrot.lane.b32.xlu0 %v9379_v26, %s10176_s0  ;;  %9370 = vrot.lane.b32.xlu1 %v9379_v26, %s11960_s1  ;;  %v9787_v26 = vld [vmem:[%s11959_s18 + $0x80] ss:$16 sps:$4 sm:$0xff]  }
 0xd9d   : > { %8262 = vmatprep.subr.bf16.mxu0 %v5548_v23  ;;  %v9788_v23 = vld [vmem:[%s11959_s18 + $0xa4] ss:$16 sps:$4 sm:$0xff]  }
 0xd9e   : > { %8263 = vmatpush3.bf16.msra.mxu0 %v11042_v24  ;;  %v5569_v24 = vld [vmem:[%s11961_s2 + $0x18] sm:$0xff] }
 0xd9f   : > { %8264 = vmatprep.subr.bf16.mxu0 %v5549_v19  ;;  %v5580_v19 = vld [vmem:[%s11961_s2 + $0x70] sm:$0xff] }
 0xda0   : > { %9385 = vrot.lane.b32.xlu0 %v9384_v13, %s10176_s0  ;;  %9375 = vrot.lane.b32.xlu1 %v9384_v13, %s11960_s1  ;;  %v5581_v13 = vld [vmem:[%s11961_s2 + $0x78] sm:$0xff]  ;;  %s11962_s1 = sld [smem:[#allocation36_spill]]  ;;  %s11978_s0 = sld [smem:[#allocation35_spill]] }
 0xda2   : > { %8265 = vmatpush3.bf16.msra.mxu0 %v11040_v7  ;;  %v5573_v7 = vld [vmem:[%s11961_s2 + $0x38] sm:$0xff] }
 0xda4   : > { %5589 = vperm.xlu0 %9297, %v5567_v55   ;;  %5584 = vperm.xlu1 %9298, %v5566_v61   ;;  %v4117_v55 = vld [vmem:[%s10335_s24 + $0x10] sm:$0xff]  ;;  %v4120_v61 = vld [vmem:[%s10335_s24 + $0x28] sm:$0xff] }
 0xda5   : > { %5855 = vmatmul.mubr.bf16.vlgmr.msra.gmra.mrb[84].mxu0 %v9773_v53  ;;  %v4118_v53 = vld [vmem:[%s10335_s24 + $0x18] sm:$0xff] }
 0xda6   : > { %5862 = vmatprep.mubr.bf16.mxu0 %v9776_v54  ;;  %v4119_v54 = vld [vmem:[%s10335_s24 + $0x20] sm:$0xff]  ;;  %v6158_v6 = vld [vmem:[%s11962_s1 + $0x1b0] sm:$0xff]  ;;  %v6145_v48 = vld [vmem:[%s11962_s1 + $0x148] sm:$0xff] }
 0xda7   : > { %v6142_v60 = vld [vmem:[%s11962_s1 + $0x130] sm:$0xff]  ;;  %v6160_v58 = vld [vmem:[%s11962_s1 + $0x1c0] sm:$0xff]  ;;  %v6163_v44 = vld [vmem:[%s11962_s1 + $0x1d8] sm:$0xff] }
 0xda8   : > { %5599 = vperm.xlu0 %9297, %v5569_v24   ;;  %5594 = vperm.xlu1 %9298, %v5568_v63   ;;  %v9790_v24 = vld [vmem:[%s11959_s18 + $0xa0] ss:$16 sps:$4 sm:$0xff]   ;;  %v9791_v63 = vld [vmem:[%s11959_s18 + $0xc4] ss:$16 sps:$4 sm:$0xff]   ;;  %v6147_v40 = vld [vmem:[%s11962_s1 + $0x158] sm:$0xff] }
 0xdac   : > { %5609 = vperm.xlu0 %9297, %v5571_v16   ;;  %5604 = vperm.xlu1 %9298, %v5570_v5   ;;  %v4122_v16 = vld [vmem:[%s10335_s24 + $0x38] sm:$0xff]  ;;  %v4121_v5 = vld [vmem:[%s10335_s24 + $0x30] sm:$0xff] }
 0xdad   : > { %5863 = vmatmul.mubr.bf16.gmra.mrb[88].mxu0 %v9778_v22  ;;  %v4124_v22 = vld [vmem:[%s10335_s24 + $0x48] sm:$0xff] }
 0xdae   : > { %5870 = vmatprep.mubr.bf16.mxu0 %v9779_v9  ;;  %v4123_v9 = vld [vmem:[%s10335_s24 + $0x40] sm:$0xff] }
 0xdb0   : > { %5619 = vperm.xlu0 %9297, %v5573_v7   ;;  %5614 = vperm.xlu1 %9298, %v5572_v11   ;;  %v9793_v7 = vld [vmem:[%s11959_s18 + $0xc0] ss:$16 sps:$4 sm:$0xff]   ;;  %v9794_v11 = vld [vmem:[%s11959_s18 + $0xe4] ss:$16 sps:$4 sm:$0xff]  }
 0xdb4   : > { %5629 = vperm.xlu0 %9297, %v5575_v62   ;;  %5624 = vperm.xlu1 %9298, %v5574_v0   ;;  %v4126_v62 = vld [vmem:[%s10335_s24 + $0x58] sm:$0xff]  ;;  %v4125_v0 = vld [vmem:[%s10335_s24 + $0x50] sm:$0xff] }
 0xdb5   : > { %5871 = vmatmul.mubr.bf16.gmra.mrb[92].mxu0 %v9781_v12  ;;  %v4128_v12 = vld [vmem:[%s10335_s24 + $0x68] sm:$0xff] }
 0xdb6   : > { %5878 = vmatprep.mubr.bf16.mxu0 %v9782_v21  ;;  %v4127_v21 = vld [vmem:[%s10335_s24 + $0x60] sm:$0xff] }
 0xdb8   : > { %5639 = vperm.xlu0 %9297, %v5577_v3   ;;  %5634 = vperm.xlu1 %9298, %v5576_v14   ;;  %v9796_v3 = vld [vmem:[%s11959_s18 + $0xe0] ss:$16 sps:$4 sm:$0xff]   ;;  %v4130_v14 = vld [vmem:[%s10335_s24 + $0x78] sm:$0xff] }
 0xdbc   : > { %5649 = vperm.xlu0 %9297, %v5579_v15   ;;  %5644 = vperm.xlu1 %9298, %v5578_v8   ;;  %v4129_v15 = vld [vmem:[%s10335_s24 + $0x70] sm:$0xff]  ;;  %v4132_v8 = vld [vmem:[%s10335_s24 + $0x88] sm:$0xff] }
 0xdbd   : > { %5879 = vmatmul.mubr.bf16.gmra.mrb[96].mxu0 %v9784_v10  ;;  %v4131_v10 = vld [vmem:[%s10335_s24 + $0x80] sm:$0xff] }
 0xdbe   : > { %5886 = vmatprep.mubr.bf16.mxu0 %v9785_v18  ;;  %v4134_v18 = vld [vmem:[%s10335_s24 + $0x98] sm:$0xff] }
 0xdc0   : > { %5659 = vperm.xlu0 %9297, %v5581_v13   ;;  %5654 = vperm.xlu1 %9298, %v5580_v19   ;;  %v4133_v13 = vld [vmem:[%s10335_s24 + $0x90] sm:$0xff]  ;;  %v4136_v19 = vld [vmem:[%s10335_s24 + $0xa8] sm:$0xff] }
 0xdc4   : > { %4186 = vperm.xlu0 %9297, %v4116_v17   ;;  %4181 = vperm.xlu1 %9298, %v4115_v25   ;;  %v4135_v17 = vld [vmem:[%s10335_s24 + $0xa0] sm:$0xff]  ;;  %v4138_v25 = vld [vmem:[%s10335_s24 + $0xb8] sm:$0xff] }
 0xdc5   : > { %5887 = vmatmul.mubr.bf16.gmra.mrb[100].mxu0 %v9787_v26  ;;  %v4137_v26 = vld [vmem:[%s10335_s24 + $0xb0] sm:$0xff] }
 0xdc6   : > { %5894 = vmatprep.mubr.bf16.mxu0 %v9788_v23  ;;  %v4140_v23 = vld [vmem:[%s10335_s24 + $0xc8] sm:$0xff] }
 0xdc8   : > { %4196 = vperm.xlu0 %9297, %v4118_v53   ;;  %4191 = vperm.xlu1 %9298, %v4117_v55   ;;  %v4139_v53 = vld [vmem:[%s10335_s24 + $0xc0] sm:$0xff]  ;;  %v4142_v55 = vld [vmem:[%s10335_s24 + $0xd8] sm:$0xff] }
 0xdcc   : > { %4206 = vperm.xlu0 %9297, %v4120_v61   ;;  %4201 = vperm.xlu1 %9298, %v4119_v54   ;;  %v4141_v61 = vld [vmem:[%s10335_s24 + $0xd0] sm:$0xff] }
 0xdcd   : > { %5895 = vmatmul.mubr.bf16.gmra.mrb[104].mxu0 %v9790_v24 }
 0xdce   : > { %5902 = vmatprep.mubr.bf16.mxu0 %v9791_v63 }
 0xdd0   : > { %4216 = vperm.xlu0 %9297, %v4122_v16   ;;  %4211 = vperm.xlu1 %9298, %v4121_v5  }
 0xdd4   : > { %4226 = vperm.xlu0 %9297, %v4124_v22   ;;  %4221 = vperm.xlu1 %9298, %v4123_v9  }
 0xdd5   : > { %5903 = vmatmul.mubr.bf16.gmra.mrb[108].mxu0 %v9793_v7 }
 0xdd6   : > { %5910 = vmatprep.mubr.bf16.mxu0 %v9794_v11  ;;  %v4144_v11 = vld [vmem:[%s10335_s24 + $0xe8] sm:$0xff] }
 0xdd8   : > { %4236 = vperm.xlu0 %9297, %v4126_v62   ;;  %4231 = vperm.xlu1 %9298, %v4125_v0  }
 0xddc   : > { %4246 = vperm.xlu0 %9297, %v4128_v12   ;;  %4241 = vperm.xlu1 %9298, %v4127_v21   ;;  %v4143_v12 = vld [vmem:[%s10335_s24 + $0xe0] sm:$0xff] }
 0xddd   : > { %5911 = vmatmul.mubr.bf16.gmra.mrb[112].mxu0 %v9796_v3 }
 0xde0   : > { %4256 = vperm.xlu0 %9297, %v4130_v14   ;;  %4251 = vperm.xlu1 %9298, %v4129_v15  }
 0xde4   : > { %4266 = vperm.xlu0 %9297, %v4132_v8   ;;  %4261 = vperm.xlu1 %9298, %v4131_v10  }
 0xde8   : > { %4276 = vperm.xlu0 %9297, %v4134_v18   ;;  %4271 = vperm.xlu1 %9298, %v4133_v13   ;;  %v4146_v18 = vld [vmem:[%s10335_s24 + $0xf8] sm:$0xff] }
 0xdec   : > { %4286 = vperm.xlu0 %9297, %v4136_v19   ;;  %4281 = vperm.xlu1 %9298, %v4135_v17   ;;  %v4145_v17 = vld [vmem:[%s10335_s24 + $0xf0] sm:$0xff] }
 0xdf0   : > { %4296 = vperm.xlu0 %9297, %v4138_v25   ;;  %4291 = vperm.xlu1 %9298, %v4137_v26  }
 0xdf4   : > { %4306 = vperm.xlu0 %9297, %v4140_v23   ;;  %4301 = vperm.xlu1 %9298, %v4139_v53  }
 0xdf6   : > { %v9321_v54 = vpop.permute.xlu0 %9320  ;;  %v9311_v24 = vpop.permute.xlu1 %9310 }
 0xdf7   : > { %v9323_v63 = vunpack.i.h.bf16 %v9321_v54  ;;  %v9322_v16 = vunpack.i.l.bf16 %v9321_v54  ;;  %v9313_v5 = vunpack.i.h.bf16 %v9311_v24  ;;  %v9312_v22 = vunpack.i.l.bf16 %v9311_v24  ;;  %v4148_v54 = vld [vmem:[%s10335_s24 + $0x108] sm:$0xff] }
 0xdf8   : > { %4316 = vperm.xlu0 %9297, %v4142_v55   ;;  %4311 = vperm.xlu1 %9298, %v4141_v61  }
 0xdf9   : > { %v5550_v9 = vpack.c.bf16 %v9323_v63, %v9322_v16  ;;  %v5558_v7 = vpack.c.bf16 %v9313_v5, %v9312_v22  ;;  %v4147_v16 = vld [vmem:[%s10335_s24 + $0x100] sm:$0xff] }
 0xdfa   : > { %v9326_v62 = vpop.permute.xlu0 %9325  ;;  %v9316_v0 = vpop.permute.xlu1 %9315 }
 0xdfb   : > { %v9328_v21 = vunpack.i.h.bf16 %v9326_v62  ;;  %v9327_v3 = vunpack.i.l.bf16 %v9326_v62  ;;  %v9318_v14 = vunpack.i.h.bf16 %v9316_v0  ;;  %v9317_v15 = vunpack.i.l.bf16 %v9316_v0  ;;  %8314 = vmatprep.subr.bf16.mxu1 %v5558_v7  ;;  %v4150_v0 = vld [vmem:[%s10335_s24 + $0x118] sm:$0xff] }
 0xdfc   : > { %8315 = vmatpush3.bf16.msra.mxu1 %v5550_v9  ;;  %4326 = vperm.xlu0 %9297, %v4144_v11  }
 0xdfd   : > { %v5551_v8 = vpack.c.bf16 %v9328_v21, %v9327_v3  ;;  %4321 = vperm.xlu1 %9298, %v4143_v12   ;;  %v5559_v10 = vpack.c.bf16 %v9318_v14, %v9317_v15  ;;  %v4149_v3 = vld [vmem:[%s10335_s24 + $0x110] sm:$0xff] }
 0xdfe   : > { %v9341_v13 = vpop.permute.xlu0 %9340  ;;  %v9331_v19 = vpop.permute.xlu1 %9330 }
 0xdff   : > { %v9343_v25 = vunpack.i.h.bf16 %v9341_v13  ;;  %v9342_v26 = vunpack.i.l.bf16 %v9341_v13  ;;  %v9333_v23 = vunpack.i.h.bf16 %v9331_v19  ;;  %v9332_v53 = vunpack.i.l.bf16 %v9331_v19  ;;  %8316 = vmatprep.subr.bf16.mxu1 %v5559_v10  ;;  %v4152_v19 = vld [vmem:[%s10335_s24 + $0x128] sm:$0xff] }
 0xe00   : > { %8317 = vmatpush3.bf16.msra.mxu1 %v5551_v8  ;;  %4336 = vperm.xlu0 %9297, %v4146_v18  }
 0xe01   : > { %v5552_v55 = vpack.c.bf16 %v9343_v25, %v9342_v26  ;;  %4331 = vperm.xlu1 %9298, %v4145_v17   ;;  %v5560_v61 = vpack.c.bf16 %v9333_v23, %v9332_v53  ;;  %v4151_v26 = vld [vmem:[%s10335_s24 + $0x120] sm:$0xff] }
 0xe02   : > { %v9346_v24 = vpop.permute.xlu0 %9345  ;;  %v9336_v63 = vpop.permute.xlu1 %9335 }
 0xe03   : > { %v9348_v5 = vunpack.i.h.bf16 %v9346_v24  ;;  %v9347_v22 = vunpack.i.l.bf16 %v9346_v24  ;;  %v9338_v9 = vunpack.i.h.bf16 %v9336_v63  ;;  %v9337_v7 = vunpack.i.l.bf16 %v9336_v63  ;;  %8318 = vmatprep.subr.bf16.mxu1 %v5560_v61  ;;  %v4154_v63 = vld [vmem:[%s10335_s24 + $0x138] sm:$0xff] }
 0xe04   : > { %8319 = vmatpush3.bf16.msra.mxu1 %v5552_v55  ;;  %4346 = vperm.xlu0 %9297, %v4148_v54  }
 0xe05   : > { %v5553_v11 = vpack.c.bf16 %v9348_v5, %v9347_v22  ;;  %4341 = vperm.xlu1 %9298, %v4147_v16   ;;  %v5561_v62 = vpack.c.bf16 %v9338_v9, %v9337_v7  ;;  %v4153_v22 = vld [vmem:[%s10335_s24 + $0x130] sm:$0xff] }
 0xe06   : > { %v9361_v12 = vpop.permute.xlu0 %9360  ;;  %v9351_v21 = vpop.permute.xlu1 %9350 }
 0xe07   : > { %v9363_v14 = vunpack.i.h.bf16 %v9361_v12  ;;  %v9362_v15 = vunpack.i.l.bf16 %v9361_v12  ;;  %v9353_v8 = vunpack.i.h.bf16 %v9351_v21  ;;  %v9352_v10 = vunpack.i.l.bf16 %v9351_v21  ;;  %8320 = vmatprep.subr.bf16.mxu1 %v5561_v62  ;;  %v6120_v21 = vld [vmem:[%s11962_s1 + $0x80] sm:$0xff] }
 0xe08   : > { %8321 = vmatpush3.bf16.msra.mxu1 %v5553_v11  ;;  %4356 = vperm.xlu0 %9297, %v4150_v0  }
 0xe09   : > { %v5554_v18 = vpack.c.bf16 %v9363_v14, %v9362_v15  ;;  %4351 = vperm.xlu1 %9298, %v4149_v3   ;;  %v5562_v13 = vpack.c.bf16 %v9353_v8, %v9352_v10  ;;  %v4155_v15 = vld [vmem:[%s10335_s24 + $0x140] sm:$0xff] }
 0xe0a   : > { %v9366_v17 = vpop.permute.xlu0 %9365  ;;  %v9356_v25 = vpop.permute.xlu1 %9355 }
 0xe0b   : > { %v9368_v23 = vunpack.i.h.bf16 %v9366_v17  ;;  %v9367_v53 = vunpack.i.l.bf16 %v9366_v17  ;;  %v9358_v55 = vunpack.i.h.bf16 %v9356_v25  ;;  %v9357_v61 = vunpack.i.l.bf16 %v9356_v25  ;;  %8322 = vmatprep.subr.bf16.mxu1 %v5562_v13  ;;  %v6104_v25 = vld [vmem:[%s11962_s1] sm:$0xff] }
 0xe0c   : > { %8323 = vmatpush3.bf16.msra.mxu1 %v5554_v18  ;;  %4366 = vperm.xlu0 %9297, %v4152_v19  }
 0xe0d   : > { %v5555_v54 = vpack.c.bf16 %v9368_v23, %v9367_v53  ;;  %4361 = vperm.xlu1 %9298, %v4151_v26   ;;  %v5563_v24 = vpack.c.bf16 %v9358_v55, %v9357_v61  ;;  %v6121_v26 = vld [vmem:[%s11962_s1 + $0x88] sm:$0xff]  ;;  %v6122_v55 = vld [vmem:[%s11962_s1 + $0x90] sm:$0xff] }
 0xe0e   : > { %v9381_v16 = vpop.permute.xlu0 %9380  ;;  %v9371_v5 = vpop.permute.xlu1 %9370  ;;  %v9811_v23 = vld [vmem:[%s11959_s18 + $0x8] ss:$16 sps:$4 sm:$0xff]   ;;  %v9814_v53 = vld [vmem:[%s11959_s18 + $0x2c] ss:$16 sps:$4 sm:$0xff]  }
 0xe0f   : > { %v9383_v9 = vunpack.i.h.bf16 %v9381_v16  ;;  %v9382_v7 = vunpack.i.l.bf16 %v9381_v16  ;;  %v9373_v11 = vunpack.i.h.bf16 %v9371_v5  ;;  %v9372_v62 = vunpack.i.l.bf16 %v9371_v5  ;;  %8324 = vmatprep.subr.bf16.mxu1 %v5563_v24  ;;  %v6105_v61 = vld [vmem:[%s11962_s1 + $0x8] sm:$0xff]  ;;  %v6123_v24 = vld [vmem:[%s11962_s1 + $0x98] sm:$0xff]  ;;  %v6124_v5 = vld [vmem:[%s11962_s1 + $0xa0] sm:$0xff] }
 0xe10   : > { %8325 = vmatpush3.bf16.msra.mxu1 %v5555_v54  ;;  %4376 = vperm.xlu0 %9297, %v4154_v63   ;;  %v6106_v54 = vld [vmem:[%s11962_s1 + $0x10] sm:$0xff]  ;;  %v9816_v63 = vld [vmem:[%s11959_s18 + $0x28] ss:$16 sps:$4 sm:$0xff]   ;;  %v9817_v16 = vld [vmem:[%s11959_s18 + $0x4c] ss:$16 sps:$4 sm:$0xff]  }
 0xe11   : > { %v5556_v0 = vpack.c.bf16 %v9383_v9, %v9382_v7  ;;  %4371 = vperm.xlu1 %9298, %v4153_v22   ;;  %v5564_v12 = vpack.c.bf16 %v9373_v11, %v9372_v62  ;;  %v6107_v22 = vld [vmem:[%s11962_s1 + $0x18] sm:$0xff]  ;;  %v6108_v9 = vld [vmem:[%s11962_s1 + $0x20] sm:$0xff]  ;;  %v6125_v7 = vld [vmem:[%s11962_s1 + $0xa8] sm:$0xff] }
 0xe12   : > { %v9386_v3 = vpop.permute.xlu0 %9385  ;;  %v9376_v14 = vpop.permute.xlu1 %9375  ;;  %v9819_v11 = vld [vmem:[%s11959_s18 + $0x48] ss:$16 sps:$4 sm:$0xff]   ;;  %v9820_v62 = vld [vmem:[%s11959_s18 + $0x6c] ss:$16 sps:$4 sm:$0xff]  }
 0xe13   : > { %v9388_v8 = vunpack.i.h.bf16 %v9386_v3  ;;  %v9387_v10 = vunpack.i.l.bf16 %v9386_v3  ;;  %v9378_v18 = vunpack.i.h.bf16 %v9376_v14  ;;  %v9377_v13 = vunpack.i.l.bf16 %v9376_v14  ;;  %8326 = vmatprep.subr.bf16.mxu1 %v5564_v12  ;;  %v6109_v12 = vld [vmem:[%s11962_s1 + $0x28] sm:$0xff]  ;;  %v6127_v3 = vld [vmem:[%s11962_s1 + $0xb8] sm:$0xff] }
 0xe14   : > { %6250 = vperm.xlu0 %9297, %v6120_v21   ;;  %8327 = vmatpush3.bf16.msra.mxu1 %v5556_v0  ;;  %v6126_v0 = vld [vmem:[%s11962_s1 + $0xb0] sm:$0xff]  ;;  %v9822_v14 = vld [vmem:[%s11959_s18 + $0x68] ss:$16 sps:$4 sm:$0xff]  }
 0xe15   : > { %v5557_v19 = vpack.c.bf16 %v9388_v8, %v9387_v10  ;;  %4381 = vperm.xlu1 %9298, %v4155_v15   ;;  %v5565_v17 = vpack.c.bf16 %v9378_v18, %v9377_v13  ;;  %v6110_v21 = vld [vmem:[%s11962_s1 + $0x30] sm:$0xff]  ;;  %v9823_v15 = vld [vmem:[%s11959_s18 + $0x8c] ss:$16 sps:$4 sm:$0xff]   ;;  %v6128_v8 = vld [vmem:[%s11962_s1 + $0xc0] sm:$0xff] }
 0xe16   : > { %v6111_v10 = vld [vmem:[%s11962_s1 + $0x38] sm:$0xff]  ;;  %v6112_v18 = vld [vmem:[%s11962_s1 + $0x40] sm:$0xff]  ;;  %v6129_v13 = vld [vmem:[%s11962_s1 + $0xc8] sm:$0xff] }
 0xe17   : > { %8328 = vmatprep.subr.bf16.mxu1 %v5565_v17  ;;  %v9826_v17 = vld [vmem:[%s11959_s18 + $0xac] ss:$16 sps:$4 sm:$0xff]  }
 0xe18   : > { %6170 = vperm.xlu0 %9297, %v6104_v25   ;;  %8329 = vmatpush3.bf16.msra.mxu1 %v5557_v19  ;;  %v9825_v19 = vld [vmem:[%s11959_s18 + $0x88] ss:$16 sps:$4 sm:$0xff]   ;;  %v6130_v25 = vld [vmem:[%s11962_s1 + $0xd0] sm:$0xff] }
 0xe19   : > { %6255 = vperm.xlu1 %9298, %v6121_v26   ;;  %v6113_v26 = vld [vmem:[%s11962_s1 + $0x48] sm:$0xff] }
 0xe1b   : > { %5952 = vmatmul.mubr.bf16.vlgmr.msra.gmra.mrb[80].mxu1 %v9811_v23 }
 0xe1c   : > { %6260 = vperm.xlu0 %9297, %v6122_v55   ;;  %5959 = vmatprep.mubr.bf16.mxu1 %v9814_v53  ;;  %v6114_v55 = vld [vmem:[%s11962_s1 + $0x50] sm:$0xff] }
 0xe1d   : > { %6175 = vperm.xlu1 %9298, %v6105_v61   ;;  %v6131_v61 = vld [vmem:[%s11962_s1 + $0xd8] sm:$0xff] }
 0xe20   : > { %6180 = vperm.xlu0 %9297, %v6106_v54   ;;  %v9828_v54 = vld [vmem:[%s11959_s18 + $0xa8] ss:$16 sps:$4 sm:$0xff]  }
 0xe21   : > { %6265 = vperm.xlu1 %9298, %v6123_v24   ;;  %v9829_v24 = vld [vmem:[%s11959_s18 + $0xcc] ss:$16 sps:$4 sm:$0xff]  }
 0xe23   : > { %5960 = vmatmul.mubr.bf16.gmra.mrb[84].mxu1 %v9816_v63  ;;  %v11177_v23 = vpop.permute.xlu0 %5589  ;;  %v11179_v53 = vpop.permute.xlu1 %5584  ;;  %v6132_v63 = vld [vmem:[%s11962_s1 + $0xe0] sm:$0xff] }
 0xe24   : > { %6270 = vperm.xlu0 %9297, %v6124_v5   ;;  %5967 = vmatprep.mubr.bf16.mxu1 %v9817_v16  ;;  %v6115_v5 = vld [vmem:[%s11962_s1 + $0x58] sm:$0xff] }
 0xe25   : > { %6185 = vperm.xlu1 %9298, %v6107_v22  }
 0xe27   : > { %v11186_v16 = vpop.permute.xlu0 %5599  ;;  %v11189_v22 = vpop.permute.xlu1 %5594 }
 0xe28   : > { %6190 = vperm.xlu0 %9297, %v6108_v9   ;;  %v6116_v9 = vld [vmem:[%s11962_s1 + $0x60] sm:$0xff] }
 0xe29   : > { %6275 = vperm.xlu1 %9298, %v6125_v7   ;;  %v6133_v7 = vld [vmem:[%s11962_s1 + $0xe8] sm:$0xff] }
 0xe2b   : > { %5968 = vmatmul.mubr.bf16.gmra.mrb[88].mxu1 %v9819_v11  ;;  %v9831_v11 = vld [vmem:[%s11959_s18 + $0xc8] ss:$16 sps:$4 sm:$0xff]  }
 0xe2c   : > { %6280 = vperm.xlu0 %9297, %v6126_v0   ;;  %5975 = vmatprep.mubr.bf16.mxu1 %v9820_v62  ;;  %v11194_v62 = vpop.permute.xlu0 %5609  ;;  %v9832_v0 = vld [vmem:[%s11959_s18 + $0xec] ss:$16 sps:$4 sm:$0xff]  }
 0xe2d   : > { %6195 = vperm.xlu1 %9298, %v6109_v12   ;;  %v11197_v12 = vpop.permute.xlu1 %5604 }
 0xe30   : > { %6200 = vperm.xlu0 %9297, %v6110_v21   ;;  %v6134_v21 = vld [vmem:[%s11962_s1 + $0xf0] sm:$0xff] }
 0xe31   : > { %6285 = vperm.xlu1 %9298, %v6127_v3   ;;  %v6117_v3 = vld [vmem:[%s11962_s1 + $0x68] sm:$0xff] }
 0xe33   : > { %5976 = vmatmul.mubr.bf16.gmra.mrb[92].mxu1 %v9822_v14  ;;  %v6118_v14 = vld [vmem:[%s11962_s1 + $0x70] sm:$0xff] }
 0xe34   : > { %6290 = vperm.xlu0 %9297, %v6128_v8   ;;  %5983 = vmatprep.mubr.bf16.mxu1 %v9823_v15  ;;  %v11202_v15 = vpop.permute.xlu0 %5619  ;;  %v6135_v8 = vld [vmem:[%s11962_s1 + $0xf8] sm:$0xff] }
 0xe35   : > { %6205 = vperm.xlu1 %9298, %v6111_v10   ;;  %v11205_v10 = vpop.permute.xlu1 %5614 }
 0xe38   : > { %6210 = vperm.xlu0 %9297, %v6112_v18   ;;  %v9834_v18 = vld [vmem:[%s11959_s18 + $0xe8] ss:$16 sps:$4 sm:$0xff]  }
 0xe39   : > { %6295 = vperm.xlu1 %9298, %v6129_v13   ;;  %v4163_v13 = vld [vmem:[%s10335_s24 + $0x180] sm:$0xff] }
 0xe3b   : > { %5984 = vmatmul.mubr.bf16.gmra.mrb[96].mxu1 %v9825_v19  ;;  %v6119_v19 = vld [vmem:[%s11962_s1 + $0x78] sm:$0xff] }
 0xe3c   : > { %6300 = vperm.xlu0 %9297, %v6130_v25   ;;  %5991 = vmatprep.mubr.bf16.mxu1 %v9826_v17  ;;  %v11210_v17 = vpop.permute.xlu0 %5629  ;;  %v11212_v25 = vpop.permute.xlu1 %5624 }
 0xe3d   : > { %6215 = vperm.xlu1 %9298, %v6113_v26   ;;  %v6152_v26 = vld [vmem:[%s11962_s1 + $0x180] sm:$0xff] }
 0xe40   : > { %6220 = vperm.xlu0 %9297, %v6114_v55   ;;  %v4164_v55 = vld [vmem:[%s10335_s24 + $0x188] sm:$0xff] }
 0xe41   : > { %6305 = vperm.xlu1 %9298, %v6131_v61   ;;  %v6136_v61 = vld [vmem:[%s11962_s1 + $0x100] sm:$0xff] }
 0xe43   : > { %5992 = vmatmul.mubr.bf16.gmra.mrb[100].mxu1 %v9828_v54  ;;  %v11217_v54 = vpop.permute.xlu0 %5639 }
 0xe44   : > { %6310 = vperm.xlu0 %9297, %v6132_v63   ;;  %5999 = vmatprep.mubr.bf16.mxu1 %v9829_v24  ;;  %v6153_v24 = vld [vmem:[%s11962_s1 + $0x188] sm:$0xff]  ;;  %v11220_v63 = vpop.permute.xlu1 %5634 }
 0xe45   : > { %6225 = vperm.xlu1 %9298, %v6115_v5   ;;  %v4165_v5 = vld [vmem:[%s10335_s24 + $0x190] sm:$0xff] }
 0xe48   : > { %6230 = vperm.xlu0 %9297, %v6116_v9   ;;  %v6137_v9 = vld [vmem:[%s11962_s1 + $0x108] sm:$0xff] }
 0xe49   : > { %6315 = vperm.xlu1 %9298, %v6133_v7   ;;  %v11224_v7 = vpop.permute.xlu0 %5649 }
 0xe4b   : > { %6000 = vmatmul.mubr.bf16.gmra.mrb[104].mxu1 %v9831_v11  ;;  %v11226_v11 = vpop.permute.xlu1 %5644 }
 0xe4c   : > { %6320 = vperm.xlu0 %9297, %v6134_v21   ;;  %6007 = vmatprep.mubr.bf16.mxu1 %v9832_v0  ;;  %v6154_v0 = vld [vmem:[%s11962_s1 + $0x190] sm:$0xff]  ;;  %v4166_v21 = vld [vmem:[%s10335_s24 + $0x198] sm:$0xff] }
 0xe4d   : > { %6235 = vperm.xlu1 %9298, %v6117_v3   ;;  %v6138_v3 = vld [vmem:[%s11962_s1 + $0x110] sm:$0xff] }
 0xe50   : > { %6240 = vperm.xlu0 %9297, %v6118_v14   ;;  %v11231_v14 = vpop.permute.xlu0 %5659 }
 0xe51   : > { %6325 = vperm.xlu1 %9298, %v6135_v8   ;;  %v6155_v8 = vld [vmem:[%s11962_s1 + $0x198] sm:$0xff] }
 0xe53   : > { %6008 = vmatmul.mubr.bf16.gmra.mrb[108].mxu1 %v9834_v18  ;;  %v11234_v18 = vpop.permute.xlu1 %5654 }
 0xe54   : > { %4421 = vperm.xlu0 %9297, %v4163_v13   ;;  %v4167_v13 = vld [vmem:[%s10335_s24 + $0x1a0] sm:$0xff] }
 0xe55   : > { %6245 = vperm.xlu1 %9298, %v6119_v19   ;;  %v6139_v19 = vld [vmem:[%s11962_s1 + $0x118] sm:$0xff] }
 0xe58   : > { %6410 = vperm.xlu0 %9297, %v6152_v26   ;;  %v11238_v26 = vpop.permute.xlu0 %4186 }
 0xe59   : > { %4426 = vperm.xlu1 %9298, %v4164_v55   ;;  %v11240_v55 = vpop.permute.xlu1 %4181 }
 0xe5c   : > { %6330 = vperm.xlu0 %9297, %v6136_v61   ;;  %v6156_v61 = vld [vmem:[%s11962_s1 + $0x1a0] sm:$0xff] }
 0xe5d   : > { %6415 = vperm.xlu1 %9298, %v6153_v24   ;;  %v4168_v24 = vld [vmem:[%s10335_s24 + $0x1a8] sm:$0xff] }
 0xe60   : > { %4431 = vperm.xlu0 %9297, %v4165_v5   ;;  %v6140_v5 = vld [vmem:[%s11962_s1 + $0x120] sm:$0xff] }
 0xe61   : > { %6335 = vperm.xlu1 %9298, %v6137_v9   ;;  %v11245_v9 = vpop.permute.xlu0 %4196 }
 0xe64   : > { %6420 = vperm.xlu0 %9297, %v6154_v0   ;;  %v6157_v0 = vld [vmem:[%s11962_s1 + $0x1a8] sm:$0xff] }
 0xe65   : > { %4436 = vperm.xlu1 %9298, %v4166_v21   ;;  %v11248_v21 = vpop.permute.xlu1 %4191 }
 0xe68   : > { %6340 = vperm.xlu0 %9297, %v6138_v3   ;;  %v4169_v3 = vld [vmem:[%s10335_s24 + $0x1b0] sm:$0xff] }
 0xe69   : > { %6425 = vperm.xlu1 %9298, %v6155_v8   ;;  %v6141_v8 = vld [vmem:[%s11962_s1 + $0x128] sm:$0xff] }
 0xe6c   : > { %4441 = vperm.xlu0 %9297, %v4167_v13   ;;  %v11252_v13 = vpop.permute.xlu0 %4206 }
 0xe6d   : > { %6345 = vperm.xlu1 %9298, %v6139_v19   ;;  %11963 = vst [vmem:[#allocation66_spill] sm:$0xff] %v11252_v13 }
 0xe70   : > { %6430 = vperm.xlu0 %9297, %v6156_v61   ;;  %v11254_v61 = vpop.permute.xlu1 %4201  ;;  %v11263_v20 = vpop.permute.xlu0 %4216 }
 0xe71   : > { %4446 = vperm.xlu1 %9298, %v4168_v24  }
 0xe74   : > { %6350 = vperm.xlu0 %9297, %v6140_v5   ;;  %v11266_v57 = vpop.permute.xlu1 %4211 }
 0xe75   : > { %6435 = vperm.xlu1 %9298, %v6157_v0  }
 0xe78   : > { %v8266_v19 = vpop.f32.mrb[84].mxu0  ;;  %4451 = vperm.xlu0 %9297, %v4169_v3   ;;  %v6159_v3 = vld [vmem:[%s11962_s1 + $0x1b8] sm:$0xff]  ;;  %v11276_v52 = vpop.permute.xlu1 %4221 }
 0xe79   : > { %6355 = vperm.xlu1 %9298, %v6141_v8   ;;  %v8267_v24 = vpop.f32.mrb[85].mxu0  ;;  %11965 = vst [vmem:[#allocation68_spill] sm:$0xff] %v11276_v52 }
 0xe7a   : > { %v11257_v4 = vadd.f32 %v8267_v24, %v8266_v19  ;;  %v8269_v59 = vpop.f32.mrb[86].mxu0  ;;  %v4171_v24 = vld [vmem:[%s10335_s24 + $0x1c0] sm:$0xff] }
 0xe7b   : > { %v8270_v5 = vpop.f32.mrb[87].mxu0 }
 0xe7c   : > { %v11260_v0 = vadd.f32 %v8270_v5, %v8269_v59  ;;  %6440 = vperm.xlu0 %9297, %v6158_v6   ;;  %v6143_v5 = vld [vmem:[%s11962_s1 + $0x138] sm:$0xff] }
 0xe7d   : > { %4456 = vperm.xlu1 %9298, %v4170_v1   ;;  %v11272_v1 = vpop.permute.xlu0 %4226 }
 0xe7e   : > { %11964 = vst [vmem:[#allocation67_spill] sm:$0xff] %v11272_v1 }
 0xe80   : > { %v8272_v8 = vpop.f32.mrb[88].mxu0  ;;  %6360 = vperm.xlu0 %9297, %v6142_v60   ;;  %v4172_v60 = vld [vmem:[%s10335_s24 + $0x1c8] sm:$0xff] }
 0xe81   : > { %6445 = vperm.xlu1 %9298, %v6159_v3   ;;  %v8273_v19 = vpop.f32.mrb[89].mxu0  ;;  %v11281_v51 = vpop.permute.xlu0 %4236 }
 0xe82   : > { %v11269_v56 = vadd.f32 %v8273_v19, %v8272_v8  ;;  %v8275_v59 = vpop.f32.mrb[90].mxu0  ;;  %v4156_v19 = vld [vmem:[%s10335_s24 + $0x148] sm:$0xff]  ;;  %11966 = vst [vmem:[#allocation69_spill] sm:$0xff] %v11281_v51  ;;  %v4161_v51 = vld [vmem:[%s10335_s24 + $0x170] sm:$0xff] }
 0xe83   : > { %v8276_v6 = vpop.f32.mrb[91].mxu0 }
 0xe84   : > { %v11274_v2 = vadd.f32 %v8276_v6, %v8275_v59  ;;  %4461 = vperm.xlu0 %9297, %v4171_v24   ;;  %v6161_v6 = vld [vmem:[%s11962_s1 + $0x1c8] sm:$0xff]  ;;  %v11286_v24 = vpop.permute.xlu1 %4231 }
 0xe85   : > { %6365 = vperm.xlu1 %9298, %v6143_v5   ;;  %11967 = vst [vmem:[#allocation70_spill] sm:$0xff] %v11286_v24 }
 0xe88   : > { %v8278_v3 = vpop.f32.mrb[92].mxu0  ;;  %6450 = vperm.xlu0 %9297, %v6160_v58   ;;  %v6144_v58 = vld [vmem:[%s11962_s1 + $0x140] sm:$0xff] }
 0xe89   : > { %4466 = vperm.xlu1 %9298, %v4172_v60   ;;  %v8279_v8 = vpop.f32.mrb[93].mxu0  ;;  %v11292_v60 = vpop.permute.xlu0 %4246 }
 0xe8a   : > { %v11283_v50 = vadd.f32 %v8279_v8, %v8278_v3  ;;  %v8281_v59 = vpop.f32.mrb[94].mxu0  ;;  %11968 = vst [vmem:[#allocation71_spill] sm:$0xff] %v11292_v60  ;;  %v11294_v3 = vpop.permute.xlu1 %4241 }
 0xe8b   : > { %v8282_v5 = vpop.f32.mrb[95].mxu0  ;;  %11969 = vst [vmem:[#allocation72_spill] sm:$0xff] %v11294_v3 }
 0xe8c   : > { %v11288_v49 = vadd.f32 %v8282_v5, %v8281_v59  ;;  %4386 = vperm.xlu0 %9297, %v4156_v19   ;;  %v4173_v5 = vld [vmem:[%s10335_s24 + $0x1d0] sm:$0xff] }
 0xe8d   : > { %6455 = vperm.xlu1 %9298, %v6161_v6   ;;  %v11303_v43 = vpop.permute.xlu0 %4256 }
 0xe8e   : > { %11970 = vst [vmem:[#allocation73_spill] sm:$0xff] %v11303_v43  ;;  %v11306_v42 = vpop.permute.xlu1 %4251 }
 0xe8f   : > { %11971 = vst [vmem:[#allocation74_spill] sm:$0xff] %v11306_v42  ;;  %v4160_v42 = vld [vmem:[%s10335_s24 + $0x168] sm:$0xff] }
 0xe90   : > { %v8284_v47 = vpop.f32.mrb[96].mxu0  ;;  %6375 = vperm.xlu0 %9297, %v6145_v48   ;;  %v6162_v48 = vld [vmem:[%s11962_s1 + $0x1d0] sm:$0xff] }
 0xe91   : > { %6370 = vperm.xlu1 %9298, %v6144_v58   ;;  %v8285_v8 = vpop.f32.mrb[97].mxu0 }
 0xe92   : > { %v11297_v45 = vadd.f32 %v8285_v8, %v8284_v47  ;;  %v8287_v59 = vpop.f32.mrb[98].mxu0  ;;  %v4158_v8 = vld [vmem:[%s10335_s24 + $0x158] sm:$0xff]  ;;  %v11316_v43 = vpop.permute.xlu1 %4261 }
 0xe93   : > { %v8288_v19 = vpop.f32.mrb[99].mxu0  ;;  %11973 = vst [vmem:[#allocation76_spill] sm:$0xff] %v11316_v43  ;;  %v6165_v43 = vld [vmem:[%s11962_s1 + $0x1e8] sm:$0xff] }
 0xe94   : > { %v11300_v6 = vadd.f32 %v8288_v19, %v8287_v59  ;;  %4476 = vperm.xlu0 %9297, %v4174_v46   ;;  %v4157_v19 = vld [vmem:[%s10335_s24 + $0x150] sm:$0xff] }
 0xe95   : > { %4471 = vperm.xlu1 %9298, %v4173_v5   ;;  %v11312_v5 = vpop.permute.xlu0 %4266 }
 0xe96   : > { %11972 = vst [vmem:[#allocation75_spill] sm:$0xff] %v11312_v5 }
 0xe98   : > { %v8290_v58 = vpop.f32.mrb[100].mxu0  ;;  %6465 = vperm.xlu0 %9297, %v6163_v44   ;;  %v6146_v44 = vld [vmem:[%s11962_s1 + $0x150] sm:$0xff] }
 0xe99   : > { %6460 = vperm.xlu1 %9298, %v6162_v48   ;;  %v8291_v47 = vpop.f32.mrb[101].mxu0  ;;  %v11321_v3 = vpop.permute.xlu0 %4276 }
 0xe9a   : > { %v11309_v60 = vadd.f32 %v8291_v47, %v8290_v58  ;;  %v8293_v59 = vpop.f32.mrb[102].mxu0  ;;  %v4176_v47 = vld [vmem:[%s10335_s24 + $0x1e8] sm:$0xff]  ;;  %11974 = vst [vmem:[#allocation77_spill] sm:$0xff] %v11321_v3 }
 0xe9b   : > { %v8294_v46 = vpop.f32.mrb[103].mxu0 }
 0xe9c   : > { %v11314_v41 = vadd.f32 %v8294_v46, %v8293_v59  ;;  %4396 = vperm.xlu0 %9297, %v4158_v8   ;;  %v4175_v46 = vld [vmem:[%s10335_s24 + $0x1e0] sm:$0xff]  ;;  %v11326_v8 = vpop.permute.xlu1 %4271 }
 0xe9d   : > { %4391 = vperm.xlu1 %9298, %v4157_v19   ;;  %11975 = vst [vmem:[#allocation78_spill] sm:$0xff] %v11326_v8 }
 0xea0   : > { %v8296_v48 = vpop.f32.mrb[104].mxu0  ;;  %6385 = vperm.xlu0 %9297, %v6147_v40   ;;  %v6164_v40 = vld [vmem:[%s11962_s1 + $0x1e0] sm:$0xff] }
 0xea1   : > { %6380 = vperm.xlu1 %9298, %v6146_v44   ;;  %v8297_v58 = vpop.f32.mrb[105].mxu0  ;;  %v11332_v44 = vpop.permute.xlu0 %4286 }
 0xea2   : > { %v11323_v39 = vadd.f32 %v8297_v58, %v8296_v48  ;;  %v8299_v59 = vpop.f32.mrb[106].mxu0  ;;  %11976 = vst [vmem:[#allocation79_spill] sm:$0xff] %v11332_v44  ;;  %v11334_v48 = vpop.permute.xlu1 %4281  ;;  %v6149_v44 = vld [vmem:[%s11962_s1 + $0x168] sm:$0xff] }
 0xea3   : > { %v8300_v19 = vpop.f32.mrb[107].mxu0  ;;  %11977 = vst [vmem:[#allocation80_spill] sm:$0xff] %v11334_v48 }
 0xea4   : > { %v11328_v5 = vadd.f32 %v8300_v19, %v8299_v59  ;;  %4486 = vperm.xlu0 %9297, %v4176_v47   ;;  %v4159_v19 = vld [vmem:[%s10335_s24 + $0x160] sm:$0xff] }
 0xea5   : > { %4481 = vperm.xlu1 %9298, %v4175_v46   ;;  %v11343_v38 = vpop.permute.xlu0 %4296 }
 0xea6   : > { %11979 = vst [vmem:[#allocation81_spill] sm:$0xff] %v11343_v38  ;;  %v11346_v48 = vpop.permute.xlu1 %4291 }
 0xea7   : > { %11980 = vst [vmem:[#allocation82_spill] sm:$0xff] %v11346_v48  ;;  %v9835_v48 = vld [vmem:[%s11978_s0] sm:$0xff]  }
 0xea8   : > { %v8302_v3 = vpop.f32.mrb[108].mxu0  ;;  %6475 = vperm.xlu0 %9297, %v6165_v43   ;;  %v6148_v43 = vld [vmem:[%s11962_s1 + $0x160] sm:$0xff]  ;;  %8756 = vmatprep.mubr.bf16.mxu1 %v9835_v48 }
 0xea9   : > { %6470 = vperm.xlu1 %9298, %v6164_v40   ;;  %v8303_v58 = vpop.f32.mrb[109].mxu0 }
 0xeaa   : > { %v11337_v8 = vadd.f32 %v8303_v58, %v8302_v3  ;;  %v8305_v59 = vpop.f32.mrb[110].mxu0  ;;  %v4178_v58 = vld [vmem:[%s10335_s24 + $0x1f8] sm:$0xff]  ;;  %v11357_v37 = vpop.permute.xlu1 %4301 }
 0xeab   : > { %v8306_v47 = vpop.f32.mrb[111].mxu0  ;;  %11982 = vst [vmem:[#allocation84_spill] sm:$0xff] %v11357_v37 }
 0xeac   : > { %v11340_v46 = vadd.f32 %v8306_v47, %v8305_v59  ;;  %4406 = vperm.xlu0 %9297, %v4160_v42   ;;  %v4177_v42 = vld [vmem:[%s10335_s24 + $0x1f0] sm:$0xff]  ;;  %v11352_v47 = vpop.permute.xlu0 %4306 }
 0xead   : > { %4401 = vperm.xlu1 %9298, %v4159_v19   ;;  %11981 = vst [vmem:[#allocation83_spill] sm:$0xff] %v11352_v47 }
 0xeae   : > { %v11365_v36 = vpop.permute.xlu1 %4311 }
 0xeaf   : > { %11984 = vst [vmem:[#allocation86_spill] sm:$0xff] %v11365_v36 }
 0xeb0   : > { %v8308_v40 = vpop.f32.mrb[112].mxu0  ;;  %6395 = vperm.xlu0 %9297, %v6149_v44   ;;  %v6167_v44 = vld [vmem:[%s11962_s1 + $0x1f8] sm:$0xff] }
 0xeb1   : > { %6390 = vperm.xlu1 %9298, %v6148_v43   ;;  %v8309_v3 = vpop.f32.mrb[113].mxu0  ;;  %v6166_v43 = vld [vmem:[%s11962_s1 + $0x1f0] sm:$0xff] }
 0xeb2   : > { %v11349_v1 = vadd.f32 %v8309_v3, %v8308_v40  ;;  %v8311_v59 = vpop.f32.mrb[114].mxu0  ;;  %v4162_v40 = vld [vmem:[%s10335_s24 + $0x178] sm:$0xff]  ;;  %v11362_v3 = vpop.permute.xlu0 %4316 }
 0xeb3   : > { %v8312_v19 = vpop.f32.mrb[115].mxu0  ;;  %11983 = vst [vmem:[#allocation85_spill] sm:$0xff] %v11362_v3  ;;  %v11371_v47 = vpop.permute.xlu1 %4321 }
 0xeb4   : > { %v11354_v38 = vadd.f32 %v8312_v19, %v8311_v59  ;;  %4496 = vperm.xlu0 %9297, %v4178_v58   ;;  %v6151_v59 = vld [vmem:[%s11962_s1 + $0x178] sm:$0xff]  ;;  %v6150_v58 = vld [vmem:[%s11962_s1 + $0x170] sm:$0xff]  ;;  %11986 = vst [vmem:[#allocation88_spill] sm:$0xff] %v11371_v47 }
 0xeb5   : > { %4491 = vperm.xlu1 %9298, %v4177_v42  }
 0xeb6   : > { %v11369_v19 = vpop.permute.xlu0 %4326 }
 0xeb7   : > { %11985 = vst [vmem:[#allocation87_spill] sm:$0xff] %v11369_v19 }
 0xeb8   : > { %6485 = vperm.xlu0 %9297, %v6167_v44   ;;  %v5857_v44 = vadd.f32 %v11257_v4, %v11179_v53  ;;  %v5868_v53 = vadd.f32 %v11274_v2, %v11186_v16 }
 0xeb9   : > { %6480 = vperm.xlu1 %9298, %v6166_v43  }
 0xebc   : > { %4416 = vperm.xlu0 %9297, %v4162_v40   ;;  %v5860_v40 = vadd.f32 %v11260_v0, %v11177_v23 }
 0xebd   : > { %4411 = vperm.xlu1 %9298, %v4161_v51  }
 0xec0   : > { %6405 = vperm.xlu0 %9297, %v6151_v59  }
 0xec1   : > { %6400 = vperm.xlu1 %9298, %v6150_v58   ;;  %v5865_v58 = vadd.f32 %v11269_v56, %v11189_v22 }
 0xeee   : > { %v8330_v42 = vpop.f32.mrb[80].mxu1 }
 0xeef   : > { %v8331_v48 = vpop.f32.mrb[81].mxu1 }
 0xef0   : > { %v8332_v43 = vadd.f32 %v8331_v48, %v8330_v42  ;;  %v8333_v3 = vpop.f32.mrb[82].mxu1 }
 0xef1   : > { %v8334_v37 = vpop.f32.mrb[83].mxu1 }
 0xef2   : > { %v5954_v51 = vadd.f32 %v8332_v43, %v5857_v44  ;;  %v8335_v36 = vadd.f32 %v8334_v37, %v8333_v3  ;;  %v5873_v3 = vadd.f32 %v11283_v50, %v11197_v12 }
 0xef4   : > { %v5957_v52 = vadd.f32 %v8335_v36, %v5860_v40  ;;  %v6016_v35 = vmax.f32 %v5954_v51, 0.0  ;;  %v5881_v40 = vadd.f32 %v11297_v45, %v11205_v10 }
 0xef6   : > { %v6017_v19 = vmax.f32 %v5957_v52, 0.0  ;;  %v8336_v59 = vpop.f32.mrb[84].mxu1 }
 0xef7   : > { %v8337_v24 = vpop.f32.mrb[85].mxu1 }
 0xef8   : > { %v8338_v47 = vadd.f32 %v8337_v24, %v8336_v59  ;;  %v8339_v34 = vpop.f32.mrb[86].mxu1  ;;  %v6096_v13 = vpack.c.bf16 %v6017_v19, %v6016_v35  ;;  %v5876_v19 = vadd.f32 %v11288_v49, %v11194_v62 }
 0xef9   : > { %v8340_v4 = vpop.f32.mrb[87].mxu1 }
 0xefa   : > { %v5962_v42 = vadd.f32 %v8338_v47, %v5865_v58  ;;  %v8341_v48 = vadd.f32 %v8340_v4, %v8339_v34  ;;  %8740 = vmatprep.subr.bf16.mxu1 %v6096_v13  ;;  %v5884_v58 = vadd.f32 %v11300_v6, %v11202_v15 }
 0xefb   : > { %8741 = vmatpush3.bf16.msra.mxu1 %v6096_v13 }
 0xefc   : > { %v5965_v37 = vadd.f32 %v8341_v48, %v5868_v53  ;;  %v6018_v36 = vmax.f32 %v5962_v42, 0.0 }
 0xefe   : > { %v6019_v23 = vmax.f32 %v5965_v37, 0.0  ;;  %v8342_v52 = vpop.f32.mrb[88].mxu1 }
 0xeff   : > { %v8343_v0 = vpop.f32.mrb[89].mxu1 }
 0xf00   : > { %v8344_v56 = vadd.f32 %v8343_v0, %v8342_v52  ;;  %v8345_v22 = vpop.f32.mrb[90].mxu1  ;;  %v6097_v24 = vpack.c.bf16 %v6019_v23, %v6018_v36  ;;  %v5889_v36 = vadd.f32 %v11309_v60, %v11212_v25  ;;  %v5892_v0 = vadd.f32 %v11314_v41, %v11210_v17 }
 0xf01   : > { %v8346_v35 = vpop.f32.mrb[91].mxu1 }
 0xf02   : > { %v5970_v2 = vadd.f32 %v8344_v56, %v5873_v3  ;;  %v8347_v16 = vadd.f32 %v8346_v35, %v8345_v22  ;;  %8742 = vmatprep.subr.bf16.mxu1 %v6097_v24 }
 0xf03   : > { %8743 = vmatpush3.bf16.msra.mxu1 %v6097_v24 }
 0xf04   : > { %v5973_v34 = vadd.f32 %v8347_v16, %v5876_v19  ;;  %v6020_v13 = vmax.f32 %v5970_v2, 0.0  ;;  %v5897_v19 = vadd.f32 %v11323_v39, %v11220_v63 }
 0xf06   : > { %v6021_v47 = vmax.f32 %v5973_v34, 0.0  ;;  %v8348_v44 = vpop.f32.mrb[92].mxu1  ;;  %v5900_v34 = vadd.f32 %v11328_v5, %v11217_v54 }
 0xf07   : > { %v8349_v43 = vpop.f32.mrb[93].mxu1 }
 0xf08   : > { %v8350_v50 = vadd.f32 %v8349_v43, %v8348_v44  ;;  %v8351_v12 = vpop.f32.mrb[94].mxu1  ;;  %v6098_v51 = vpack.c.bf16 %v6021_v47, %v6020_v13 }
 0xf09   : > { %v8352_v59 = vpop.f32.mrb[95].mxu1 }
 0xf0a   : > { %v5978_v49 = vadd.f32 %v8350_v50, %v5881_v40  ;;  %v8353_v62 = vadd.f32 %v8352_v59, %v8351_v12  ;;  %8744 = vmatprep.subr.bf16.mxu1 %v6098_v51  ;;  %v5905_v50 = vadd.f32 %v11337_v8, %v11226_v11  ;;  %v5908_v59 = vadd.f32 %v11340_v46, %v11224_v7 }
 0xf0b   : > { %8745 = vmatpush3.bf16.msra.mxu1 %v6098_v51  ;;  %v5913_v11 = vadd.f32 %v11349_v1, %v11234_v18  ;;  %v5916_v7 = vadd.f32 %v11354_v38, %v11231_v14  ;;  %v9836_v1 = vld [vmem:[%s11978_s0 + $0x8] sm:$0xff]   ;;  %v9838_v38 = vld [vmem:[%s11978_s0 + $0x18] sm:$0xff]   ;;  %v9839_v14 = vld [vmem:[%s11978_s0 + $0x20] sm:$0xff]  }
 0xf0c   : > { %v5981_v4 = vadd.f32 %v8353_v62, %v5884_v58  ;;  %v6022_v53 = vmax.f32 %v5978_v49, 0.0 }
 0xf0e   : > { %v6023_v42 = vmax.f32 %v5981_v4, 0.0  ;;  %v8354_v48 = vpop.f32.mrb[96].mxu1 }
 0xf0f   : > { %v8355_v37 = vpop.f32.mrb[97].mxu1 }
 0xf10   : > { %v8356_v45 = vadd.f32 %v8355_v37, %v8354_v48  ;;  %v8357_v10 = vpop.f32.mrb[98].mxu1  ;;  %v6099_v23 = vpack.c.bf16 %v6023_v42, %v6022_v53 }
 0xf11   : > { %v8358_v52 = vpop.f32.mrb[99].mxu1 }
 0xf12   : > { %v5986_v15 = vadd.f32 %v8356_v45, %v5889_v36  ;;  %v8359_v6 = vadd.f32 %v8358_v52, %v8357_v10  ;;  %8746 = vmatprep.subr.bf16.mxu1 %v6099_v23  ;;  %v9837_v52 = vld [vmem:[%s11978_s0 + $0x10] sm:$0xff]  }
 0xf13   : > { %8747 = vmatpush3.bf16.msra.mxu1 %v6099_v23 }
 0xf14   : > { %v5989_v3 = vadd.f32 %v8359_v6, %v5892_v0  ;;  %v6024_v56 = vmax.f32 %v5986_v15, 0.0  ;;  %v9840_v0 = vld [vmem:[%s11978_s0 + $0x28] sm:$0xff]   ;;  %v9841_v15 = vld [vmem:[%s11978_s0 + $0x30] sm:$0xff]   ;;  %v9842_v6 = vld [vmem:[%s11978_s0 + $0x38] sm:$0xff]  }
 0xf16   : > { %v6025_v22 = vmax.f32 %v5989_v3, 0.0  ;;  %v8360_v24 = vpop.f32.mrb[100].mxu1  ;;  %v9843_v3 = vld [vmem:[%s11978_s0 + $0x40] sm:$0xff]  }
 0xf17   : > { %v8361_v35 = vpop.f32.mrb[101].mxu1 }
 0xf18   : > { %v8362_v25 = vadd.f32 %v8361_v35, %v8360_v24  ;;  %v8363_v60 = vpop.f32.mrb[102].mxu1  ;;  %v6100_v2 = vpack.c.bf16 %v6025_v22, %v6024_v56  ;;  %v9844_v56 = vld [vmem:[%s11978_s0 + $0x48] sm:$0xff]   ;;  %v9845_v22 = vld [vmem:[%s11978_s0 + $0x50] sm:$0xff]   ;;  %v9846_v24 = vld [vmem:[%s11978_s0 + $0x58] sm:$0xff]  }
 0xf19   : > { %v8364_v16 = vpop.f32.mrb[103].mxu1  ;;  %v9847_v35 = vld [vmem:[%s11978_s0 + $0x60] sm:$0xff]  }
 0xf1a   : > { %v5994_v41 = vadd.f32 %v8362_v25, %v5897_v19  ;;  %v8365_v17 = vadd.f32 %v8364_v16, %v8363_v60  ;;  %8748 = vmatprep.subr.bf16.mxu1 %v6100_v2  ;;  %v9848_v19 = vld [vmem:[%s11978_s0 + $0x68] sm:$0xff]   ;;  %v9849_v25 = vld [vmem:[%s11978_s0 + $0x70] sm:$0xff]   ;;  %v11419_v60 = vpop.permute.xlu1 %4331  ;;  %v9850_v16 = vld [vmem:[%s11978_s0 + $0x78] sm:$0xff]  }
 0xf1b   : > { %8749 = vmatpush3.bf16.msra.mxu1 %v6100_v2  ;;  %v11421_v2 = vpop.permute.xlu0 %4336 }
 0xf1c   : > { %v5997_v13 = vadd.f32 %v8365_v17, %v5900_v34  ;;  %v6026_v47 = vmax.f32 %v5994_v41, 0.0  ;;  %v9851_v41 = vld [vmem:[%s11978_s0 + $0x80] sm:$0xff]  }
 0xf1e   : > { %v6027_v44 = vmax.f32 %v5997_v13, 0.0  ;;  %v8366_v43 = vpop.f32.mrb[104].mxu1  ;;  %v11424_v34 = vpop.permute.xlu1 %4341 }
 0xf1f   : > { %v8367_v40 = vpop.f32.mrb[105].mxu1  ;;  %v11427_v17 = vpop.permute.xlu0 %4346 }
 0xf20   : > { %v8368_v39 = vadd.f32 %v8367_v40, %v8366_v43  ;;  %v8369_v63 = vpop.f32.mrb[106].mxu1  ;;  %v6101_v12 = vpack.c.bf16 %v6027_v44, %v6026_v47  ;;  %11987 = vst [vmem:[#allocation89_spill] sm:$0xff] %v11427_v17  ;;  %v9852_v47 = vld [vmem:[%s11978_s0 + $0x88] sm:$0xff]   ;;  %v9853_v43 = vld [vmem:[%s11978_s0 + $0x90] sm:$0xff]  }
 0xf21   : > { %v8370_v51 = vpop.f32.mrb[107].mxu1 }
 0xf22   : > { %v6002_v54 = vadd.f32 %v8368_v39, %v5905_v50  ;;  %v8371_v5 = vadd.f32 %v8370_v51, %v8369_v63  ;;  %8750 = vmatprep.subr.bf16.mxu1 %v6101_v12  ;;  %v11429_v13 = vpop.permute.xlu1 %4351  ;;  %v9854_v39 = vld [vmem:[%s11978_s0 + $0x98] sm:$0xff]   ;;  %v9855_v63 = vld [vmem:[%s11978_s0 + $0xa0] sm:$0xff]  }
 0xf23   : > { %8751 = vmatpush3.bf16.msra.mxu1 %v6101_v12  ;;  %v11432_v44 = vpop.permute.xlu0 %4356 }
 0xf24   : > { %v6005_v58 = vadd.f32 %v8371_v5, %v5908_v59  ;;  %v6028_v49 = vmax.f32 %v6002_v54, 0.0  ;;  %v9856_v59 = vld [vmem:[%s11978_s0 + $0xa8] sm:$0xff]   ;;  %v9857_v5 = vld [vmem:[%s11978_s0 + $0xb0] sm:$0xff]  }
 0xf26   : > { %v6029_v62 = vmax.f32 %v6005_v58, 0.0  ;;  %v8372_v4 = vpop.f32.mrb[108].mxu1  ;;  %v11435_v40 = vpop.permute.xlu1 %4361 }
 0xf27   : > { %v8373_v53 = vpop.f32.mrb[109].mxu1  ;;  %11988 = vst [vmem:[#allocation90_spill] sm:$0xff] %v11435_v40  ;;  %v11437_v50 = vpop.permute.xlu0 %4366 }
 0xf28   : > { %v8374_v8 = vadd.f32 %v8373_v53, %v8372_v4  ;;  %v8375_v42 = vpop.f32.mrb[110].mxu1  ;;  %v6102_v48 = vpack.c.bf16 %v6029_v62, %v6028_v49  ;;  %11989 = vst [vmem:[#allocation91_spill] sm:$0xff] %v11437_v50  ;;  %v9858_v62 = vld [vmem:[%s11978_s0 + $0xb8] sm:$0xff]   ;;  %v9859_v53 = vld [vmem:[%s11978_s0 + $0xc0] sm:$0xff]  }
 0xf29   : > { %v8376_v37 = vpop.f32.mrb[111].mxu1 }
 0xf2a   : > { %v6010_v46 = vadd.f32 %v8374_v8, %v5913_v11  ;;  %v8377_v36 = vadd.f32 %v8376_v37, %v8375_v42  ;;  %8752 = vmatprep.subr.bf16.mxu1 %v6102_v48  ;;  %v11441_v12 = vpop.permute.xlu1 %4371  ;;  %v9860_v42 = vld [vmem:[%s11978_s0 + $0xc8] sm:$0xff]  }
 0xf2b   : > { %8753 = vmatpush3.bf16.msra.mxu1 %v6102_v48  ;;  %11990 = vst [vmem:[#allocation92_spill] sm:$0xff] %v11441_v12  ;;  %v11443_v51 = vpop.permute.xlu0 %4376  ;;  %v9861_v48 = vld [vmem:[%s11978_s0 + $0xd0] sm:$0xff]  }
 0xf2c   : > { %v6013_v45 = vadd.f32 %v8377_v36, %v5916_v7  ;;  %v6030_v10 = vmax.f32 %v6010_v46, 0.0  ;;  %11991 = vst [vmem:[#allocation93_spill] sm:$0xff] %v11443_v51  ;;  %v9862_v46 = vld [vmem:[%s11978_s0 + $0xd8] sm:$0xff]  }
 0xf2e   : > { %v6031_v23 = vmax.f32 %v6013_v45, 0.0  ;;  %v11446_v54 = vpop.permute.xlu1 %4381  ;;  %v9863_v45 = vld [vmem:[%s11978_s0 + $0xe0] sm:$0xff]  }
 0xf2f   : > { %11992 = vst [vmem:[#allocation94_spill] sm:$0xff] %v11446_v54  ;;  %v11449_v58 = vpop.permute.xlu0 %6250 }
 0xf30   : > { %v6103_v18 = vpack.c.bf16 %v6031_v23, %v6030_v10 }
 0xf32   : > { %8754 = vmatprep.subr.bf16.mxu1 %v6103_v18  ;;  %v11451_v49 = vpop.permute.xlu1 %6255 }
 0xf33   : > { %8755 = vmatpush3.bf16.msra.mxu1 %v6103_v18  ;;  %v11454_v4 = vpop.permute.xlu0 %6170  ;;  %v9864_v18 = vld [vmem:[%s11978_s0 + $0xe8] sm:$0xff]  }
 0xf36   : > { %8757 = vmatmul.mubr.bf16.vlgmr.msra.gmra.mrb[112].mxu1 %v9836_v1  ;;  %v11457_v11 = vpop.permute.xlu1 %6175 }
 0xf37   : > { %8760 = vmatprep.mubr.bf16.mxu1 %v9837_v52  ;;  %v11459_v8 = vpop.permute.xlu0 %6260  ;;  %v9865_v52 = vld [vmem:[%s11978_s0 + $0xf0] sm:$0xff]  }
 0xf3a   : > { %v11463_v37 = vpop.permute.xlu1 %6265 }
 0xf3b   : > { %v6181_v7 = vpop.permute.xlu0 %6180 }
 0xf3e   : > { %8761 = vmatmul.mubr.bf16.gmra.mrb[116].mxu1 %v9838_v38  ;;  %v6186_v36 = vpop.permute.xlu1 %6185 }
 0xf3f   : > { %8764 = vmatprep.mubr.bf16.mxu1 %v9839_v14  ;;  %v11467_v10 = vpop.permute.xlu0 %6270 }
 0xf42   : > { %v11469_v23 = vpop.permute.xlu1 %6275 }
 0xf43   : > { %v11472_v1 = vpop.permute.xlu0 %6190 }
 0xf46   : > { %8765 = vmatmul.mubr.bf16.gmra.mrb[120].mxu1 %v9840_v0  ;;  %v11475_v38 = vpop.permute.xlu1 %6195  ;;  %v9866_v0 = vld [vmem:[%s11978_s0 + $0xf8] sm:$0xff]   ;;  %s8129_s0 = sshll.u32 %s12076_s11, 4 }
 0xf47   : > { %8768 = vmatprep.mubr.bf16.mxu1 %v9841_v15  ;;  %v11477_v14 = vpop.permute.xlu0 %6280  ;;  %s1125_s1 = scalar_lea.vmem %s10350_s20, %s8129_s0 }
 0xf4a   : > { %v11480_v15 = vpop.permute.xlu1 %6285 }
 0xf4e   : > { %8769 = vmatmul.mubr.bf16.gmra.mrb[124].mxu1 %v9842_v6  ;;  %v6201_v6 = vpop.permute.xlu0 %6200 }
 0xf4f   : > { %8772 = vmatprep.mubr.bf16.mxu1 %v9843_v3  ;;  %v11482_v3 = vpop.permute.xlu1 %6205 }
 0xf56   : > { %8773 = vmatmul.mubr.bf16.gmra.mrb[128].mxu1 %v9844_v56  ;;  %v11484_v56 = vpop.permute.xlu0 %6290 }
 0xf57   : > { %8776 = vmatprep.mubr.bf16.mxu1 %v9845_v22  ;;  %v11486_v22 = vpop.permute.xlu1 %6295 }
 0xf5e   : > { %8777 = vmatmul.mubr.bf16.gmra.mrb[132].mxu1 %v9846_v24  ;;  %v11488_v24 = vpop.permute.xlu0 %6210 }
 0xf5f   : > { %8780 = vmatprep.mubr.bf16.mxu1 %v9847_v35  ;;  %v11490_v35 = vpop.permute.xlu1 %6215 }
 0xf66   : > { %8781 = vmatmul.mubr.bf16.gmra.mrb[136].mxu1 %v9848_v19  ;;  %v11492_v19 = vpop.permute.xlu0 %6300 }
 0xf67   : > { %8784 = vmatprep.mubr.bf16.mxu1 %v9849_v25  ;;  %v11494_v25 = vpop.permute.xlu1 %6305 }
 0xf6e   : > { %8785 = vmatmul.mubr.bf16.gmra.mrb[140].mxu1 %v9850_v16  ;;  %v11496_v16 = vpop.permute.xlu0 %6220 }
 0xf6f   : > { %8788 = vmatprep.mubr.bf16.mxu1 %v9851_v41  ;;  %v11498_v41 = vpop.permute.xlu1 %6225 }
 0xf76   : > { %8789 = vmatmul.mubr.bf16.gmra.mrb[144].mxu1 %v9852_v47  ;;  %v11500_v47 = vpop.permute.xlu0 %6310 }
 0xf77   : > { %8792 = vmatprep.mubr.bf16.mxu1 %v9853_v43  ;;  %v11502_v43 = vpop.permute.xlu1 %6315 }
 0xf7e   : > { %8793 = vmatmul.mubr.bf16.gmra.mrb[52].mxu1 %v9854_v39  ;;  %v11504_v39 = vpop.permute.xlu0 %6230 }
 0xf7f   : > { %8796 = vmatprep.mubr.bf16.mxu1 %v9855_v63  ;;  %v11506_v63 = vpop.permute.xlu1 %6235 }
 0xf86   : > { %8797 = vmatmul.mubr.bf16.gmra.mrb[56].mxu1 %v9856_v59  ;;  %v11508_v59 = vpop.permute.xlu0 %6320 }
 0xf87   : > { %8800 = vmatprep.mubr.bf16.mxu1 %v9857_v5  ;;  %v11510_v5 = vpop.permute.xlu1 %6325 }
 0xf8e   : > { %8801 = vmatmul.mubr.bf16.gmra.mrb[60].mxu1 %v9858_v62  ;;  %v11512_v62 = vpop.permute.xlu0 %6240 }
 0xf8f   : > { %8804 = vmatprep.mubr.bf16.mxu1 %v9859_v53  ;;  %v11514_v53 = vpop.permute.xlu1 %6245 }
 0xf96   : > { %8805 = vmatmul.mubr.bf16.gmra.mrb[64].mxu1 %v9860_v42  ;;  %v11516_v42 = vpop.permute.xlu0 %4421 }
 0xf97   : > { %8808 = vmatprep.mubr.bf16.mxu1 %v9861_v48  ;;  %11993 = vst [vmem:[#allocation95_spill] sm:$0xff] %v11516_v42  ;;  %v11518_v48 = vpop.permute.xlu1 %4426  ;;  %v4737_v42 = vadd.f32 %v10948_v29, %v11245_v9 }
 0xf98   : > { %11994 = vst [vmem:[#allocation96_spill] sm:$0xff] %v11518_v48  ;;  %v4734_v48 = vadd.f32 %v10944_v27, %v11248_v21 }
 0xf9e   : > { %8809 = vmatmul.mubr.bf16.gmra.mrb[68].mxu1 %v9862_v46  ;;  %v11520_v46 = vpop.permute.xlu0 %6410 }
 0xf9f   : > { %8812 = vmatprep.mubr.bf16.mxu1 %v9863_v45  ;;  %11995 = vst [vmem:[#allocation97_spill] sm:$0xff] %v11520_v46  ;;  %v11522_v45 = vpop.permute.xlu1 %6415 }
 0xfa0   : > { %11996 = vst [vmem:[#allocation98_spill] sm:$0xff] %v11522_v45  ;;  %v4726_v45 = vadd.f32 %v10946_v28, %v11240_v55 }
 0xfa6   : > { %8813 = vmatmul.mubr.bf16.gmra.mrb[72].mxu1 %v9864_v18  ;;  %v11524_v18 = vpop.permute.xlu0 %6330 }
 0xfa7   : > { %8816 = vmatprep.mubr.bf16.mxu1 %v9865_v52  ;;  %11997 = vst [vmem:[#allocation99_spill] sm:$0xff] %v11524_v18  ;;  %v11526_v52 = vpop.permute.xlu1 %6335 }
 0xfa8   : > { %11998 = vst [vmem:[#allocation100_spill] sm:$0xff] %v11526_v52  ;;  %v8947_v52 = vadd.f32 %v6186_v36, %v4737_v42  ;;  %v12005_v42 = vld [vmem:[#allocation66_spill] sm:$0xff] }
 0xfab   : > { %v11530_v54 = vpop.permute.xlu1 %4436 }
 0xfac   : > { %12000 = vst [vmem:[#allocation102_spill] sm:$0xff] %v11530_v54  ;;  %v4729_v54 = vadd.f32 %v10950_v30, %v11238_v26  ;;  %v4750_v30 = vadd.f32 %v10952_v31, %v11266_v57 }
 0xfae   : > { %8817 = vmatmul.mubr.bf16.gmra.mrb[76].mxu1 %v9866_v0  ;;  %v11528_v0 = vpop.permute.xlu0 %4431  ;;  %v8950_v21 = vadd.f32 %v11457_v11, %v4729_v54  ;;  %v8953_v54 = vadd.f32 %v6201_v6, %v4750_v30 }
 0xfaf   : > { %11999 = vst [vmem:[#allocation101_spill] sm:$0xff] %v11528_v0  ;;  %v11534_v51 = vpop.permute.xlu1 %6425  ;;  %v8941_v0 = vadd.f32 %v6181_v7, %v4734_v48  ;;  %v12006_v48 = vld [vmem:[#allocation37_spill] sm:$0xff] }
 0xfb0   : > { %12002 = vst [vmem:[#allocation104_spill] sm:$0xff] %v11534_v51  ;;  %v4745_v31 = vadd.f32 %v12006_v48, %v12005_v42 }
 0xfb2   : > { %v11532_v50 = vpop.permute.xlu0 %6420 }
 0xfb3   : > { %12001 = vst [vmem:[#allocation103_spill] sm:$0xff] %v11532_v50  ;;  %v11542_v46 = vpop.permute.xlu1 %6345  ;;  %v8944_v50 = vadd.f32 %v11454_v4, %v4726_v45 }
 0xfb4   : > { %12004 = vst [vmem:[#allocation106_spill] sm:$0xff] %v11542_v46 }
 0xfb6   : > { %v11536_v40 = vpop.permute.xlu0 %6340 }
 0xfb7   : > { %12003 = vst [vmem:[#allocation105_spill] sm:$0xff] %v11536_v40  ;;  %v11552_v29 = vpop.permute.xlu1 %4446 }
 0xfba   : > { %v11549_v51 = vpop.permute.xlu0 %4441 }
 0xfbe   : > { %v11559_v36 = vpop.permute.xlu0 %6430 }
0x1009   : > { %v8758_v12 = vpop.f32.mrb[112].mxu1 }
0x100a   : > { %v8942_v18 = vadd.f32 %v8941_v0, %v8758_v12  ;;  %v6714_v27 = vpop.f32.mrb[113].mxu1  ;;  %v4742_v12 = vadd.f32 %v10954_v32, %v11254_v61 }
0x100b   : > { %v8945_v28 = vadd.f32 %v8944_v50, %v6714_v27  ;;  %v8759_v55 = vpop.f32.mrb[114].mxu1  ;;  %v4753_v50 = vadd.f32 %v10956_v33, %v11263_v20  ;;  %v11570_v33 = vpop.permute.xlu1 %6435 }
0x100c   : > { %v7035_v46 = vmax.f32 %v8942_v18, 0.0  ;;  %v8948_v17 = vadd.f32 %v8947_v52, %v8759_v55  ;;  %v6717_v40 = vpop.f32.mrb[115].mxu1  ;;  %v8956_v57 = vadd.f32 %v11472_v1, %v4742_v12  ;;  %v8962_v18 = vadd.f32 %v11475_v38, %v4745_v31  ;;  %v12008_v55 = vld [vmem:[#allocation38_spill] sm:$0xff]  ;;  %v12013_v31 = vld [vmem:[#allocation67_spill] sm:$0xff] }
0x100d   : > { %v8951_v9 = vadd.f32 %v8950_v21, %v6717_v40  ;;  %v7033_v26 = vmax.f32 %v8945_v28, 0.0  ;;  %v11573_v21 = vpop.permute.xlu0 %6350 }
0x100e   : > { %v7036_v4 = vmax.f32 %v8948_v17, 0.0  ;;  %v7103_v7 = vsel %vm2544_vm0, %v7035_v46, 0.0  ;;  %v8959_v46 = vadd.f32 %v11482_v3, %v4753_v50  ;;  %v12007_v3 = vld [vmem:[#allocation70_spill] sm:$0xff]  ;;  %v12011_v50 = vld [vmem:[#allocation69_spill] sm:$0xff] }
0x100f   : > { %7104 = vadd.xlane.f32.xlu0 %v7103_v7  ;;  %v7034_v11 = vmax.f32 %v8951_v9, 0.0  ;;  %v7097_v45 = vsel %vm2544_vm0, %v7033_v26, 0.0  ;;  %v4766_v9 = vadd.f32 %v12008_v55, %v12007_v3  ;;  %v12010_v7 = vld [vmem:[#allocation39_spill] sm:$0xff] }
0x1010   : > { %v7106_v40 = vsel %vm2544_vm0, %v7036_v4, 0.0  ;;  %v12009_v4 = vld [vmem:[#allocation68_spill] sm:$0xff] }
0x1011   : > { %7107 = vadd.xlane.f32.xlu1 %v7106_v40  ;;  %v8762_v17 = vpop.f32.mrb[116].mxu1  ;;  %v7100_v1 = vsel %vm2544_vm0, %v7034_v11, 0.0  ;;  %v4758_v12 = vadd.f32 %v12010_v7, %v12009_v4  ;;  %v8965_v11 = vadd.f32 %v11496_v16, %v4766_v9  ;;  %v12015_v9 = vld [vmem:[#allocation74_spill] sm:$0xff]  ;;  %v12018_v7 = vld [vmem:[#allocation43_spill] sm:$0xff] }
0x1012   : > { %v8954_v32 = vadd.f32 %v8953_v54, %v8762_v17  ;;  %v6730_v61 = vpop.f32.mrb[117].mxu1  ;;  %v12012_v54 = vld [vmem:[#allocation40_spill] sm:$0xff] }
0x1013   : > { %v8957_v20 = vadd.f32 %v8956_v57, %v6730_v61  ;;  %7098 = vadd.xlane.f32.xlu0 %v7097_v45  ;;  %v8763_v6 = vpop.f32.mrb[118].mxu1  ;;  %v4769_v40 = vadd.f32 %v12012_v54, %v12011_v50  ;;  %v12014_v57 = vld [vmem:[#allocation41_spill] sm:$0xff] }
0x1014   : > { %v7039_v52 = vmax.f32 %v8954_v32, 0.0  ;;  %v8960_v0 = vadd.f32 %v8959_v46, %v8763_v6  ;;  %v6733_v27 = vpop.f32.mrb[119].mxu1  ;;  %v4761_v17 = vadd.f32 %v12014_v57, %v12013_v31  ;;  %v8968_v46 = vadd.f32 %v11488_v24, %v4758_v12  ;;  %v11587_v32 = vpop.permute.xlu1 %6355  ;;  %v12019_v54 = vld [vmem:[#allocation73_spill] sm:$0xff]  ;;  %v12021_v57 = vld [vmem:[#allocation71_spill] sm:$0xff] }
0x1015   : > { %v8963_v28 = vadd.f32 %v8962_v18, %v6733_v27  ;;  %7101 = vadd.xlane.f32.xlu1 %v7100_v1  ;;  %v7037_v30 = vmax.f32 %v8957_v20, 0.0  ;;  %v8971_v45 = vadd.f32 %v11498_v41, %v4769_v40  ;;  %v12016_v41 = vld [vmem:[#allocation42_spill] sm:$0xff]  ;;  %v12020_v40 = vld [vmem:[#allocation44_spill] sm:$0xff] }
0x1016   : > { %v7040_v26 = vmax.f32 %v8960_v0, 0.0  ;;  %v7115_v38 = vsel %vm2544_vm0, %v7039_v52, 0.0  ;;  %v8974_v16 = vadd.f32 %v11490_v35, %v4761_v17  ;;  %v11592_v52 = vpop.permute.xlu0 %4451  ;;  %v12017_v35 = vld [vmem:[#allocation72_spill] sm:$0xff]  ;;  %v12022_v17 = vld [vmem:[#allocation45_spill] sm:$0xff] }
0x1017   : > { %7116 = vadd.xlane.f32.xlu0 %v7115_v38  ;;  %v7038_v42 = vmax.f32 %v8963_v28, 0.0  ;;  %v7109_v6 = vsel %vm2544_vm0, %v7037_v30, 0.0  ;;  %v4774_v12 = vadd.f32 %v12018_v7, %v12017_v35  ;;  %v12026_v35 = vld [vmem:[#allocation47_spill] sm:$0xff] }
0x1018   : > { %v7118_v48 = vsel %vm2544_vm0, %v7040_v26, 0.0  ;;  %v4782_v26 = vadd.f32 %v12016_v41, %v12015_v9  ;;  %v11600_v50 = vpop.permute.xlu1 %4456  ;;  %v12023_v41 = vld [vmem:[#allocation78_spill] sm:$0xff] }
0x1019   : > { %7119 = vadd.xlane.f32.xlu1 %v7118_v48  ;;  %v8766_v61 = vpop.f32.mrb[120].mxu1  ;;  %v7112_v3 = vsel %vm2544_vm0, %v7038_v42, 0.0 }
0x101a   : > { %v8966_v18 = vadd.f32 %v8965_v11, %v8766_v61  ;;  %v6746_v20 = vpop.f32.mrb[121].mxu1  ;;  %v4785_v11 = vadd.f32 %v12020_v40, %v12019_v54  ;;  %v8977_v42 = vadd.f32 %v11512_v62, %v4782_v26  ;;  %v8980_v61 = vadd.f32 %v11504_v39, %v4774_v12  ;;  %v12027_v54 = vld [vmem:[#allocation77_spill] sm:$0xff]  ;;  %v12028_v40 = vld [vmem:[#allocation48_spill] sm:$0xff] }
0x101b   : > { %v8969_v0 = vadd.f32 %v8968_v46, %v6746_v20  ;;  %7110 = vadd.xlane.f32.xlu0 %v7109_v6  ;;  %v8767_v27 = vpop.f32.mrb[122].mxu1  ;;  %v4777_v46 = vadd.f32 %v12022_v17, %v12021_v57  ;;  %v12029_v57 = vld [vmem:[#allocation75_spill] sm:$0xff]  ;;  %v12030_v17 = vld [vmem:[#allocation49_spill] sm:$0xff] }
0x101c   : > { %v7043_v1 = vmax.f32 %v8966_v18, 0.0  ;;  %v8972_v28 = vadd.f32 %v8971_v45, %v8767_v27  ;;  %v6749_v24 = vpop.f32.mrb[123].mxu1  ;;  %v11609_v45 = vpop.permute.xlu0 %6440  ;;  %v8983_v20 = vadd.f32 %v11514_v53, %v4785_v11  ;;  %v12024_v53 = vld [vmem:[#allocation46_spill] sm:$0xff]  ;;  %v4801_v11 = vadd.f32 %v12028_v40, %v12027_v54  ;;  %v12036_v54 = vld [vmem:[#allocation52_spill] sm:$0xff] }
0x101d   : > { %v8975_v55 = vadd.f32 %v8974_v16, %v6749_v24  ;;  %7113 = vadd.xlane.f32.xlu1 %v7112_v3  ;;  %v7041_v38 = vmax.f32 %v8969_v0, 0.0  ;;  %v8986_v62 = vadd.f32 %v11506_v63, %v4777_v46  ;;  %v4798_v26 = vadd.f32 %v12024_v53, %v12023_v41  ;;  %v12025_v63 = vld [vmem:[#allocation76_spill] sm:$0xff]  ;;  %v12031_v41 = vld [vmem:[#allocation82_spill] sm:$0xff] }
0x101e   : > { %v7044_v4 = vmax.f32 %v8972_v28, 0.0  ;;  %v7127_v30 = vsel %vm2544_vm0, %v7043_v1, 0.0  ;;  %v4790_v7 = vadd.f32 %v12026_v35, %v12025_v63  ;;  %v4793_v46 = vadd.f32 %v12030_v17, %v12029_v57  ;;  %v12032_v53 = vld [vmem:[#allocation50_spill] sm:$0xff] }
0x101f   : > { %7128 = vadd.xlane.f32.xlu0 %v7127_v30  ;;  %v7042_v48 = vmax.f32 %v8975_v55, 0.0  ;;  %v7121_v0 = vsel %vm2544_vm0, %v7041_v38, 0.0  ;;  %v11615_v55 = vpop.permute.xlu1 %6445 }
0x1020   : > { %v7130_v31 = vsel %vm2544_vm0, %v7044_v4, 0.0  ;;  %v11622_v12 = vpop.permute.xlu0 %6360 }
0x1021   : > { %7131 = vadd.xlane.f32.xlu1 %v7130_v31  ;;  %v8770_v18 = vpop.f32.mrb[124].mxu1  ;;  %v7124_v39 = vsel %vm2544_vm0, %v7042_v48, 0.0 }
0x1022   : > { %v8978_v6 = vadd.f32 %v8977_v42, %v8770_v18  ;;  %v6762_v16 = vpop.f32.mrb[125].mxu1  ;;  %v8989_v42 = vadd.f32 %v11459_v8, %v4798_v26  ;;  %v4814_v26 = vadd.f32 %v12032_v53, %v12031_v41 }
0x1023   : > { %v8981_v27 = vadd.f32 %v8980_v61, %v6762_v16  ;;  %7122 = vadd.xlane.f32.xlu0 %v7121_v0  ;;  %v8771_v1 = vpop.f32.mrb[126].mxu1  ;;  %v8992_v61 = vadd.f32 %v11449_v58, %v4790_v7  ;;  %v12035_v7 = vld [vmem:[#allocation81_spill] sm:$0xff] }
0x1024   : > { %v7047_v28 = vmax.f32 %v8978_v6, 0.0  ;;  %v8984_v24 = vadd.f32 %v8983_v20, %v8771_v1  ;;  %v6765_v3 = vpop.f32.mrb[127].mxu1  ;;  %v8995_v20 = vadd.f32 %v11463_v37, %v4801_v11  ;;  %v4817_v40 = vadd.f32 %v12036_v54, %v12035_v7 }
0x1025   : > { %v8987_v9 = vadd.f32 %v8986_v62, %v6765_v3  ;;  %7125 = vadd.xlane.f32.xlu1 %v7124_v39  ;;  %v7045_v4 = vmax.f32 %v8981_v27, 0.0  ;;  %v8998_v62 = vadd.f32 %v11451_v49, %v4793_v46  ;;  %v11634_v27 = vpop.permute.xlu1 %6365  ;;  %v11637_v39 = vpop.permute.xlu0 %4461  ;;  %v9001_v11 = vadd.f32 %v11477_v14, %v4814_v26  ;;  %v12042_v26 = vld [vmem:[#allocation55_spill] sm:$0xff] }
0x1026   : > { %v7048_v30 = vmax.f32 %v8984_v24, 0.0  ;;  %v7139_v38 = vsel %vm2544_vm0, %v7047_v28, 0.0 }
0x1027   : > { %7140 = vadd.xlane.f32.xlu0 %v7139_v38  ;;  %v7046_v48 = vmax.f32 %v8987_v9, 0.0  ;;  %v7133_v0 = vsel %vm2544_vm0, %v7045_v4, 0.0  ;;  %v12033_v4 = vld [vmem:[#allocation80_spill] sm:$0xff] }
0x1028   : > { %v7142_v31 = vsel %vm2544_vm0, %v7048_v30, 0.0  ;;  %v12034_v30 = vld [vmem:[#allocation51_spill] sm:$0xff] }
0x1029   : > { %7143 = vadd.xlane.f32.xlu1 %v7142_v31  ;;  %v8774_v18 = vpop.f32.mrb[128].mxu1  ;;  %v7136_v58 = vsel %vm2544_vm0, %v7046_v48, 0.0  ;;  %v4806_v38 = vadd.f32 %v12034_v30, %v12033_v4  ;;  %v12037_v48 = vld [vmem:[#allocation79_spill] sm:$0xff]  ;;  %v12038_v31 = vld [vmem:[#allocation53_spill] sm:$0xff]  ;;  %v11651_v46 = vpop.permute.xlu1 %4466 }
0x102a   : > { %v8990_v6 = vadd.f32 %v8989_v42, %v8774_v18  ;;  %v6778_v16 = vpop.f32.mrb[129].mxu1  ;;  %v4809_v57 = vadd.f32 %v12038_v31, %v12037_v48  ;;  %v12043_v30 = vld [vmem:[#allocation85_spill] sm:$0xff] }
0x102b   : > { %v8993_v8 = vadd.f32 %v8992_v61, %v6778_v16  ;;  %7134 = vadd.xlane.f32.xlu0 %v7133_v0  ;;  %v8775_v1 = vpop.f32.mrb[130].mxu1  ;;  %v9004_v17 = vadd.f32 %v11467_v10, %v4806_v38  ;;  %v12044_v38 = vld [vmem:[#allocation56_spill] sm:$0xff] }
0x102c   : > { %v7051_v28 = vmax.f32 %v8990_v6, 0.0  ;;  %v8996_v24 = vadd.f32 %v8995_v20, %v8775_v1  ;;  %v6781_v3 = vpop.f32.mrb[131].mxu1  ;;  %v9007_v20 = vadd.f32 %v11480_v15, %v4817_v40  ;;  %v9010_v0 = vadd.f32 %v11469_v23, %v4809_v57  ;;  %v12041_v23 = vld [vmem:[#allocation84_spill] sm:$0xff]  ;;  %v12045_v40 = vld [vmem:[#allocation83_spill] sm:$0xff] }
0x102d   : > { %v7049_v9 = vmax.f32 %v8993_v8, 0.0  ;;  %v8999_v37 = vadd.f32 %v8998_v62, %v6781_v3  ;;  %7137 = vadd.xlane.f32.xlu1 %v7136_v58  ;;  %v11656_v62 = vpop.permute.xlu0 %6450  ;;  %v12039_v58 = vld [vmem:[#allocation86_spill] sm:$0xff]  ;;  %v11664_v4 = vpop.permute.xlu1 %6455 }
0x102e   : > { %v7151_v49 = vsel %vm2544_vm0, %v7051_v28, 0.0  ;;  %v7052_v42 = vmax.f32 %v8996_v24, 0.0 }
0x102f   : > { %v7050_v63 = vmax.f32 %v8999_v37, 0.0  ;;  %7152 = vadd.xlane.f32.xlu0 %v7151_v49  ;;  %v7145_v35 = vsel %vm2544_vm0, %v7049_v9, 0.0  ;;  %v12040_v9 = vld [vmem:[#allocation54_spill] sm:$0xff]  ;;  %v4822_v49 = vadd.f32 %v12042_v26, %v12041_v23 }
0x1030   : > { %v7154_v24 = vsel %vm2544_vm0, %v7052_v42, 0.0  ;;  %v4830_v37 = vadd.f32 %v12040_v9, %v12039_v58  ;;  %v12049_v9 = vld [vmem:[#allocation59_spill] sm:$0xff] }
0x1031   : > { %7146 = vadd.xlane.f32.xlu1 %v7145_v35  ;;  %v8778_v61 = vpop.f32.mrb[132].mxu1  ;;  %v7148_v18 = vsel %vm2544_vm0, %v7050_v63, 0.0  ;;  %v4833_v63 = vadd.f32 %v12044_v38, %v12043_v30  ;;  %v9016_v48 = vadd.f32 %v11484_v56, %v4822_v49  ;;  %v11673_v31 = vpop.permute.xlu0 %4386  ;;  %v12051_v30 = vld [vmem:[#allocation87_spill] sm:$0xff] }
0x1032   : > { %v9002_v6 = vadd.f32 %v9001_v11, %v8778_v61  ;;  %v6794_v16 = vpop.f32.mrb[133].mxu1  ;;  %v9013_v35 = vadd.f32 %v11492_v19, %v4830_v37  ;;  %v12046_v11 = vld [vmem:[#allocation57_spill] sm:$0xff] }
0x1033   : > { %v9005_v14 = vadd.f32 %v9004_v17, %v6794_v16  ;;  %7149 = vadd.xlane.f32.xlu0 %v7148_v18  ;;  %v8779_v8 = vpop.f32.mrb[134].mxu1  ;;  %v4825_v42 = vadd.f32 %v12046_v11, %v12045_v40  ;;  %v9019_v17 = vadd.f32 %v11494_v25, %v4833_v63  ;;  %v12047_v25 = vld [vmem:[#allocation58_spill] sm:$0xff] }
0x1034   : > { %v7055_v1 = vmax.f32 %v9002_v6, 0.0  ;;  %v9008_v28 = vadd.f32 %v9007_v20, %v8779_v8  ;;  %v6797_v10 = vpop.f32.mrb[135].mxu1 }
0x1035   : > { %v9011_v3 = vadd.f32 %v9010_v0, %v6797_v10  ;;  %7155 = vadd.xlane.f32.xlu1 %v7154_v24  ;;  %v7053_v15 = vmax.f32 %v9005_v14, 0.0  ;;  %v9022_v19 = vadd.f32 %v11486_v22, %v4825_v42  ;;  %v4846_v10 = vadd.f32 %v12047_v25, %v11419_v60  ;;  %v12048_v22 = vld [vmem:[#allocation88_spill] sm:$0xff]  ;;  %v12052_v60 = vld [vmem:[#allocation61_spill] sm:$0xff] }
0x1036   : > { %v7056_v41 = vmax.f32 %v9008_v28, 0.0  ;;  %v7163_v53 = vsel %vm2544_vm0, %v7055_v1, 0.0  ;;  %v11679_v1 = vpop.permute.xlu1 %6370  ;;  %v4838_v37 = vadd.f32 %v12049_v9, %v12048_v22  ;;  %v4841_v38 = vadd.f32 %v12052_v60, %v12051_v30 }
0x1037   : > { %7164 = vadd.xlane.f32.xlu0 %v7163_v53  ;;  %v7054_v7 = vmax.f32 %v9011_v3, 0.0  ;;  %v7157_v20 = vsel %vm2544_vm0, %v7053_v15, 0.0  ;;  %v11686_v15 = vpop.permute.xlu0 %6375  ;;  %v9025_v23 = vadd.f32 %v11508_v59, %v4846_v10 }
0x1038   : > { %v7166_v54 = vsel %vm2544_vm0, %v7056_v41, 0.0  ;;  %v12050_v41 = vld [vmem:[#allocation60_spill] sm:$0xff]  ;;  %v9028_v63 = vadd.f32 %v11500_v47, %v4838_v37 }
0x1039   : > { %7167 = vadd.xlane.f32.xlu1 %v7166_v54  ;;  %v8782_v57 = vpop.f32.mrb[136].mxu1  ;;  %v7160_v56 = vsel %vm2544_vm0, %v7054_v7, 0.0  ;;  %v4849_v53 = vadd.f32 %v12050_v41, %v11421_v2  ;;  %v9034_v2 = vadd.f32 %v11502_v43, %v4841_v38 }
0x103a   : > { %v9014_v61 = vadd.f32 %v9013_v35, %v8782_v57  ;;  %v6810_v18 = vpop.f32.mrb[137].mxu1  ;;  %v11698_v42 = vpop.permute.xlu1 %4471 }
0x103b   : > { %v9017_v6 = vadd.f32 %v9016_v48, %v6810_v18  ;;  %7158 = vadd.xlane.f32.xlu0 %v7157_v20  ;;  %v8783_v16 = vpop.f32.mrb[138].mxu1  ;;  %v9031_v7 = vadd.f32 %v11510_v5, %v4849_v53  ;;  %v11701_v18 = vpop.permute.xlu0 %4476  ;;  %v12053_v5 = vld [vmem:[#allocation62_spill] sm:$0xff] }
0x103c   : > { %v7059_v0 = vmax.f32 %v9014_v61, 0.0  ;;  %v9020_v14 = vadd.f32 %v9019_v17, %v8783_v16  ;;  %v6813_v8 = vpop.f32.mrb[139].mxu1  ;;  %v12060_v53 = vld [vmem:[#allocation106_spill] sm:$0xff] }
0x103d   : > { %v9023_v28 = vadd.f32 %v9022_v19, %v6813_v8  ;;  %7161 = vadd.xlane.f32.xlu1 %v7160_v56  ;;  %v7057_v24 = vmax.f32 %v9017_v6, 0.0  ;;  %v4862_v19 = vadd.f32 %v12053_v5, %v11429_v13  ;;  %v12055_v8 = vld [vmem:[#allocation64_spill] sm:$0xff]  ;;  %v12059_v13 = vld [vmem:[#allocation99_spill] sm:$0xff]  ;;  %v12063_v5 = vld [vmem:[#allocation90_spill] sm:$0xff] }
0x103e   : > { %v7060_v3 = vmax.f32 %v9020_v14, 0.0  ;;  %v7175_v58 = vsel %vm2544_vm0, %v7059_v0, 0.0  ;;  %v12054_v0 = vld [vmem:[#allocation63_spill] sm:$0xff]  ;;  %v4865_v56 = vadd.f32 %v12055_v8, %v11432_v44  ;;  %v11715_v37 = vpop.permute.xlu1 %6460 }
0x103f   : > { %7176 = vadd.xlane.f32.xlu0 %v7175_v58  ;;  %v7058_v26 = vmax.f32 %v9023_v28, 0.0  ;;  %v7169_v11 = vsel %vm2544_vm0, %v7057_v24, 0.0  ;;  %v4854_v14 = vadd.f32 %v12054_v0, %v11424_v34  ;;  %v12056_v28 = vld [vmem:[#allocation105_spill] sm:$0xff]  ;;  %v11720_v60 = vpop.permute.xlu0 %6465 }
0x1040   : > { %v7178_v49 = vsel %vm2544_vm0, %v7060_v3, 0.0  ;;  %v9037_v25 = vadd.f32 %v12056_v28, %v4862_v19  ;;  %v12057_v3 = vld [vmem:[#allocation89_spill] sm:$0xff]  ;;  %v9043_v34 = vadd.f32 %v12060_v53, %v4865_v56  ;;  %v9050_v19 = vadd.f32 %v11573_v21, %v12063_v5  ;;  %v12065_v28 = vld [vmem:[#allocation91_spill] sm:$0xff] }
0x1041   : > { %7179 = vadd.xlane.f32.xlu1 %v7178_v49  ;;  %v8786_v35 = vpop.f32.mrb[140].mxu1  ;;  %v7172_v47 = vsel %vm2544_vm0, %v7058_v26, 0.0  ;;  %v12058_v58 = vld [vmem:[#allocation65_spill] sm:$0xff]  ;;  %v9040_v9 = vadd.f32 %v12059_v13, %v4854_v14  ;;  %v12061_v49 = vld [vmem:[#allocation100_spill] sm:$0xff] }
0x1042   : > { %v9026_v54 = vadd.f32 %v9025_v23, %v8786_v35  ;;  %v6826_v40 = vpop.f32.mrb[141].mxu1  ;;  %v4857_v22 = vadd.f32 %v12058_v58, %v12057_v3 }
0x1043   : > { %v9029_v59 = vadd.f32 %v9028_v63, %v6826_v40  ;;  %7170 = vadd.xlane.f32.xlu0 %v7169_v11  ;;  %v8787_v48 = vpop.f32.mrb[142].mxu1 }
0x1044   : > { %v7063_v57 = vmax.f32 %v9026_v54, 0.0  ;;  %v9032_v17 = vadd.f32 %v9031_v7, %v8787_v48  ;;  %v6829_v61 = vpop.f32.mrb[143].mxu1  ;;  %v9046_v30 = vadd.f32 %v12061_v49, %v4857_v22 }
0x1045   : > { %v9035_v20 = vadd.f32 %v9034_v2, %v6829_v61  ;;  %7173 = vadd.xlane.f32.xlu1 %v7172_v47  ;;  %v7061_v6 = vmax.f32 %v9029_v59, 0.0 }
0x1046   : > { %v7064_v16 = vmax.f32 %v9032_v17, 0.0  ;;  %v7187_v43 = vsel %vm2544_vm0, %v7063_v57, 0.0  ;;  %v4392_v57 = vpop.permute.xlu1 %4391  ;;  %v12062_v17 = vld [vmem:[#allocation92_spill] sm:$0xff] }
0x1047   : > { %7188 = vadd.xlane.f32.xlu0 %v7187_v43  ;;  %v7062_v10 = vmax.f32 %v9035_v20, 0.0  ;;  %v7181_v44 = vsel %vm2544_vm0, %v7061_v6, 0.0  ;;  %v9048_v61 = vadd.f32 %v11622_v12, %v12062_v17  ;;  %v4397_v6 = vpop.permute.xlu0 %4396  ;;  %v12064_v43 = vld [vmem:[#allocation93_spill] sm:$0xff] }
0x1048   : > { %v7190_v24 = vsel %vm2544_vm0, %v7064_v16, 0.0  ;;  %v9052_v0 = vadd.f32 %v11634_v27, %v12064_v43 }
0x1049   : > { %7191 = vadd.xlane.f32.xlu1 %v7190_v24  ;;  %v8790_v41 = vpop.f32.mrb[144].mxu1  ;;  %v7184_v40 = vsel %vm2544_vm0, %v7062_v10, 0.0 }
0x104a   : > { %v9038_v23 = vadd.f32 %v9037_v25, %v8790_v41  ;;  %v6842_v26 = vpop.f32.mrb[145].mxu1  ;;  %v9054_v25 = vadd.f32 %v11587_v32, %v12065_v28  ;;  %v6381_v22 = vpop.permute.xlu1 %6380  ;;  %v12067_v28 = vld [vmem:[#allocation101_spill] sm:$0xff] }
0x104b   : > { %v9041_v38 = vadd.f32 %v9040_v9, %v6842_v26  ;;  %7182 = vadd.xlane.f32.xlu0 %v7181_v44  ;;  %v8791_v63 = vpop.f32.mrb[146].mxu1  ;;  %v6386_v53 = vpop.permute.xlu0 %6385  ;;  %v12066_v26 = vld [vmem:[#allocation94_spill] sm:$0xff] }
0x104c   : > { %v7067_v35 = vmax.f32 %v9038_v23, 0.0  ;;  %v9044_v7 = vadd.f32 %v9043_v34, %v8791_v63  ;;  %v6845_v54 = vpop.f32.mrb[147].mxu1  ;;  %v9056_v34 = vadd.f32 %v6381_v22, %v4392_v57  ;;  %v9058_v44 = vadd.f32 %v11679_v1, %v12066_v26  ;;  %v12071_v22 = vld [vmem:[#allocation102_spill] sm:$0xff] }
0x104d   : > { %v9047_v11 = vadd.f32 %v9046_v30, %v6845_v54  ;;  %7185 = vadd.xlane.f32.xlu1 %v7184_v40  ;;  %v7065_v2 = vmax.f32 %v9041_v38, 0.0  ;;  %v9060_v30 = vadd.f32 %v6386_v53, %v4397_v6  ;;  %v12073_v53 = vld [vmem:[#allocation96_spill] sm:$0xff] }
0x104e   : > { %v7068_v59 = vmax.f32 %v9044_v7, 0.0  ;;  %v7199_v48 = vsel %vm2544_vm0, %v7067_v35, 0.0  ;;  %v9062_v7 = vadd.f32 %v11686_v15, %v11673_v31  ;;  %v11742_v54 = vpop.permute.xlu1 %4481 }
0x104f   : > { %7200 = vadd.xlane.f32.xlu0 %v7199_v48  ;;  %v7066_v47 = vmax.f32 %v9047_v11, 0.0  ;;  %v7193_v56 = vsel %vm2544_vm0, %v7065_v2, 0.0  ;;  %v11745_v57 = vpop.permute.xlu0 %4486 }
0x1050   : > { %v7202_v20 = vsel %vm2544_vm0, %v7068_v59, 0.0 }
0x1051   : > { %7203 = vadd.xlane.f32.xlu1 %v7202_v20  ;;  %v8794_v16 = vpop.f32.mrb[52].mxu1  ;;  %v7196_v21 = vsel %vm2544_vm0, %v7066_v47, 0.0 }
0x1052   : > { %v9049_v14 = vadd.f32 %v9048_v61, %v8794_v16  ;;  %v6858_v8 = vpop.f32.mrb[53].mxu1  ;;  %v11749_v5 = vpop.permute.xlu1 %6470 }
0x1053   : > { %v9051_v12 = vadd.f32 %v9050_v19, %v6858_v8  ;;  %7194 = vadd.xlane.f32.xlu0 %v7193_v56  ;;  %v8795_v10 = vpop.f32.mrb[54].mxu1  ;;  %v11756_v43 = vpop.permute.xlu0 %6475 }
0x1054   : > { %v7071_v24 = vmax.f32 %v9049_v14, 0.0  ;;  %v9053_v3 = vadd.f32 %v9052_v0, %v8795_v10  ;;  %v6861_v58 = vpop.f32.mrb[55].mxu1  ;;  %v12069_v10 = vld [vmem:[#allocation95_spill] sm:$0xff] }
0x1055   : > { %v9055_v13 = vadd.f32 %v9054_v25, %v6861_v58  ;;  %7197 = vadd.xlane.f32.xlu1 %v7196_v21  ;;  %v7069_v9 = vmax.f32 %v9051_v12, 0.0  ;;  %v12068_v25 = vld [vmem:[#allocation103_spill] sm:$0xff] }
0x1056   : > { %v7072_v27 = vmax.f32 %v9053_v3, 0.0  ;;  %v7211_v41 = vsel %vm2544_vm0, %v7071_v24, 0.0  ;;  %v11763_v56 = vpop.permute.xlu1 %4401  ;;  %v9072_v12 = vadd.f32 %v12068_v25, %v12067_v28  ;;  %v12070_v24 = vld [vmem:[#allocation97_spill] sm:$0xff] }
0x1057   : > { %7212 = vadd.xlane.f32.xlu0 %v7211_v41  ;;  %v7070_v23 = vmax.f32 %v9055_v13, 0.0  ;;  %v7205_v35 = vsel %vm2544_vm0, %v7069_v9, 0.0  ;;  %v9074_v3 = vadd.f32 %v12070_v24, %v12069_v10  ;;  %v11769_v58 = vpop.permute.xlu0 %4406  ;;  %v12072_v13 = vld [vmem:[#allocation104_spill] sm:$0xff] }
0x1058   : > { %v7214_v32 = vsel %vm2544_vm0, %v7072_v27, 0.0  ;;  %v9076_v9 = vadd.f32 %v12072_v13, %v12071_v22  ;;  %v9092_v13 = vadd.f32 %v11720_v60, %v11701_v18 }
0x1059   : > { %7215 = vadd.xlane.f32.xlu1 %v7214_v32  ;;  %v8798_v49 = vpop.f32.mrb[56].mxu1  ;;  %v7208_v1 = vsel %vm2544_vm0, %v7070_v23, 0.0 }
0x105a   : > { %v9057_v38 = vadd.f32 %v9056_v34, %v8798_v49  ;;  %v6874_v63 = vpop.f32.mrb[57].mxu1  ;;  %v12074_v34 = vld [vmem:[#allocation98_spill] sm:$0xff] }
0x105b   : > { %v9059_v40 = vadd.f32 %v9058_v44, %v6874_v63  ;;  %7206 = vadd.xlane.f32.xlu0 %v7205_v35  ;;  %v8799_v11 = vpop.f32.mrb[58].mxu1  ;;  %v9078_v23 = vadd.f32 %v12074_v34, %v12073_v53  ;;  %v9094_v53 = vadd.f32 %v11664_v4, %v11651_v46 }
0x105c   : > { %v7075_v2 = vmax.f32 %v9057_v38, 0.0  ;;  %v9061_v59 = vadd.f32 %v9060_v30, %v8799_v11  ;;  %v6877_v48 = vpop.f32.mrb[59].mxu1  ;;  %v6391_v38 = vpop.permute.xlu1 %6390 }
0x105d   : > { %v9063_v17 = vadd.f32 %v9062_v7, %v6877_v48  ;;  %7209 = vadd.xlane.f32.xlu1 %v7208_v1  ;;  %v7073_v61 = vmax.f32 %v9059_v40, 0.0  ;;  %v6396_v11 = vpop.permute.xlu0 %6395  ;;  %v9082_v1 = vadd.f32 %v11559_v36, %v11549_v51 }
0x105e   : > { %v7076_v47 = vmax.f32 %v9061_v59, 0.0  ;;  %v7223_v20 = vsel %vm2544_vm0, %v7075_v2, 0.0  ;;  %v9080_v2 = vadd.f32 %v11609_v45, %v11592_v52  ;;  %v9070_v18 = vadd.f32 %v6396_v11, %v11769_v58 }
0x105f   : > { %7224 = vadd.xlane.f32.xlu0 %v7223_v20  ;;  %v7074_v31 = vmax.f32 %v9063_v17, 0.0  ;;  %v7217_v16 = vsel %vm2544_vm0, %v7073_v61, 0.0  ;;  %v9084_v61 = vadd.f32 %v11615_v55, %v11600_v50 }
0x1060   : > { %v7226_v15 = vsel %vm2544_vm0, %v7076_v47, 0.0 }
0x1061   : > { %7227 = vadd.xlane.f32.xlu1 %v7226_v15  ;;  %v11751_v19 = vpop.f32.mrb[60].mxu1  ;;  %v7220_v8 = vsel %vm2544_vm0, %v7074_v31, 0.0  ;;  %v9086_v15 = vadd.f32 %v11570_v33, %v11552_v29  ;;  %v4497_v36 = vpop.permute.xlu0 %4496  ;;  %v9088_v29 = vadd.f32 %v11715_v37, %v11698_v42 }
0x1062   : > { %v11753_v6 = vpop.f32.mrb[61].mxu1 }
0x1063   : > { %7218 = vadd.xlane.f32.xlu0 %v7217_v16  ;;  %v11758_v0 = vpop.f32.mrb[62].mxu1  ;;  %v4492_v16 = vpop.permute.xlu1 %4491 }
0x1064   : > { %v11760_v14 = vpop.f32.mrb[63].mxu1 }
0x1065   : > { %7221 = vadd.xlane.f32.xlu1 %v7220_v8  ;;  %v6486_v42 = vpop.permute.xlu0 %6485 }
0x1069   : > { %v8806_v21 = vpop.f32.mrb[64].mxu1 }
0x106a   : > { %v9073_v27 = vadd.f32 %v9072_v12, %v8806_v21  ;;  %v6906_v41 = vpop.f32.mrb[65].mxu1  ;;  %v6481_v21 = vpop.permute.xlu1 %6480 }
0x106b   : > { %v9075_v32 = vadd.f32 %v9074_v3, %v6906_v41  ;;  %v8807_v26 = vpop.f32.mrb[66].mxu1  ;;  %v9090_v3 = vadd.f32 %v11656_v62, %v11637_v39 }
0x106c   : > { %v7083_v44 = vmax.f32 %v9073_v27, 0.0  ;;  %v9077_v49 = vadd.f32 %v9076_v9, %v8807_v26  ;;  %v6909_v30 = vpop.f32.mrb[67].mxu1 }
0x106d   : > { %v9079_v63 = vadd.f32 %v9078_v23, %v6909_v30  ;;  %v7081_v35 = vmax.f32 %v9075_v32, 0.0  ;;  %v9066_v23 = vadd.f32 %v6391_v38, %v11763_v56 }
0x106e   : > { %v7084_v7 = vmax.f32 %v9077_v49, 0.0  ;;  %v7247_v40 = vsel %vm2544_vm0, %v7083_v44, 0.0  ;;  %v4412_v4 = vpop.permute.xlu1 %4411 }
0x106f   : > { %7248 = vadd.xlane.f32.xlu0 %v7247_v40  ;;  %v7082_v59 = vmax.f32 %v9079_v63, 0.0  ;;  %v7241_v31 = vsel %vm2544_vm0, %v7081_v35, 0.0  ;;  %v9067_v44 = vadd.f32 %v9066_v23, %v11753_v6  ;;  %v9071_v63 = vadd.f32 %v9070_v18, %v11760_v14 }
0x1070   : > { %v7250_v48 = vsel %vm2544_vm0, %v7084_v7, 0.0  ;;  %v9098_v35 = vadd.f32 %v11749_v5, %v11742_v54  ;;  %v4417_v7 = vpop.permute.xlu0 %4416 }
0x1071   : > { %7251 = vadd.xlane.f32.xlu1 %v7250_v48  ;;  %v8810_v17 = vpop.f32.mrb[68].mxu1  ;;  %v7244_v51 = vsel %vm2544_vm0, %v7082_v59, 0.0  ;;  %v7077_v40 = vmax.f32 %v9067_v44, 0.0  ;;  %v9096_v48 = vadd.f32 %v6481_v21, %v4492_v16 }
0x1072   : > { %v9081_v47 = vadd.f32 %v9080_v2, %v8810_v17  ;;  %v6922_v20 = vpop.f32.mrb[69].mxu1  ;;  %v9102_v2 = vadd.f32 %v11756_v43, %v11745_v57  ;;  %v6401_v54 = vpop.permute.xlu1 %6400  ;;  %v7354_v57 = vld [vmem:[%s10340_s14 + $0x8] sm:$0xff] }
0x1073   : > { %v9083_v52 = vadd.f32 %v9082_v1, %v6922_v20  ;;  %7242 = vadd.xlane.f32.xlu0 %v7241_v31  ;;  %v8811_v45 = vpop.f32.mrb[70].mxu1  ;;  %v7078_v1 = vmax.f32 %v9071_v63, 0.0  ;;  %v9064_v43 = vadd.f32 %v6401_v54, %v4412_v4  ;;  %7427 = vmatprep.mubr.f32.mxu0 %v7354_v57 }
0x1074   : > { %v7087_v8 = vmax.f32 %v9081_v47, 0.0  ;;  %v9085_v28 = vadd.f32 %v9084_v61, %v8811_v45  ;;  %v6925_v25 = vpop.f32.mrb[71].mxu1  ;;  %v9100_v47 = vadd.f32 %v6486_v42, %v4497_v36 }
0x1075   : > { %v9087_v12 = vadd.f32 %v9086_v15, %v6925_v25  ;;  %7245 = vadd.xlane.f32.xlu1 %v7244_v51  ;;  %v7085_v50 = vmax.f32 %v9083_v52, 0.0  ;;  %v7229_v15 = vsel %vm2544_vm0, %v7077_v40, 0.0  ;;  %v6406_v52 = vpop.permute.xlu0 %6405  ;;  %v7232_v16 = vsel %vm2544_vm0, %v7078_v1, 0.0 }
0x1076   : > { %v7088_v55 = vmax.f32 %v9085_v28, 0.0  ;;  %v7259_v10 = vsel %vm2544_vm0, %v7087_v8, 0.0  ;;  %v9068_v28 = vadd.f32 %v6406_v52, %v4417_v7  ;;  %v9065_v25 = vadd.f32 %v9064_v43, %v11751_v19 }
0x1077   : > { %7260 = vadd.xlane.f32.xlu0 %v7259_v10  ;;  %v7086_v33 = vmax.f32 %v9087_v12, 0.0  ;;  %v7253_v41 = vsel %vm2544_vm0, %v7085_v50, 0.0 }
0x1078   : > { %v7262_v24 = vsel %vm2544_vm0, %v7088_v55, 0.0  ;;  %v9069_v12 = vadd.f32 %v9068_v28, %v11758_v0  ;;  %v7079_v10 = vmax.f32 %v9065_v25, 0.0 }
0x1079   : > { %7263 = vadd.xlane.f32.xlu1 %v7262_v24  ;;  %v8814_v22 = vpop.f32.mrb[72].mxu1  ;;  %v7256_v26 = vsel %vm2544_vm0, %v7086_v33, 0.0 }
0x107a   : > { %v9089_v9 = vadd.f32 %v9088_v29, %v8814_v22  ;;  %v6938_v27 = vpop.f32.mrb[73].mxu1  ;;  %v7080_v33 = vmax.f32 %v9069_v12, 0.0  ;;  %v7235_v19 = vsel %vm2544_vm0, %v7079_v10, 0.0 }
0x107b   : > { %v9091_v37 = vadd.f32 %v9090_v3, %v6938_v27  ;;  %7254 = vadd.xlane.f32.xlu0 %v7253_v41  ;;  %v8815_v34 = vpop.f32.mrb[74].mxu1 }
0x107c   : > { %v7091_v39 = vmax.f32 %v9089_v9, 0.0  ;;  %v9093_v62 = vadd.f32 %v9092_v13, %v8815_v34  ;;  %v6941_v32 = vpop.f32.mrb[75].mxu1  ;;  %v7238_v3 = vsel %vm2544_vm0, %v7080_v33, 0.0 }
0x107d   : > { %v9095_v60 = vadd.f32 %v9094_v53, %v6941_v32  ;;  %7257 = vadd.xlane.f32.xlu1 %v7256_v26  ;;  %v7089_v49 = vmax.f32 %v9091_v37, 0.0 }
0x107e   : > { %v7092_v30 = vmax.f32 %v9093_v62, 0.0  ;;  %v7271_v46 = vsel %vm2544_vm0, %v7091_v39, 0.0 }
0x107f   : > { %7272 = vadd.xlane.f32.xlu0 %v7271_v46  ;;  %v7090_v56 = vmax.f32 %v9095_v60, 0.0  ;;  %v7265_v6 = vsel %vm2544_vm0, %v7089_v49, 0.0 }
0x1080   : > { %v7274_v38 = vsel %vm2544_vm0, %v7092_v30, 0.0 }
0x1081   : > { %7275 = vadd.xlane.f32.xlu1 %v7274_v38  ;;  %v8818_v58 = vpop.f32.mrb[76].mxu1  ;;  %v7268_v61 = vsel %vm2544_vm0, %v7090_v56, 0.0 }
0x1082   : > { %v6954_v11 = vpop.f32.mrb[77].mxu1  ;;  %v9097_v20 = vadd.f32 %v9096_v48, %v8818_v58 }
0x1083   : > { %v9099_v59 = vadd.f32 %v9098_v35, %v6954_v11  ;;  %7266 = vadd.xlane.f32.xlu0 %v7265_v6  ;;  %v8819_v14 = vpop.f32.mrb[78].mxu1 }
0x1084   : > { %v6957_v17 = vpop.f32.mrb[79].mxu1  ;;  %v9101_v45 = vadd.f32 %v9100_v47, %v8819_v14  ;;  %v7095_v51 = vmax.f32 %v9097_v20, 0.0 }
0x1085   : > { %v9103_v5 = vadd.f32 %v9102_v2, %v6957_v17  ;;  %7269 = vadd.xlane.f32.xlu1 %v7268_v61  ;;  %v7093_v31 = vmax.f32 %v9099_v59, 0.0 }
0x1086   : > { %v7096_v50 = vmax.f32 %v9101_v45, 0.0  ;;  %v7283_v29 = vsel %vm2544_vm0, %v7095_v51, 0.0 }
0x1087   : > { %7230 = vadd.xlane.f32.xlu0 %v7229_v15  ;;  %v7094_v8 = vmax.f32 %v9103_v5, 0.0  ;;  %v7277_v36 = vsel %vm2544_vm0, %v7093_v31, 0.0 }
0x1088   : > { %v7286_v24 = vsel %vm2544_vm0, %v7096_v50, 0.0 }
0x1089   : > { %7233 = vadd.xlane.f32.xlu1 %v7232_v16  ;;  %v7280_v55 = vsel %vm2544_vm0, %v7094_v8, 0.0 }
0x108b   : > { %7278 = vadd.xlane.f32.xlu0 %v7277_v36 }
0x108d   : > { %7281 = vadd.xlane.f32.xlu1 %v7280_v55 }
0x108f   : > { %7284 = vadd.xlane.f32.xlu0 %v7283_v29 }
0x1091   : > { %7287 = vadd.xlane.f32.xlu1 %v7286_v24 }
0x1093   : > { %7236 = vadd.xlane.f32.xlu0 %v7235_v19 }
0x1095   : > { %7239 = vadd.xlane.f32.xlu1 %v7238_v3 }
0x109c   : > { %v7105_v21 = vpop.xlane.xlu0 %7104 }
0x109d   : > { %v7291_v6 = vmul.f32 0.03125, %v7105_v21 }
0x109e   : > { %v7108_v0 = vpop.xlane.xlu1 %7107 }
0x109f   : > { %v7292_v7 = vmul.f32 0.03125, %v7108_v0 }
0x10a0   : > { %v7099_v22 = vpop.xlane.xlu0 %7098 }
0x10a1   : > { %v7289_v4 = vmul.f32 0.03125, %v7099_v22  ;;  %v8826_v59 = vpack.c.bf16 %v7292_v7, %v7291_v6 }
0x10a2   : > { %v7102_v13 = vpop.xlane.xlu1 %7101 }
0x10a3   : > { %v7290_v44 = vmul.f32 0.03125, %v7102_v13 }
0x10a4   : > { %v7117_v9 = vpop.xlane.xlu0 %7116 }
0x10a5   : > { %v8822_v58 = vpack.c.bf16 %v7290_v44, %v7289_v4  ;;  %v7295_v45 = vmul.f32 0.03125, %v7117_v9  ;;  %v7353_v4 = vld [vmem:[%s10340_s14] sm:$0xff] }
0x10a6   : > { %v7120_v27 = vpop.xlane.xlu1 %7119 }
0x10a7   : > { %v7296_v15 = vmul.f32 0.03125, %v7120_v27 }
0x10a8   : > { %v7111_v41 = vpop.xlane.xlu0 %7110 }
0x10a9   : > { %v7293_v5 = vmul.f32 0.03125, %v7111_v41  ;;  %v8834_v16 = vpack.c.bf16 %v7296_v15, %v7295_v45 }
0x10aa   : > { %v7114_v53 = vpop.xlane.xlu1 %7113 }
0x10ab   : > { %v7294_v48 = vmul.f32 0.03125, %v7114_v53 }
0x10ac   : > { %v11822_v42 = vpop.xlane.xlu0 %7128 }
0x10ad   : > { %v8830_v52 = vpack.c.bf16 %v7294_v48, %v7293_v5  ;;  %v7299_v21 = vmul.f32 0.03125, %v11822_v42 }
0x10ae   : > { %v7132_v37 = vpop.xlane.xlu1 %7131 }
0x10af   : > { %v7300_v33 = vmul.f32 0.03125, %v7132_v37 }
0x10b0   : > { %v7123_v34 = vpop.xlane.xlu0 %7122 }
0x10b1   : > { %v7297_v50 = vmul.f32 0.03125, %v7123_v34  ;;  %v8842_v22 = vpack.c.bf16 %v7300_v33, %v7299_v21 }
0x10b2   : > { %v7126_v23 = vpop.xlane.xlu1 %7125 }
0x10b3   : > { %v7298_v28 = vmul.f32 0.03125, %v7126_v23 }
0x10b4   : > { %v11824_v39 = vpop.xlane.xlu0 %7140 }
0x10b5   : > { %v8838_v24 = vpack.c.bf16 %v7298_v28, %v7297_v50 }
0x10b6   : > { %v11826_v62 = vpop.xlane.xlu1 %7143 }
0x10b7   : > { %v7304_v42 = vmul.f32 0.03125, %v11826_v62  ;;  %v7357_v62 = vld [vmem:[%s10340_s14 + $0x20] sm:$0x3] }
0x10b8   : > { %v11828_v32 = vpop.xlane.xlu0 %7134 }
0x10b9   : > { %v7301_v34 = vmul.f32 0.03125, %v11828_v32 }
0x10ba   : > { %v11830_v26 = vpop.xlane.xlu1 %7137 }
0x10bb   : > { %v7302_v13 = vmul.f32 0.03125, %v11830_v26  ;;  %v7303_v26 = vmul.f32 0.03125, %v11824_v39 }
0x10bc   : > { %v7153_v18 = vpop.xlane.xlu0 %7152 }
0x10bd   : > { %v7307_v56 = vmul.f32 0.03125, %v7153_v18  ;;  %v8850_v32 = vpack.c.bf16 %v7304_v42, %v7303_v26 }
0x10be   : > { %v7147_v60 = vpop.xlane.xlu1 %7146 }
0x10bf   : > { %v7305_v30 = vmul.f32 0.03125, %v7147_v60  ;;  %v8846_v60 = vpack.c.bf16 %v7302_v13, %v7301_v34 }
0x10c0   : > { %v7150_v49 = vpop.xlane.xlu0 %7149 }
0x10c1   : > { %v7306_v46 = vmul.f32 0.03125, %v7150_v49 }
0x10c2   : > { %v7156_v63 = vpop.xlane.xlu1 %7155 }
0x10c3   : > { %v8820_v38 = vpack.c.bf16 %v7306_v46, %v7305_v30  ;;  %v7308_v35 = vmul.f32 0.03125, %v7156_v63  ;;  %v7358_v63 = vld [vmem:[%s10340_s14 + $0x28] sm:$0x3] }
0x10c4   : > { %v7165_v40 = vpop.xlane.xlu0 %7164 }
0x10c5   : > { %v8824_v11 = vpack.c.bf16 %v7308_v35, %v7307_v56  ;;  %8821 = vmatprep.subr.bf16.mxu0 %v8820_v38  ;;  %v7311_v20 = vmul.f32 0.03125, %v7165_v40  ;;  %v7356_v35 = vld [vmem:[%s10340_s14 + $0x18] sm:$0xff] }
0x10c6   : > { %8823 = vmatpush3.bf16.msra.mxu0 %v8822_v58  ;;  %v7168_v2 = vpop.xlane.xlu1 %7167 }
0x10c7   : > { %8825 = vmatprep.subr.bf16.mxu0 %v8824_v11  ;;  %v7312_v17 = vmul.f32 0.03125, %v7168_v2 }
0x10c8   : > { %v7159_v14 = vpop.xlane.xlu0 %7158 }
0x10c9   : > { %v7309_v61 = vmul.f32 0.03125, %v7159_v14  ;;  %v8832_v43 = vpack.c.bf16 %v7312_v17, %v7311_v20 }
0x10ca   : > { %8827 = vmatpush3.bf16.msra.mxu0 %v8826_v59  ;;  %v7162_v1 = vpop.xlane.xlu1 %7161 }
0x10cb   : > { %v7310_v54 = vmul.f32 0.03125, %v7162_v1 }
0x10cc   : > { %v7177_v47 = vpop.xlane.xlu0 %7176 }
0x10cd   : > { %v8828_v31 = vpack.c.bf16 %v7310_v54, %v7309_v61  ;;  %v7315_v10 = vmul.f32 0.03125, %v7177_v47 }
0x10ce   : > { %v7180_v57 = vpop.xlane.xlu1 %7179 }
0x10cf   : > { %8829 = vmatprep.subr.bf16.mxu0 %v8828_v31  ;;  %v7316_v51 = vmul.f32 0.03125, %v7180_v57 }
0x10d0   : > { %8831 = vmatpush3.bf16.msra.mxu0 %v8830_v52  ;;  %v7171_v8 = vpop.xlane.xlu0 %7170 }
0x10d1   : > { %8833 = vmatprep.subr.bf16.mxu0 %v8832_v43  ;;  %v7313_v36 = vmul.f32 0.03125, %v7171_v8  ;;  %v8840_v3 = vpack.c.bf16 %v7316_v51, %v7315_v10 }
0x10d2   : > { %v7174_v25 = vpop.xlane.xlu1 %7173 }
0x10d3   : > { %v7314_v12 = vmul.f32 0.03125, %v7174_v25 }
0x10d4   : > { %8835 = vmatpush3.bf16.msra.mxu0 %v8834_v16  ;;  %v7189_v55 = vpop.xlane.xlu0 %7188 }
0x10d5   : > { %v8836_v29 = vpack.c.bf16 %v7314_v12, %v7313_v36  ;;  %v7319_v23 = vmul.f32 0.03125, %v7189_v55 }
0x10d6   : > { %v7192_v19 = vpop.xlane.xlu1 %7191 }
0x10d7   : > { %8837 = vmatprep.subr.bf16.mxu0 %v8836_v29  ;;  %v7320_v27 = vmul.f32 0.03125, %v7192_v19 }
0x10d8   : > { %8839 = vmatpush3.bf16.msra.mxu0 %v8838_v24  ;;  %v7183_v0 = vpop.xlane.xlu0 %7182 }
0x10d9   : > { %8841 = vmatprep.subr.bf16.mxu0 %v8840_v3  ;;  %v7317_v41 = vmul.f32 0.03125, %v7183_v0  ;;  %v8848_v49 = vpack.c.bf16 %v7320_v27, %v7319_v23 }
0x10da   : > { %v7186_v9 = vpop.xlane.xlu1 %7185 }
0x10db   : > { %v7318_v53 = vmul.f32 0.03125, %v7186_v9 }
0x10dc   : > { %8843 = vmatpush3.bf16.msra.mxu0 %v8842_v22  ;;  %v7201_v37 = vpop.xlane.xlu0 %7200 }
0x10dd   : > { %v8844_v18 = vpack.c.bf16 %v7318_v53, %v7317_v41  ;;  %v7323_v45 = vmul.f32 0.03125, %v7201_v37 }
0x10de   : > { %v7204_v44 = vpop.xlane.xlu1 %7203 }
0x10df   : > { %8845 = vmatprep.subr.bf16.mxu0 %v8844_v18  ;;  %v7324_v15 = vmul.f32 0.03125, %v7204_v44 }
0x10e0   : > { %8847 = vmatpush3.bf16.msra.mxu0 %v8846_v60  ;;  %v7195_v30 = vpop.xlane.xlu0 %7194 }
0x10e1   : > { %8849 = vmatprep.subr.bf16.mxu0 %v8848_v49  ;;  %v7321_v5 = vmul.f32 0.03125, %v7195_v30  ;;  %v8858_v16 = vpack.c.bf16 %v7324_v15, %v7323_v45 }
0x10e2   : > { %v7198_v46 = vpop.xlane.xlu1 %7197 }
0x10e3   : > { %v7322_v48 = vmul.f32 0.03125, %v7198_v46 }
0x10e4   : > { %8851 = vmatpush3.bf16.msra.mxu0 %v8850_v32  ;;  %v7213_v56 = vpop.xlane.xlu0 %7212 }
0x10e5   : > { %v8854_v52 = vpack.c.bf16 %v7322_v48, %v7321_v5  ;;  %v7327_v21 = vmul.f32 0.03125, %v7213_v56 }
0x10e6   : > { %v7216_v38 = vpop.xlane.xlu1 %7215 }
0x10e7   : > { %7428 = vmatmul.mubr.f32.vlgmr.msra.gmra.mrb[116].mxu0 %v7353_v4  ;;  %v7328_v33 = vmul.f32 0.03125, %v7216_v38 }
0x10e8   : > { %7432 = vmatprep.mubr.f32.mxu0 %v7358_v63  ;;  %v7207_v7 = vpop.xlane.xlu0 %7206 }
0x10e9   : > { %v7325_v50 = vmul.f32 0.03125, %v7207_v7  ;;  %v8866_v22 = vpack.c.bf16 %v7328_v33, %v7327_v21 }
0x10ea   : > { %v7210_v58 = vpop.xlane.xlu1 %7209 }
0x10eb   : > { %7433 = vmatmul.mubr.f32.gmra.mrb[118].mxu0 %v7357_v62  ;;  %v7326_v28 = vmul.f32 0.03125, %v7210_v58 }
0x10ec   : > { %7502 = vmatprep.mubr.f32.mxu0 %v7356_v35  ;;  %v7225_v40 = vpop.xlane.xlu0 %7224 }
0x10ed   : > { %v8862_v24 = vpack.c.bf16 %v7326_v28, %v7325_v50  ;;  %v7331_v26 = vmul.f32 0.03125, %v7225_v40 }
0x10ee   : > { %v7228_v39 = vpop.xlane.xlu1 %7227 }
0x10ef   : > { %v7332_v42 = vmul.f32 0.03125, %v7228_v39 }
0x10f0   : > { %v7219_v11 = vpop.xlane.xlu0 %7218 }
0x10f1   : > { %v7329_v34 = vmul.f32 0.03125, %v7219_v11  ;;  %v8874_v32 = vpack.c.bf16 %v7332_v42, %v7331_v26 }
0x10f2   : > { %v7222_v6 = vpop.xlane.xlu1 %7221 }
0x10f3   : > { %v7330_v13 = vmul.f32 0.03125, %v7222_v6 }
0x10f5   : > { %v8870_v60 = vpack.c.bf16 %v7330_v13, %v7329_v34 }
0x10fc   : > { %v7249_v2 = vpop.xlane.xlu0 %7248 }
0x10fd   : > { %v7339_v20 = vmul.f32 0.03125, %v7249_v2 }
0x10fe   : > { %v7252_v59 = vpop.xlane.xlu1 %7251 }
0x10ff   : > { %v7340_v17 = vmul.f32 0.03125, %v7252_v59 }
0x1100   : > { %v7243_v14 = vpop.xlane.xlu0 %7242 }
0x1101   : > { %v7337_v61 = vmul.f32 0.03125, %v7243_v14  ;;  %v8856_v43 = vpack.c.bf16 %v7340_v17, %v7339_v20  ;;  %v7360_v17 = vld [vmem:[%s10340_s14 + $0x38] sm:$0x3] }
0x1102   : > { %v7246_v1 = vpop.xlane.xlu1 %7245 }
0x1103   : > { %v7338_v54 = vmul.f32 0.03125, %v7246_v1  ;;  %v7355_v1 = vld [vmem:[%s10340_s14 + $0x10] sm:$0xff] }
0x1104   : > { %v7261_v47 = vpop.xlane.xlu0 %7260 }
0x1105   : > { %v8852_v31 = vpack.c.bf16 %v7338_v54, %v7337_v61  ;;  %v7343_v10 = vmul.f32 0.03125, %v7261_v47  ;;  %v7359_v61 = vld [vmem:[%s10340_s14 + $0x30] sm:$0x3] }
0x1106   : > { %v7264_v57 = vpop.xlane.xlu1 %7263 }
0x1107   : > { %8853 = vmatprep.subr.bf16.mxu0 %v8852_v31  ;;  %v7344_v51 = vmul.f32 0.03125, %v7264_v57 }
0x1108   : > { %8855 = vmatpush3.bf16.msra.mxu0 %v8854_v52  ;;  %v7255_v8 = vpop.xlane.xlu0 %7254  ;;  %v7361_v52 = vld [vmem:[%s10345_s8] sm:$0xff] }
0x1109   : > { %8857 = vmatprep.subr.bf16.mxu0 %v8856_v43  ;;  %v7341_v36 = vmul.f32 0.03125, %v7255_v8  ;;  %v8864_v3 = vpack.c.bf16 %v7344_v51, %v7343_v10 }
0x110a   : > { %v7258_v25 = vpop.xlane.xlu1 %7257 }
0x110b   : > { %v7342_v12 = vmul.f32 0.03125, %v7258_v25 }
0x110c   : > { %8859 = vmatpush3.bf16.msra.mxu0 %v8858_v16  ;;  %v7273_v55 = vpop.xlane.xlu0 %7272  ;;  %v7362_v16 = vld [vmem:[%s10345_s8 + $0x8] sm:$0x3] }
0x110d   : > { %v8860_v29 = vpack.c.bf16 %v7342_v12, %v7341_v36  ;;  %v7347_v23 = vmul.f32 0.03125, %v7273_v55 }
0x110e   : > { %v7276_v19 = vpop.xlane.xlu1 %7275 }
0x110f   : > { %8861 = vmatprep.subr.bf16.mxu0 %v8860_v29  ;;  %v7348_v27 = vmul.f32 0.03125, %v7276_v19 }
0x1110   : > { %8863 = vmatpush3.bf16.msra.mxu0 %v8862_v24  ;;  %v7267_v0 = vpop.xlane.xlu0 %7266 }
0x1111   : > { %8865 = vmatprep.subr.bf16.mxu0 %v8864_v3  ;;  %v7345_v41 = vmul.f32 0.03125, %v7267_v0  ;;  %v8872_v49 = vpack.c.bf16 %v7348_v27, %v7347_v23 }
0x1112   : > { %v7270_v9 = vpop.xlane.xlu1 %7269 }
0x1113   : > { %v7346_v53 = vmul.f32 0.03125, %v7270_v9 }
0x1114   : > { %8867 = vmatpush3.bf16.msra.mxu0 %v8866_v22  ;;  %v7231_v37 = vpop.xlane.xlu0 %7230 }
0x1115   : > { %v8868_v18 = vpack.c.bf16 %v7346_v53, %v7345_v41  ;;  %v7333_v38 = vmul.f32 0.03125, %v7231_v37 }
0x1116   : > { %v7234_v44 = vpop.xlane.xlu1 %7233 }
0x1117   : > { %8869 = vmatprep.subr.bf16.mxu0 %v8868_v18  ;;  %v7334_v46 = vmul.f32 0.03125, %v7234_v44 }
0x1118   : > { %8871 = vmatpush3.bf16.msra.mxu0 %v8870_v60  ;;  %v7279_v30 = vpop.xlane.xlu0 %7278 }
0x1119   : > { %8873 = vmatprep.subr.bf16.mxu0 %v8872_v49  ;;  %v7349_v63 = vmul.f32 0.03125, %v7279_v30  ;;  %v8878_v7 = vpack.c.bf16 %v7334_v46, %v7333_v38 }
0x111a   : > { %v7282_v4 = vpop.xlane.xlu1 %7281 }
0x111b   : > { %v7350_v56 = vmul.f32 0.03125, %v7282_v4 }
0x111c   : > { %8875 = vmatpush3.bf16.msra.mxu0 %v8874_v32  ;;  %v7285_v62 = vpop.xlane.xlu0 %7284 }
0x111d   : > { %v8876_v35 = vpack.c.bf16 %v7350_v56, %v7349_v63  ;;  %v7351_v39 = vmul.f32 0.03125, %v7285_v62 }
0x111e   : > { %v7288_v58 = vpop.xlane.xlu1 %7287 }
0x111f   : > { %v7352_v11 = vmul.f32 0.03125, %v7288_v58  ;;  %8877 = vmatprep.subr.bf16.mxu0 %v8876_v35 }
0x1120   : > { %v7237_v40 = vpop.xlane.xlu0 %7236  ;;  %8879 = vmatpush3.bf16.msra.mxu0 %v8878_v7 }
0x1121   : > { %v8880_v6 = vpack.c.bf16 %v7352_v11, %v7351_v39  ;;  %v7335_v59 = vmul.f32 0.03125, %v7237_v40 }
0x1122   : > { %v7240_v2 = vpop.xlane.xlu1 %7239 }
0x1123   : > { %v7336_v14 = vmul.f32 0.03125, %v7240_v2  ;;  %8881 = vmatprep.subr.bf16.mxu0 %v8880_v6 }
0x1125   : > { %v8882_v48 = vpack.c.bf16 %v7336_v14, %v7335_v59 }
0x1127   : > { %8883 = vmatpush3.bf16.msra.mxu0 %v8882_v48 }
0x112a   : > { %7503 = vmatmul.mubr.f32.vlgmr.msra.gmra.mrb[120].mxu0 %v7355_v1 }
0x112b   : > { %7507 = vmatprep.mubr.f32.mxu0 %v7360_v17 }
0x112e   : > { %7508 = vmatmul.mubr.f32.gmra.mrb[122].mxu0 %v7359_v61 }
0x11ba   : > { %v8450_v54 = vpop.f32.mrb[116].mxu0 }
0x11bb   : > { %v8451_v5 = vpop.f32.mrb[117].mxu0 }
0x11bc   : > { %v8452_v47 = vadd.f32 %v8451_v5, %v8450_v54 }
0x11be   : > { %v8453_v20 = vpop.f32.mrb[118].mxu0  ;;  %v7430_v45 = vadd.f32 %v8452_v47, %v7361_v52 }
0x11bf   : > { %v8454_v31 = vpop.f32.mrb[119].mxu0 }
0x11c0   : > { %v8455_v15 = vadd.f32 %v8454_v31, %v8453_v20 }
0x11c2   : > { %v7435_v36 = vadd.f32 %v8455_v15, %v7362_v16 }
0x11fd   : > { %v8488_v57 = vpop.f32.mrb[120].mxu0 }
0x11fe   : > { %v8489_v43 = vpop.f32.mrb[121].mxu0 }
0x11ff   : > { %v8490_v8 = vadd.f32 %v8489_v43, %v8488_v57 }
0x1201   : > { %v7505_v28 = vadd.f32 %v8490_v8, %v7430_v45  ;;  %v8491_v25 = vpop.f32.mrb[122].mxu0 }
0x1202   : > { %v8492_v51 = vpop.f32.mrb[123].mxu0 }
0x1203   : > { %v8493_v12 = vadd.f32 %v8492_v51, %v8491_v25  ;;  %v7514_v55 = vsel %vm7513_vm5, %v7505_v28, -inf }
0x1205   : > { %v7510_v50 = vadd.f32 %v8493_v12, %v7435_v36 }
0x1207   : > { %v7516_v10 = vsel %vm7515_vm6, %v7510_v50, -inf }
0x1208   : > { %v7517_v29 = vmax.f32 %v7514_v55, %v7516_v10 }
0x120a   : > { %v7518_v33 = vrot.slane %v7517_v29, 4 }
0x120c   : > { %v7519_v24 = vmax.f32 %v7517_v29, %v7518_v33 }
0x120e   : > { %v7520_v19 = vrot.slane %v7519_v24, 2 }
0x1210   : > { %v7521_v3 = vmax.f32 %v7519_v24, %v7520_v19 }
0x1212   : > { %v7522_v21 = vrot.slane %v7521_v3, 1 }
0x1214   : > { %v7523_v0 = vmax.f32 %v7521_v3, %v7522_v21 }
0x1216   : > { %v7524_v22 = vsub.f32 %v7505_v28, %v7523_v0  ;;  %v7525_v13 = vsub.f32 %v7510_v50, %v7523_v0 }
0x1218   : > { %v7526_v9 = vmul.f32 1.442695, %v7524_v22  ;;  %v7528_v27 = vmul.f32 1.442695, %v7525_v13 }
0x121a   : > { %9867 = vpow2.f32 %v7526_v9 }
0x121b   : > { %9869 = vpow2.f32 %v7528_v27 }
0x1224   : > { %v9868_v41 = vpop.eup %9867 }
0x1225   : > { %v9870_v53 = vpop.eup %9869  ;;  %v7530_v34 = vsel %vm7513_vm5, %v9868_v41, 0.0 }
0x1226   : > { %v7531_v37 = vsel %vm7515_vm6, %v9870_v53, 0.0 }
0x1227   : > { %v7532_v23 = vadd.f32 %v7531_v37, %v7530_v34 }
0x1229   : > { %v7533_v18 = vrot.slane %v7532_v23, 4 }
0x122b   : > { %v7534_v42 = vadd.f32 %v7533_v18, %v7532_v23 }
0x122d   : > { %v7535_v60 = vrot.slane %v7534_v42, 2 }
0x122f   : > { %v7536_v44 = vadd.f32 %v7535_v60, %v7534_v42 }
0x1231   : > { %v7537_v49 = vrot.slane %v7536_v44, 1 }
0x1233   : > { %v7538_v26 = vadd.f32 %v7537_v49, %v7536_v44 }
0x1235   : > { %9871 = vlog2.f32 %v7538_v26 }
0x123f   : > { %v9872_v30 = vpop.eup %9871 }
0x1240   : > { %v7540_v32 = vmul.f32 0.6931472, %v9872_v30 }
0x1242   : > { %v7541_v46 = vsub.f32 %v7524_v22, %v7540_v32  ;;  %v7542_v4 = vsub.f32 %v7525_v13, %v7540_v32 }
0x1244   : > { %7543 = vst.msk [vmem:[%s1125_s1] sm:$0xff] %vm7513_vm5, %v7541_v46 }
0x1245   : > { %7544 = vst.msk [vmem:[%s1125_s1 + $0x8] sm:$0x3] %vm7515_vm6, %v7542_v4 }
0x1246 PF: > { %s82_s7 = sadd.s32 1, %s10125_s7  }
0x1247   : > { %p79_p1 = scmp.ge.s32.totalorder %s82_s7, 4  }
0x1249   :  { %81 = sbr.rel (!%p79_p1) target bundleno = 58 (0x3a), region = 248 }
0x1250   :  { %7566 = vsyncpa [#allocation3], 1 }
0x1251   :  { %7568 = vsyncpa [#allocation3 + $0x1], 1 }
0x1252   :  { %7569 = vsyncpa [#allocation5], 1 }
0x1253   :  { %7570 = vsyncpa [#allocation8], 1 }
0x1254   :  { %7571 = vsyncpa [#allocation11], 1 }
0x1255   :  { %7572 = vsyncpa [#allocation14], 1 }

</bundles_post_ra>
